<compile_context>
chip_gen: v7x
topology: tpu7x:2x2x1
jax: 0.10.0
libtpu: 0.0.40
codegen_flags: <defaults>
</compile_context>

<pallas_src>
import jax
import jax.numpy as jnp
from jax import lax
from jax.experimental import pallas as pl
from jax.experimental.pallas import tpu as pltpu


def _odelstm_kernel(dt_ref,                       # (T-1,)   SMEM  time deltas
                    x_ref, h_ref, c_ref,          # (obs,Bb) (H,Bb) (H,Bb) VMEM
                    wf1_ref, bf1_ref,             # (H,H)=w_f1^T  (H,1)
                    wf2_ref, bf2_ref,             # (H,H)=w_f2^T  (H,1)
                    wx_ref, wh_ref, bi_ref,       # (H,obs) (H,H) (H,1)   i2h
                    wo_ref, bo_ref,               # (2L,H) (2L,1)         h2o
                    out_ref, h_out_ref, c_out_ref):   # (2L,Bb) (H,Bb) (H,Bb)
    f32 = jnp.float32
    H, Bb = h_ref.shape

    # Hoist loop-invariant weight loads and bias broadcasts out of the
    # unrolled RK4 loop (broadcast_in_dim is not CSE'd by JAX).
    wf1 = wf1_ref[...]
    wf2 = wf2_ref[...]
    bf1 = jnp.broadcast_to(bf1_ref[...], (H, Bb))
    bf2 = jnp.broadcast_to(bf2_ref[...], (H, Bb))

    def ode_func(hv):
        z = jnp.tanh(jnp.dot(wf1, hv, preferred_element_type=f32) + bf1)
        return jnp.dot(wf2, z, preferred_element_type=f32) + bf2

    # ---- odeint(func, h, t)[-1]: fixed-step RK4, fully unrolled over the
    #      small compile-time-known time grid.  Incremental accumulation keeps
    #      at most ~4 (H, Bb) f32 arrays live.
    hv = h_ref[...]
    for i in range(dt_ref.shape[0]):              # static unroll (T-1 steps)
        dt = dt_ref[i]
        half = dt * 0.5
        k1 = ode_func(hv)
        acc = k1
        k2 = ode_func(hv + half * k1)
        acc = acc + 2.0 * k2
        k3 = ode_func(hv + half * k2)
        acc = acc + 2.0 * k3
        k4 = ode_func(hv + dt * k3)
        acc = acc + k4
        hv = hv + (dt * (1.0 / 6.0)) * acc

    # ---- LSTM-style cell update: i2h split into two lane-aligned matmuls
    #      (no lane-misaligned concat of x and h).
    pre = (jnp.dot(wx_ref[...], x_ref[...], preferred_element_type=f32)
           + jnp.dot(wh_ref[...], hv, preferred_element_type=f32)
           + jnp.broadcast_to(bi_ref[...], (H, Bb)))
    g = jax.nn.sigmoid(pre)                       # c_tilde == i == f == o == g

    c_new = g * c_ref[...] + g * g                # f*c + i*c_tilde
    h_new = g * jnp.tanh(c_new)                   # o*tanh(c)

    out = (jnp.dot(wo_ref[...], h_new, preferred_element_type=f32)
           + jnp.broadcast_to(bo_ref[...], (wo_ref.shape[0], Bb)))

    # Lane-dense (batch on lanes) outputs -> unmasked full-lane stores.
    out_ref[...] = out
    h_out_ref[...] = h_new
    c_out_ref[...] = c_new


def recognition_odelstm_forward(params, x, h, c, t, *, block_b=None):
    """Batched RecognitionODELSTM forward.

    x: (B, obs_dim)  rows are the already-squeezed observations x.squeeze(0)
    h: (B, nhidden), c: (B, nhidden), t: (T,)
    Returns (out, h_new, c_new) of shapes ((B, 2*latent), (B, H), (B, H)).
    """
    f32 = jnp.float32
    x = jnp.asarray(x, f32)
    h = jnp.asarray(h, f32)
    c = jnp.asarray(c, f32)
    t = jnp.asarray(t, f32)

    B, obs_dim = x.shape
    H = h.shape[-1]
    latent2 = params["b_h2o"].shape[0]

    # Batch sits on the 128-lane axis inside the kernel, so blocks are a
    # multiple of 128 rows.  Default: one fat block up to 256 rows (whole
    # problem is a few hundred KiB of VMEM); larger batches split into blocks
    # that the "parallel" grid axis shards across TensorCores on v7x.
    if block_b is None:
        block_b = min(256, ((B + 127) // 128) * 128)
    assert block_b % 128 == 0
    B_pad = ((B + block_b - 1) // block_b) * block_b

    if B_pad != B:
        pad = B_pad - B
        x = jnp.concatenate([x, jnp.zeros((pad, obs_dim), f32)], axis=0)
        h = jnp.concatenate([h, jnp.zeros((pad, H), f32)], axis=0)
        c = jnp.concatenate([c, jnp.zeros((pad, H), f32)], axis=0)

    # Transpose so batch is the last (lane) axis.
    xT = x.T                                      # (obs, B_pad)
    hT = h.T                                      # (H, B_pad)
    cT = c.T                                      # (H, B_pad)

    dt = t[1:] - t[:-1]                           # time deltas -> SMEM

    # Pre-transpose weights: kernel computes W^T @ state.
    wf1 = jnp.asarray(params["w_f1"], f32).T                 # (H, H)
    wf2 = jnp.asarray(params["w_f2"], f32).T                 # (H, H)
    wx = jnp.asarray(params["w_i2h"], f32)[:obs_dim].T       # (H, obs)
    wh = jnp.asarray(params["w_i2h"], f32)[obs_dim:].T       # (H, H)
    wo = jnp.asarray(params["w_h2o"], f32).T                 # (2L, H)
    bf1 = jnp.asarray(params["b_f1"], f32).reshape(H, 1)
    bf2 = jnp.asarray(params["b_f2"], f32).reshape(H, 1)
    bi = jnp.asarray(params["b_i2h"], f32).reshape(H, 1)
    bo = jnp.asarray(params["b_h2o"], f32).reshape(latent2, 1)

    n_blocks = B_pad // block_b
    const = lambda b: (0, 0)                      # weights: same block each step

    grid_spec = pltpu.PrefetchScalarGridSpec(
        num_scalar_prefetch=0,
        grid=(n_blocks,),
        in_specs=[
            pl.BlockSpec(memory_space=pltpu.MemorySpace.SMEM),    # dt
            pl.BlockSpec((obs_dim, block_b), lambda b: (0, b)),   # x^T
            pl.BlockSpec((H, block_b), lambda b: (0, b)),         # h^T
            pl.BlockSpec((H, block_b), lambda b: (0, b)),         # c^T
            pl.BlockSpec((H, H), const),                          # w_f1^T
            pl.BlockSpec((H, 1), const),                          # b_f1
            pl.BlockSpec((H, H), const),                          # w_f2^T
            pl.BlockSpec((H, 1), const),                          # b_f2
            pl.BlockSpec((H, obs_dim), const),                    # w_i2h_x^T
            pl.BlockSpec((H, H), const),                          # w_i2h_h^T
            pl.BlockSpec((H, 1), const),                          # b_i2h
            pl.BlockSpec((latent2, H), const),                    # w_h2o^T
            pl.BlockSpec((latent2, 1), const),                    # b_h2o
        ],
        out_specs=[
            pl.BlockSpec((latent2, block_b), lambda b: (0, b)),   # out^T
            pl.BlockSpec((H, block_b), lambda b: (0, b)),         # h_new^T
            pl.BlockSpec((H, block_b), lambda b: (0, b)),         # c_new^T
        ],
    )

    out_t, h_t, c_t = pl.pallas_call(
        _odelstm_kernel,
        out_shape=(jax.ShapeDtypeStruct((latent2, B_pad), f32),
                   jax.ShapeDtypeStruct((H, B_pad), f32),
                   jax.ShapeDtypeStruct((H, B_pad), f32)),
        grid_spec=grid_spec,
        compiler_params=pltpu.CompilerParams(
            dimension_semantics=("parallel",)),   # v7x: shard batch blocks over TCs
    )(dt, xT, hT, cT, wf1, bf1, wf2, bf2, wx, wh, bi, wo, bo)

    return out_t[:, :B].T, h_t[:, :B].T, c_t[:, :B].T


def init_params(key, latent_dim, obs_dim, nhidden):
    """Deterministic synthetic parameters (weights stored as (in, out))."""
    ks = jax.random.split(key, 8)
    s = 0.1
    return {
        # ODE dynamics func: h' = tanh(h @ w_f1 + b_f1) @ w_f2 + b_f2
        "w_f1": s * jax.random.normal(ks[0], (nhidden, nhidden), jnp.float32),
        "b_f1": s * jax.random.normal(ks[1], (nhidden,), jnp.float32),
        "w_f2": s * jax.random.normal(ks[2], (nhidden, nhidden), jnp.float32),
        "b_f2": s * jax.random.normal(ks[3], (nhidden,), jnp.float32),
        # i2h: Linear(obs_dim + nhidden -> nhidden)
        "w_i2h": s * jax.random.normal(ks[4], (obs_dim + nhidden, nhidden), jnp.float32),
        "b_i2h": s * jax.random.normal(ks[5], (nhidden,), jnp.float32),
        # h2o: Linear(nhidden -> latent_dim * 2)
        "w_h2o": s * jax.random.normal(ks[6], (nhidden, latent_dim * 2), jnp.float32),
        "b_h2o": jnp.zeros((latent_dim * 2,), jnp.float32),
    }


def reference_forward(params, x, h, c, t):
    """Pure-JAX f32 reference (same RK4 discretization), batched over rows."""
    P = lax.Precision.HIGHEST

    def ode_func(hv):
        z = jnp.tanh(jnp.dot(hv, params["w_f1"], precision=P) + params["b_f1"])
        return jnp.dot(z, params["w_f2"], precision=P) + params["b_f2"]

    hv = h
    dt = t[1:] - t[:-1]
    for i in range(dt.shape[0]):
        d = dt[i]
        k1 = ode_func(hv)
        k2 = ode_func(hv + 0.5 * d * k1)
        k3 = ode_func(hv + 0.5 * d * k2)
        k4 = ode_func(hv + d * k3)
        hv = hv + (d / 6.0) * (k1 + 2.0 * k2 + 2.0 * k3 + k4)

    combined = jnp.concatenate([x, hv], axis=-1)
    g = jax.nn.sigmoid(jnp.dot(combined, params["w_i2h"], precision=P)
                       + params["b_i2h"])
    c_new = g * c + g * g
    h_new = g * jnp.tanh(c_new)
    out = jnp.dot(h_new, params["w_h2o"], precision=P) + params["b_h2o"]
    return out, h_new, c_new


if __name__ == "__main__":
    latent_dim, obs_dim, nhidden, T, batch = 4, 4, 32, 8, 16

    key = jax.random.PRNGKey(0)
    kp, kx, kh, kc = jax.random.split(key, 4)

    params = init_params(kp, latent_dim, obs_dim, nhidden)
    x = jax.random.normal(kx, (batch, obs_dim), jnp.float32)   # rows = x.squeeze(0)
    h = jax.random.normal(kh, (batch, nhidden), jnp.float32)
    c = jax.random.normal(kc, (batch, nhidden), jnp.float32)
    t = jnp.linspace(0.0, 1.0, T, dtype=jnp.float32)

    out, h_new, c_new = recognition_odelstm_forward(params, x, h, c, t)
    jax.block_until_ready((out, h_new, c_new))

    assert out.shape == (batch, latent_dim * 2)
    assert h_new.shape == (batch, nhidden)
    assert c_new.shape == (batch, nhidden)

    # Validate against a pure-JAX f32 reference (same fixed-step RK4).
    ref_out, ref_h, ref_c = reference_forward(params, x, h, c, t)
    assert jnp.allclose(out, ref_out, atol=1e-2, rtol=1e-2)
    assert jnp.allclose(h_new, ref_h, atol=1e-2, rtol=1e-2)
    assert jnp.allclose(c_new, ref_c, atol=1e-2, rtol=1e-2)

    print("KERNEL_OK")
</pallas_src>

<mosaic_0001>
module attributes {stable_mosaic.version = 11 : i64} {
  func.func @_odelstm_kernel(%arg0: i32, %arg1: memref<7xf32, #tpu.memory_space<smem>>, %arg2: memref<4x128xf32, #tpu.memory_space<vmem>>, %arg3: memref<32x128xf32, #tpu.memory_space<vmem>>, %arg4: memref<32x128xf32, #tpu.memory_space<vmem>>, %arg5: memref<32x32xf32, #tpu.memory_space<vmem>>, %arg6: memref<32x1xf32, #tpu.memory_space<vmem>>, %arg7: memref<32x32xf32, #tpu.memory_space<vmem>>, %arg8: memref<32x1xf32, #tpu.memory_space<vmem>>, %arg9: memref<32x4xf32, #tpu.memory_space<vmem>>, %arg10: memref<32x32xf32, #tpu.memory_space<vmem>>, %arg11: memref<32x1xf32, #tpu.memory_space<vmem>>, %arg12: memref<8x32xf32, #tpu.memory_space<vmem>>, %arg13: memref<8x1xf32, #tpu.memory_space<vmem>>, %arg14: memref<8x128xf32, #tpu.memory_space<vmem>>, %arg15: memref<32x128xf32, #tpu.memory_space<vmem>>, %arg16: memref<32x128xf32, #tpu.memory_space<vmem>>) attributes {dimension_semantics = [#tpu.dimension_semantics<parallel>], iteration_bounds = array<i64: 1>, scalar_prefetch = 0 : i64, scratch_operands = 0 : i64, tpu.core_type = #tpu.core_type<tc>, window_params = [{transform_indices = @transform_0, window_bounds = array<i64: 7>}, {transform_indices = @transform_1, window_bounds = array<i64: 4, 128>}, {transform_indices = @transform_2, window_bounds = array<i64: 32, 128>}, {transform_indices = @transform_3, window_bounds = array<i64: 32, 128>}, {pipeline_mode = #tpu.pipeline_mode<synchronous>, transform_indices = @transform_4, window_bounds = array<i64: 32, 32>}, {pipeline_mode = #tpu.pipeline_mode<synchronous>, transform_indices = @transform_5, window_bounds = array<i64: 32, 1>}, {pipeline_mode = #tpu.pipeline_mode<synchronous>, transform_indices = @transform_6, window_bounds = array<i64: 32, 32>}, {pipeline_mode = #tpu.pipeline_mode<synchronous>, transform_indices = @transform_7, window_bounds = array<i64: 32, 1>}, {pipeline_mode = #tpu.pipeline_mode<synchronous>, transform_indices = @transform_8, window_bounds = array<i64: 32, 4>}, {pipeline_mode = #tpu.pipeline_mode<synchronous>, transform_indices = @transform_9, window_bounds = array<i64: 32, 32>}, {pipeline_mode = #tpu.pipeline_mode<synchronous>, transform_indices = @transform_10, window_bounds = array<i64: 32, 1>}, {pipeline_mode = #tpu.pipeline_mode<synchronous>, transform_indices = @transform_11, window_bounds = array<i64: 8, 32>}, {pipeline_mode = #tpu.pipeline_mode<synchronous>, transform_indices = @transform_12, window_bounds = array<i64: 8, 1>}, {transform_indices = @transform_13, window_bounds = array<i64: 8, 128>}, {transform_indices = @transform_14, window_bounds = array<i64: 32, 128>}, {transform_indices = @transform_15, window_bounds = array<i64: 32, 128>}]} {
    %c0 = arith.constant 0 : index
    %c0_0 = arith.constant 0 : index
    %0 = vector.load %arg5[%c0, %c0_0] : memref<32x32xf32, #tpu.memory_space<vmem>>, vector<32x32xf32>
    %c0_1 = arith.constant 0 : index
    %c0_2 = arith.constant 0 : index
    %1 = vector.load %arg7[%c0_1, %c0_2] : memref<32x32xf32, #tpu.memory_space<vmem>>, vector<32x32xf32>
    %c0_3 = arith.constant 0 : index
    %c0_4 = arith.constant 0 : index
    %2 = vector.load %arg6[%c0_3, %c0_4] : memref<32x1xf32, #tpu.memory_space<vmem>>, vector<32x1xf32>
    %3 = vector.shape_cast %2 : vector<32x1xf32> to vector<32x1xf32>
    %4 = vector.broadcast %3 : vector<32x1xf32> to vector<32x128xf32>
    %c0_5 = arith.constant 0 : index
    %c0_6 = arith.constant 0 : index
    %5 = vector.load %arg8[%c0_5, %c0_6] : memref<32x1xf32, #tpu.memory_space<vmem>>, vector<32x1xf32>
    %6 = vector.shape_cast %5 : vector<32x1xf32> to vector<32x1xf32>
    %7 = vector.broadcast %6 : vector<32x1xf32> to vector<32x128xf32>
    %c0_7 = arith.constant 0 : index
    %c0_8 = arith.constant 0 : index
    %8 = vector.load %arg3[%c0_7, %c0_8] : memref<32x128xf32, #tpu.memory_space<vmem>>, vector<32x128xf32>
    %c0_9 = arith.constant 0 : index
    %9 = memref.load %arg1[%c0_9] : memref<7xf32, #tpu.memory_space<smem>>
    %cst = arith.constant 5.000000e-01 : f32
    %10 = arith.mulf %9, %cst : f32
    %cst_10 = arith.constant dense<0.000000e+00> : vector<32x128xf32>
    %11 = tpu.matmul %0, %8, %cst_10 {dimension_numbers = #tpu.dot_dimension_numbers<[1], [0], [0], [1], [0, 0, 1, 1], [], []>} : vector<32x32xf32>, vector<32x128xf32>, vector<32x128xf32> -> vector<32x128xf32>
    %12 = arith.addf %11, %4 : vector<32x128xf32>
    %13 = math.tanh %12 : vector<32x128xf32>
    %cst_11 = arith.constant dense<0.000000e+00> : vector<32x128xf32>
    %14 = tpu.matmul %1, %13, %cst_11 {dimension_numbers = #tpu.dot_dimension_numbers<[1], [0], [0], [1], [0, 0, 1, 1], [], []>} : vector<32x32xf32>, vector<32x128xf32>, vector<32x128xf32> -> vector<32x128xf32>
    %15 = arith.addf %14, %7 : vector<32x128xf32>
    %16 = vector.broadcast %10 : f32 to vector<32x128xf32>
    %17 = arith.mulf %16, %15 : vector<32x128xf32>
    %18 = arith.addf %8, %17 : vector<32x128xf32>
    %cst_12 = arith.constant dense<0.000000e+00> : vector<32x128xf32>
    %19 = tpu.matmul %0, %18, %cst_12 {dimension_numbers = #tpu.dot_dimension_numbers<[1], [0], [0], [1], [0, 0, 1, 1], [], []>} : vector<32x32xf32>, vector<32x128xf32>, vector<32x128xf32> -> vector<32x128xf32>
    %20 = arith.addf %19, %4 : vector<32x128xf32>
    %21 = math.tanh %20 : vector<32x128xf32>
    %cst_13 = arith.constant dense<0.000000e+00> : vector<32x128xf32>
    %22 = tpu.matmul %1, %21, %cst_13 {dimension_numbers = #tpu.dot_dimension_numbers<[1], [0], [0], [1], [0, 0, 1, 1], [], []>} : vector<32x32xf32>, vector<32x128xf32>, vector<32x128xf32> -> vector<32x128xf32>
    %23 = arith.addf %22, %7 : vector<32x128xf32>
    %cst_14 = arith.constant 2.000000e+00 : f32
    %24 = vector.broadcast %cst_14 : f32 to vector<32x128xf32>
    %25 = arith.mulf %24, %23 : vector<32x128xf32>
    %26 = arith.addf %15, %25 : vector<32x128xf32>
    %27 = vector.broadcast %10 : f32 to vector<32x128xf32>
    %28 = arith.mulf %27, %23 : vector<32x128xf32>
    %29 = arith.addf %8, %28 : vector<32x128xf32>
    %cst_15 = arith.constant dense<0.000000e+00> : vector<32x128xf32>
    %30 = tpu.matmul %0, %29, %cst_15 {dimension_numbers = #tpu.dot_dimension_numbers<[1], [0], [0], [1], [0, 0, 1, 1], [], []>} : vector<32x32xf32>, vector<32x128xf32>, vector<32x128xf32> -> vector<32x128xf32>
    %31 = arith.addf %30, %4 : vector<32x128xf32>
    %32 = math.tanh %31 : vector<32x128xf32>
    %cst_16 = arith.constant dense<0.000000e+00> : vector<32x128xf32>
    %33 = tpu.matmul %1, %32, %cst_16 {dimension_numbers = #tpu.dot_dimension_numbers<[1], [0], [0], [1], [0, 0, 1, 1], [], []>} : vector<32x32xf32>, vector<32x128xf32>, vector<32x128xf32> -> vector<32x128xf32>
    %34 = arith.addf %33, %7 : vector<32x128xf32>
    %cst_17 = arith.constant 2.000000e+00 : f32
    %35 = vector.broadcast %cst_17 : f32 to vector<32x128xf32>
    %36 = arith.mulf %35, %34 : vector<32x128xf32>
    %37 = arith.addf %26, %36 : vector<32x128xf32>
    %38 = vector.broadcast %9 : f32 to vector<32x128xf32>
    %39 = arith.mulf %38, %34 : vector<32x128xf32>
    %40 = arith.addf %8, %39 : vector<32x128xf32>
    %cst_18 = arith.constant dense<0.000000e+00> : vector<32x128xf32>
    %41 = tpu.matmul %0, %40, %cst_18 {dimension_numbers = #tpu.dot_dimension_numbers<[1], [0], [0], [1], [0, 0, 1, 1], [], []>} : vector<32x32xf32>, vector<32x128xf32>, vector<32x128xf32> -> vector<32x128xf32>
    %42 = arith.addf %41, %4 : vector<32x128xf32>
    %43 = math.tanh %42 : vector<32x128xf32>
    %cst_19 = arith.constant dense<0.000000e+00> : vector<32x128xf32>
    %44 = tpu.matmul %1, %43, %cst_19 {dimension_numbers = #tpu.dot_dimension_numbers<[1], [0], [0], [1], [0, 0, 1, 1], [], []>} : vector<32x32xf32>, vector<32x128xf32>, vector<32x128xf32> -> vector<32x128xf32>
    %45 = arith.addf %44, %7 : vector<32x128xf32>
    %46 = arith.addf %37, %45 : vector<32x128xf32>
    %cst_20 = arith.constant 0.166666672 : f32
    %47 = arith.mulf %9, %cst_20 : f32
    %48 = vector.broadcast %47 : f32 to vector<32x128xf32>
    %49 = arith.mulf %48, %46 : vector<32x128xf32>
    %50 = arith.addf %8, %49 : vector<32x128xf32>
    %c1 = arith.constant 1 : index
    %51 = memref.load %arg1[%c1] : memref<7xf32, #tpu.memory_space<smem>>
    %cst_21 = arith.constant 5.000000e-01 : f32
    %52 = arith.mulf %51, %cst_21 : f32
    %cst_22 = arith.constant dense<0.000000e+00> : vector<32x128xf32>
    %53 = tpu.matmul %0, %50, %cst_22 {dimension_numbers = #tpu.dot_dimension_numbers<[1], [0], [0], [1], [0, 0, 1, 1], [], []>} : vector<32x32xf32>, vector<32x128xf32>, vector<32x128xf32> -> vector<32x128xf32>
    %54 = arith.addf %53, %4 : vector<32x128xf32>
    %55 = math.tanh %54 : vector<32x128xf32>
    %cst_23 = arith.constant dense<0.000000e+00> : vector<32x128xf32>
    %56 = tpu.matmul %1, %55, %cst_23 {dimension_numbers = #tpu.dot_dimension_numbers<[1], [0], [0], [1], [0, 0, 1, 1], [], []>} : vector<32x32xf32>, vector<32x128xf32>, vector<32x128xf32> -> vector<32x128xf32>
    %57 = arith.addf %56, %7 : vector<32x128xf32>
    %58 = vector.broadcast %52 : f32 to vector<32x128xf32>
    %59 = arith.mulf %58, %57 : vector<32x128xf32>
    %60 = arith.addf %50, %59 : vector<32x128xf32>
    %cst_24 = arith.constant dense<0.000000e+00> : vector<32x128xf32>
    %61 = tpu.matmul %0, %60, %cst_24 {dimension_numbers = #tpu.dot_dimension_numbers<[1], [0], [0], [1], [0, 0, 1, 1], [], []>} : vector<32x32xf32>, vector<32x128xf32>, vector<32x128xf32> -> vector<32x128xf32>
    %62 = arith.addf %61, %4 : vector<32x128xf32>
    %63 = math.tanh %62 : vector<32x128xf32>
    %cst_25 = arith.constant dense<0.000000e+00> : vector<32x128xf32>
    %64 = tpu.matmul %1, %63, %cst_25 {dimension_numbers = #tpu.dot_dimension_numbers<[1], [0], [0], [1], [0, 0, 1, 1], [], []>} : vector<32x32xf32>, vector<32x128xf32>, vector<32x128xf32> -> vector<32x128xf32>
    %65 = arith.addf %64, %7 : vector<32x128xf32>
    %cst_26 = arith.constant 2.000000e+00 : f32
    %66 = vector.broadcast %cst_26 : f32 to vector<32x128xf32>
    %67 = arith.mulf %66, %65 : vector<32x128xf32>
    %68 = arith.addf %57, %67 : vector<32x128xf32>
    %69 = vector.broadcast %52 : f32 to vector<32x128xf32>
    %70 = arith.mulf %69, %65 : vector<32x128xf32>
    %71 = arith.addf %50, %70 : vector<32x128xf32>
    %cst_27 = arith.constant dense<0.000000e+00> : vector<32x128xf32>
    %72 = tpu.matmul %0, %71, %cst_27 {dimension_numbers = #tpu.dot_dimension_numbers<[1], [0], [0], [1], [0, 0, 1, 1], [], []>} : vector<32x32xf32>, vector<32x128xf32>, vector<32x128xf32> -> vector<32x128xf32>
    %73 = arith.addf %72, %4 : vector<32x128xf32>
    %74 = math.tanh %73 : vector<32x128xf32>
    %cst_28 = arith.constant dense<0.000000e+00> : vector<32x128xf32>
    %75 = tpu.matmul %1, %74, %cst_28 {dimension_numbers = #tpu.dot_dimension_numbers<[1], [0], [0], [1], [0, 0, 1, 1], [], []>} : vector<32x32xf32>, vector<32x128xf32>, vector<32x128xf32> -> vector<32x128xf32>
    %76 = arith.addf %75, %7 : vector<32x128xf32>
    %cst_29 = arith.constant 2.000000e+00 : f32
    %77 = vector.broadcast %cst_29 : f32 to vector<32x128xf32>
    %78 = arith.mulf %77, %76 : vector<32x128xf32>
    %79 = arith.addf %68, %78 : vector<32x128xf32>
    %80 = vector.broadcast %51 : f32 to vector<32x128xf32>
    %81 = arith.mulf %80, %76 : vector<32x128xf32>
    %82 = arith.addf %50, %81 : vector<32x128xf32>
    %cst_30 = arith.constant dense<0.000000e+00> : vector<32x128xf32>
    %83 = tpu.matmul %0, %82, %cst_30 {dimension_numbers = #tpu.dot_dimension_numbers<[1], [0], [0], [1], [0, 0, 1, 1], [], []>} : vector<32x32xf32>, vector<32x128xf32>, vector<32x128xf32> -> vector<32x128xf32>
    %84 = arith.addf %83, %4 : vector<32x128xf32>
    %85 = math.tanh %84 : vector<32x128xf32>
    %cst_31 = arith.constant dense<0.000000e+00> : vector<32x128xf32>
    %86 = tpu.matmul %1, %85, %cst_31 {dimension_numbers = #tpu.dot_dimension_numbers<[1], [0], [0], [1], [0, 0, 1, 1], [], []>} : vector<32x32xf32>, vector<32x128xf32>, vector<32x128xf32> -> vector<32x128xf32>
    %87 = arith.addf %86, %7 : vector<32x128xf32>
    %88 = arith.addf %79, %87 : vector<32x128xf32>
    %cst_32 = arith.constant 0.166666672 : f32
    %89 = arith.mulf %51, %cst_32 : f32
    %90 = vector.broadcast %89 : f32 to vector<32x128xf32>
    %91 = arith.mulf %90, %88 : vector<32x128xf32>
    %92 = arith.addf %50, %91 : vector<32x128xf32>
    %c2 = arith.constant 2 : index
    %93 = memref.load %arg1[%c2] : memref<7xf32, #tpu.memory_space<smem>>
    %cst_33 = arith.constant 5.000000e-01 : f32
    %94 = arith.mulf %93, %cst_33 : f32
    %cst_34 = arith.constant dense<0.000000e+00> : vector<32x128xf32>
    %95 = tpu.matmul %0, %92, %cst_34 {dimension_numbers = #tpu.dot_dimension_numbers<[1], [0], [0], [1], [0, 0, 1, 1], [], []>} : vector<32x32xf32>, vector<32x128xf32>, vector<32x128xf32> -> vector<32x128xf32>
    %96 = arith.addf %95, %4 : vector<32x128xf32>
    %97 = math.tanh %96 : vector<32x128xf32>
    %cst_35 = arith.constant dense<0.000000e+00> : vector<32x128xf32>
    %98 = tpu.matmul %1, %97, %cst_35 {dimension_numbers = #tpu.dot_dimension_numbers<[1], [0], [0], [1], [0, 0, 1, 1], [], []>} : vector<32x32xf32>, vector<32x128xf32>, vector<32x128xf32> -> vector<32x128xf32>
    %99 = arith.addf %98, %7 : vector<32x128xf32>
    %100 = vector.broadcast %94 : f32 to vector<32x128xf32>
    %101 = arith.mulf %100, %99 : vector<32x128xf32>
    %102 = arith.addf %92, %101 : vector<32x128xf32>
    %cst_36 = arith.constant dense<0.000000e+00> : vector<32x128xf32>
    %103 = tpu.matmul %0, %102, %cst_36 {dimension_numbers = #tpu.dot_dimension_numbers<[1], [0], [0], [1], [0, 0, 1, 1], [], []>} : vector<32x32xf32>, vector<32x128xf32>, vector<32x128xf32> -> vector<32x128xf32>
    %104 = arith.addf %103, %4 : vector<32x128xf32>
    %105 = math.tanh %104 : vector<32x128xf32>
    %cst_37 = arith.constant dense<0.000000e+00> : vector<32x128xf32>
    %106 = tpu.matmul %1, %105, %cst_37 {dimension_numbers = #tpu.dot_dimension_numbers<[1], [0], [0], [1], [0, 0, 1, 1], [], []>} : vector<32x32xf32>, vector<32x128xf32>, vector<32x128xf32> -> vector<32x128xf32>
    %107 = arith.addf %106, %7 : vector<32x128xf32>
    %cst_38 = arith.constant 2.000000e+00 : f32
    %108 = vector.broadcast %cst_38 : f32 to vector<32x128xf32>
    %109 = arith.mulf %108, %107 : vector<32x128xf32>
    %110 = arith.addf %99, %109 : vector<32x128xf32>
    %111 = vector.broadcast %94 : f32 to vector<32x128xf32>
    %112 = arith.mulf %111, %107 : vector<32x128xf32>
    %113 = arith.addf %92, %112 : vector<32x128xf32>
    %cst_39 = arith.constant dense<0.000000e+00> : vector<32x128xf32>
    %114 = tpu.matmul %0, %113, %cst_39 {dimension_numbers = #tpu.dot_dimension_numbers<[1], [0], [0], [1], [0, 0, 1, 1], [], []>} : vector<32x32xf32>, vector<32x128xf32>, vector<32x128xf32> -> vector<32x128xf32>
    %115 = arith.addf %114, %4 : vector<32x128xf32>
    %116 = math.tanh %115 : vector<32x128xf32>
    %cst_40 = arith.constant dense<0.000000e+00> : vector<32x128xf32>
    %117 = tpu.matmul %1, %116, %cst_40 {dimension_numbers = #tpu.dot_dimension_numbers<[1], [0], [0], [1], [0, 0, 1, 1], [], []>} : vector<32x32xf32>, vector<32x128xf32>, vector<32x128xf32> -> vector<32x128xf32>
    %118 = arith.addf %117, %7 : vector<32x128xf32>
    %cst_41 = arith.constant 2.000000e+00 : f32
    %119 = vector.broadcast %cst_41 : f32 to vector<32x128xf32>
    %120 = arith.mulf %119, %118 : vector<32x128xf32>
    %121 = arith.addf %110, %120 : vector<32x128xf32>
    %122 = vector.broadcast %93 : f32 to vector<32x128xf32>
    %123 = arith.mulf %122, %118 : vector<32x128xf32>
    %124 = arith.addf %92, %123 : vector<32x128xf32>
    %cst_42 = arith.constant dense<0.000000e+00> : vector<32x128xf32>
    %125 = tpu.matmul %0, %124, %cst_42 {dimension_numbers = #tpu.dot_dimension_numbers<[1], [0], [0], [1], [0, 0, 1, 1], [], []>} : vector<32x32xf32>, vector<32x128xf32>, vector<32x128xf32> -> vector<32x128xf32>
    %126 = arith.addf %125, %4 : vector<32x128xf32>
    %127 = math.tanh %126 : vector<32x128xf32>
    %cst_43 = arith.constant dense<0.000000e+00> : vector<32x128xf32>
    %128 = tpu.matmul %1, %127, %cst_43 {dimension_numbers = #tpu.dot_dimension_numbers<[1], [0], [0], [1], [0, 0, 1, 1], [], []>} : vector<32x32xf32>, vector<32x128xf32>, vector<32x128xf32> -> vector<32x128xf32>
    %129 = arith.addf %128, %7 : vector<32x128xf32>
    %130 = arith.addf %121, %129 : vector<32x128xf32>
    %cst_44 = arith.constant 0.166666672 : f32
    %131 = arith.mulf %93, %cst_44 : f32
    %132 = vector.broadcast %131 : f32 to vector<32x128xf32>
    %133 = arith.mulf %132, %130 : vector<32x128xf32>
    %134 = arith.addf %92, %133 : vector<32x128xf32>
    %c3 = arith.constant 3 : index
    %135 = memref.load %arg1[%c3] : memref<7xf32, #tpu.memory_space<smem>>
    %cst_45 = arith.constant 5.000000e-01 : f32
    %136 = arith.mulf %135, %cst_45 : f32
    %cst_46 = arith.constant dense<0.000000e+00> : vector<32x128xf32>
    %137 = tpu.matmul %0, %134, %cst_46 {dimension_numbers = #tpu.dot_dimension_numbers<[1], [0], [0], [1], [0, 0, 1, 1], [], []>} : vector<32x32xf32>, vector<32x128xf32>, vector<32x128xf32> -> vector<32x128xf32>
    %138 = arith.addf %137, %4 : vector<32x128xf32>
    %139 = math.tanh %138 : vector<32x128xf32>
    %cst_47 = arith.constant dense<0.000000e+00> : vector<32x128xf32>
    %140 = tpu.matmul %1, %139, %cst_47 {dimension_numbers = #tpu.dot_dimension_numbers<[1], [0], [0], [1], [0, 0, 1, 1], [], []>} : vector<32x32xf32>, vector<32x128xf32>, vector<32x128xf32> -> vector<32x128xf32>
    %141 = arith.addf %140, %7 : vector<32x128xf32>
    %142 = vector.broadcast %136 : f32 to vector<32x128xf32>
    %143 = arith.mulf %142, %141 : vector<32x128xf32>
    %144 = arith.addf %134, %143 : vector<32x128xf32>
    %cst_48 = arith.constant dense<0.000000e+00> : vector<32x128xf32>
    %145 = tpu.matmul %0, %144, %cst_48 {dimension_numbers = #tpu.dot_dimension_numbers<[1], [0], [0], [1], [0, 0, 1, 1], [], []>} : vector<32x32xf32>, vector<32x128xf32>, vector<32x128xf32> -> vector<32x128xf32>
    %146 = arith.addf %145, %4 : vector<32x128xf32>
    %147 = math.tanh %146 : vector<32x128xf32>
    %cst_49 = arith.constant dense<0.000000e+00> : vector<32x128xf32>
    %148 = tpu.matmul %1, %147, %cst_49 {dimension_numbers = #tpu.dot_dimension_numbers<[1], [0], [0], [1], [0, 0, 1, 1], [], []>} : vector<32x32xf32>, vector<32x128xf32>, vector<32x128xf32> -> vector<32x128xf32>
    %149 = arith.addf %148, %7 : vector<32x128xf32>
    %cst_50 = arith.constant 2.000000e+00 : f32
    %150 = vector.broadcast %cst_50 : f32 to vector<32x128xf32>
    %151 = arith.mulf %150, %149 : vector<32x128xf32>
    %152 = arith.addf %141, %151 : vector<32x128xf32>
    %153 = vector.broadcast %136 : f32 to vector<32x128xf32>
    %154 = arith.mulf %153, %149 : vector<32x128xf32>
    %155 = arith.addf %134, %154 : vector<32x128xf32>
    %cst_51 = arith.constant dense<0.000000e+00> : vector<32x128xf32>
    %156 = tpu.matmul %0, %155, %cst_51 {dimension_numbers = #tpu.dot_dimension_numbers<[1], [0], [0], [1], [0, 0, 1, 1], [], []>} : vector<32x32xf32>, vector<32x128xf32>, vector<32x128xf32> -> vector<32x128xf32>
    %157 = arith.addf %156, %4 : vector<32x128xf32>
    %158 = math.tanh %157 : vector<32x128xf32>
    %cst_52 = arith.constant dense<0.000000e+00> : vector<32x128xf32>
    %159 = tpu.matmul %1, %158, %cst_52 {dimension_numbers = #tpu.dot_dimension_numbers<[1], [0], [0], [1], [0, 0, 1, 1], [], []>} : vector<32x32xf32>, vector<32x128xf32>, vector<32x128xf32> -> vector<32x128xf32>
    %160 = arith.addf %159, %7 : vector<32x128xf32>
    %cst_53 = arith.constant 2.000000e+00 : f32
    %161 = vector.broadcast %cst_53 : f32 to vector<32x128xf32>
    %162 = arith.mulf %161, %160 : vector<32x128xf32>
    %163 = arith.addf %152, %162 : vector<32x128xf32>
    %164 = vector.broadcast %135 : f32 to vector<32x128xf32>
    %165 = arith.mulf %164, %160 : vector<32x128xf32>
    %166 = arith.addf %134, %165 : vector<32x128xf32>
    %cst_54 = arith.constant dense<0.000000e+00> : vector<32x128xf32>
    %167 = tpu.matmul %0, %166, %cst_54 {dimension_numbers = #tpu.dot_dimension_numbers<[1], [0], [0], [1], [0, 0, 1, 1], [], []>} : vector<32x32xf32>, vector<32x128xf32>, vector<32x128xf32> -> vector<32x128xf32>
    %168 = arith.addf %167, %4 : vector<32x128xf32>
    %169 = math.tanh %168 : vector<32x128xf32>
    %cst_55 = arith.constant dense<0.000000e+00> : vector<32x128xf32>
    %170 = tpu.matmul %1, %169, %cst_55 {dimension_numbers = #tpu.dot_dimension_numbers<[1], [0], [0], [1], [0, 0, 1, 1], [], []>} : vector<32x32xf32>, vector<32x128xf32>, vector<32x128xf32> -> vector<32x128xf32>
    %171 = arith.addf %170, %7 : vector<32x128xf32>
    %172 = arith.addf %163, %171 : vector<32x128xf32>
    %cst_56 = arith.constant 0.166666672 : f32
    %173 = arith.mulf %135, %cst_56 : f32
    %174 = vector.broadcast %173 : f32 to vector<32x128xf32>
    %175 = arith.mulf %174, %172 : vector<32x128xf32>
    %176 = arith.addf %134, %175 : vector<32x128xf32>
    %c4 = arith.constant 4 : index
    %177 = memref.load %arg1[%c4] : memref<7xf32, #tpu.memory_space<smem>>
    %cst_57 = arith.constant 5.000000e-01 : f32
    %178 = arith.mulf %177, %cst_57 : f32
    %cst_58 = arith.constant dense<0.000000e+00> : vector<32x128xf32>
    %179 = tpu.matmul %0, %176, %cst_58 {dimension_numbers = #tpu.dot_dimension_numbers<[1], [0], [0], [1], [0, 0, 1, 1], [], []>} : vector<32x32xf32>, vector<32x128xf32>, vector<32x128xf32> -> vector<32x128xf32>
    %180 = arith.addf %179, %4 : vector<32x128xf32>
    %181 = math.tanh %180 : vector<32x128xf32>
    %cst_59 = arith.constant dense<0.000000e+00> : vector<32x128xf32>
    %182 = tpu.matmul %1, %181, %cst_59 {dimension_numbers = #tpu.dot_dimension_numbers<[1], [0], [0], [1], [0, 0, 1, 1], [], []>} : vector<32x32xf32>, vector<32x128xf32>, vector<32x128xf32> -> vector<32x128xf32>
    %183 = arith.addf %182, %7 : vector<32x128xf32>
    %184 = vector.broadcast %178 : f32 to vector<32x128xf32>
    %185 = arith.mulf %184, %183 : vector<32x128xf32>
    %186 = arith.addf %176, %185 : vector<32x128xf32>
    %cst_60 = arith.constant dense<0.000000e+00> : vector<32x128xf32>
    %187 = tpu.matmul %0, %186, %cst_60 {dimension_numbers = #tpu.dot_dimension_numbers<[1], [0], [0], [1], [0, 0, 1, 1], [], []>} : vector<32x32xf32>, vector<32x128xf32>, vector<32x128xf32> -> vector<32x128xf32>
    %188 = arith.addf %187, %4 : vector<32x128xf32>
    %189 = math.tanh %188 : vector<32x128xf32>
    %cst_61 = arith.constant dense<0.000000e+00> : vector<32x128xf32>
    %190 = tpu.matmul %1, %189, %cst_61 {dimension_numbers = #tpu.dot_dimension_numbers<[1], [0], [0], [1], [0, 0, 1, 1], [], []>} : vector<32x32xf32>, vector<32x128xf32>, vector<32x128xf32> -> vector<32x128xf32>
    %191 = arith.addf %190, %7 : vector<32x128xf32>
    %cst_62 = arith.constant 2.000000e+00 : f32
    %192 = vector.broadcast %cst_62 : f32 to vector<32x128xf32>
    %193 = arith.mulf %192, %191 : vector<32x128xf32>
    %194 = arith.addf %183, %193 : vector<32x128xf32>
    %195 = vector.broadcast %178 : f32 to vector<32x128xf32>
    %196 = arith.mulf %195, %191 : vector<32x128xf32>
    %197 = arith.addf %176, %196 : vector<32x128xf32>
    %cst_63 = arith.constant dense<0.000000e+00> : vector<32x128xf32>
    %198 = tpu.matmul %0, %197, %cst_63 {dimension_numbers = #tpu.dot_dimension_numbers<[1], [0], [0], [1], [0, 0, 1, 1], [], []>} : vector<32x32xf32>, vector<32x128xf32>, vector<32x128xf32> -> vector<32x128xf32>
    %199 = arith.addf %198, %4 : vector<32x128xf32>
    %200 = math.tanh %199 : vector<32x128xf32>
    %cst_64 = arith.constant dense<0.000000e+00> : vector<32x128xf32>
    %201 = tpu.matmul %1, %200, %cst_64 {dimension_numbers = #tpu.dot_dimension_numbers<[1], [0], [0], [1], [0, 0, 1, 1], [], []>} : vector<32x32xf32>, vector<32x128xf32>, vector<32x128xf32> -> vector<32x128xf32>
    %202 = arith.addf %201, %7 : vector<32x128xf32>
    %cst_65 = arith.constant 2.000000e+00 : f32
    %203 = vector.broadcast %cst_65 : f32 to vector<32x128xf32>
    %204 = arith.mulf %203, %202 : vector<32x128xf32>
    %205 = arith.addf %194, %204 : vector<32x128xf32>
    %206 = vector.broadcast %177 : f32 to vector<32x128xf32>
    %207 = arith.mulf %206, %202 : vector<32x128xf32>
    %208 = arith.addf %176, %207 : vector<32x128xf32>
    %cst_66 = arith.constant dense<0.000000e+00> : vector<32x128xf32>
    %209 = tpu.matmul %0, %208, %cst_66 {dimension_numbers = #tpu.dot_dimension_numbers<[1], [0], [0], [1], [0, 0, 1, 1], [], []>} : vector<32x32xf32>, vector<32x128xf32>, vector<32x128xf32> -> vector<32x128xf32>
    %210 = arith.addf %209, %4 : vector<32x128xf32>
    %211 = math.tanh %210 : vector<32x128xf32>
    %cst_67 = arith.constant dense<0.000000e+00> : vector<32x128xf32>
    %212 = tpu.matmul %1, %211, %cst_67 {dimension_numbers = #tpu.dot_dimension_numbers<[1], [0], [0], [1], [0, 0, 1, 1], [], []>} : vector<32x32xf32>, vector<32x128xf32>, vector<32x128xf32> -> vector<32x128xf32>
    %213 = arith.addf %212, %7 : vector<32x128xf32>
    %214 = arith.addf %205, %213 : vector<32x128xf32>
    %cst_68 = arith.constant 0.166666672 : f32
    %215 = arith.mulf %177, %cst_68 : f32
    %216 = vector.broadcast %215 : f32 to vector<32x128xf32>
    %217 = arith.mulf %216, %214 : vector<32x128xf32>
    %218 = arith.addf %176, %217 : vector<32x128xf32>
    %c5 = arith.constant 5 : index
    %219 = memref.load %arg1[%c5] : memref<7xf32, #tpu.memory_space<smem>>
    %cst_69 = arith.constant 5.000000e-01 : f32
    %220 = arith.mulf %219, %cst_69 : f32
    %cst_70 = arith.constant dense<0.000000e+00> : vector<32x128xf32>
    %221 = tpu.matmul %0, %218, %cst_70 {dimension_numbers = #tpu.dot_dimension_numbers<[1], [0], [0], [1], [0, 0, 1, 1], [], []>} : vector<32x32xf32>, vector<32x128xf32>, vector<32x128xf32> -> vector<32x128xf32>
    %222 = arith.addf %221, %4 : vector<32x128xf32>
    %223 = math.tanh %222 : vector<32x128xf32>
    %cst_71 = arith.constant dense<0.000000e+00> : vector<32x128xf32>
    %224 = tpu.matmul %1, %223, %cst_71 {dimension_numbers = #tpu.dot_dimension_numbers<[1], [0], [0], [1], [0, 0, 1, 1], [], []>} : vector<32x32xf32>, vector<32x128xf32>, vector<32x128xf32> -> vector<32x128xf32>
    %225 = arith.addf %224, %7 : vector<32x128xf32>
    %226 = vector.broadcast %220 : f32 to vector<32x128xf32>
    %227 = arith.mulf %226, %225 : vector<32x128xf32>
    %228 = arith.addf %218, %227 : vector<32x128xf32>
    %cst_72 = arith.constant dense<0.000000e+00> : vector<32x128xf32>
    %229 = tpu.matmul %0, %228, %cst_72 {dimension_numbers = #tpu.dot_dimension_numbers<[1], [0], [0], [1], [0, 0, 1, 1], [], []>} : vector<32x32xf32>, vector<32x128xf32>, vector<32x128xf32> -> vector<32x128xf32>
    %230 = arith.addf %229, %4 : vector<32x128xf32>
    %231 = math.tanh %230 : vector<32x128xf32>
    %cst_73 = arith.constant dense<0.000000e+00> : vector<32x128xf32>
    %232 = tpu.matmul %1, %231, %cst_73 {dimension_numbers = #tpu.dot_dimension_numbers<[1], [0], [0], [1], [0, 0, 1, 1], [], []>} : vector<32x32xf32>, vector<32x128xf32>, vector<32x128xf32> -> vector<32x128xf32>
    %233 = arith.addf %232, %7 : vector<32x128xf32>
    %cst_74 = arith.constant 2.000000e+00 : f32
    %234 = vector.broadcast %cst_74 : f32 to vector<32x128xf32>
    %235 = arith.mulf %234, %233 : vector<32x128xf32>
    %236 = arith.addf %225, %235 : vector<32x128xf32>
    %237 = vector.broadcast %220 : f32 to vector<32x128xf32>
    %238 = arith.mulf %237, %233 : vector<32x128xf32>
    %239 = arith.addf %218, %238 : vector<32x128xf32>
    %cst_75 = arith.constant dense<0.000000e+00> : vector<32x128xf32>
    %240 = tpu.matmul %0, %239, %cst_75 {dimension_numbers = #tpu.dot_dimension_numbers<[1], [0], [0], [1], [0, 0, 1, 1], [], []>} : vector<32x32xf32>, vector<32x128xf32>, vector<32x128xf32> -> vector<32x128xf32>
    %241 = arith.addf %240, %4 : vector<32x128xf32>
    %242 = math.tanh %241 : vector<32x128xf32>
    %cst_76 = arith.constant dense<0.000000e+00> : vector<32x128xf32>
    %243 = tpu.matmul %1, %242, %cst_76 {dimension_numbers = #tpu.dot_dimension_numbers<[1], [0], [0], [1], [0, 0, 1, 1], [], []>} : vector<32x32xf32>, vector<32x128xf32>, vector<32x128xf32> -> vector<32x128xf32>
    %244 = arith.addf %243, %7 : vector<32x128xf32>
    %cst_77 = arith.constant 2.000000e+00 : f32
    %245 = vector.broadcast %cst_77 : f32 to vector<32x128xf32>
    %246 = arith.mulf %245, %244 : vector<32x128xf32>
    %247 = arith.addf %236, %246 : vector<32x128xf32>
    %248 = vector.broadcast %219 : f32 to vector<32x128xf32>
    %249 = arith.mulf %248, %244 : vector<32x128xf32>
    %250 = arith.addf %218, %249 : vector<32x128xf32>
    %cst_78 = arith.constant dense<0.000000e+00> : vector<32x128xf32>
    %251 = tpu.matmul %0, %250, %cst_78 {dimension_numbers = #tpu.dot_dimension_numbers<[1], [0], [0], [1], [0, 0, 1, 1], [], []>} : vector<32x32xf32>, vector<32x128xf32>, vector<32x128xf32> -> vector<32x128xf32>
    %252 = arith.addf %251, %4 : vector<32x128xf32>
    %253 = math.tanh %252 : vector<32x128xf32>
    %cst_79 = arith.constant dense<0.000000e+00> : vector<32x128xf32>
    %254 = tpu.matmul %1, %253, %cst_79 {dimension_numbers = #tpu.dot_dimension_numbers<[1], [0], [0], [1], [0, 0, 1, 1], [], []>} : vector<32x32xf32>, vector<32x128xf32>, vector<32x128xf32> -> vector<32x128xf32>
    %255 = arith.addf %254, %7 : vector<32x128xf32>
    %256 = arith.addf %247, %255 : vector<32x128xf32>
    %cst_80 = arith.constant 0.166666672 : f32
    %257 = arith.mulf %219, %cst_80 : f32
    %258 = vector.broadcast %257 : f32 to vector<32x128xf32>
    %259 = arith.mulf %258, %256 : vector<32x128xf32>
    %260 = arith.addf %218, %259 : vector<32x128xf32>
    %c6 = arith.constant 6 : index
    %261 = memref.load %arg1[%c6] : memref<7xf32, #tpu.memory_space<smem>>
    %cst_81 = arith.constant 5.000000e-01 : f32
    %262 = arith.mulf %261, %cst_81 : f32
    %cst_82 = arith.constant dense<0.000000e+00> : vector<32x128xf32>
    %263 = tpu.matmul %0, %260, %cst_82 {dimension_numbers = #tpu.dot_dimension_numbers<[1], [0], [0], [1], [0, 0, 1, 1], [], []>} : vector<32x32xf32>, vector<32x128xf32>, vector<32x128xf32> -> vector<32x128xf32>
    %264 = arith.addf %263, %4 : vector<32x128xf32>
    %265 = math.tanh %264 : vector<32x128xf32>
    %cst_83 = arith.constant dense<0.000000e+00> : vector<32x128xf32>
    %266 = tpu.matmul %1, %265, %cst_83 {dimension_numbers = #tpu.dot_dimension_numbers<[1], [0], [0], [1], [0, 0, 1, 1], [], []>} : vector<32x32xf32>, vector<32x128xf32>, vector<32x128xf32> -> vector<32x128xf32>
    %267 = arith.addf %266, %7 : vector<32x128xf32>
    %268 = vector.broadcast %262 : f32 to vector<32x128xf32>
    %269 = arith.mulf %268, %267 : vector<32x128xf32>
    %270 = arith.addf %260, %269 : vector<32x128xf32>
    %cst_84 = arith.constant dense<0.000000e+00> : vector<32x128xf32>
    %271 = tpu.matmul %0, %270, %cst_84 {dimension_numbers = #tpu.dot_dimension_numbers<[1], [0], [0], [1], [0, 0, 1, 1], [], []>} : vector<32x32xf32>, vector<32x128xf32>, vector<32x128xf32> -> vector<32x128xf32>
    %272 = arith.addf %271, %4 : vector<32x128xf32>
    %273 = math.tanh %272 : vector<32x128xf32>
    %cst_85 = arith.constant dense<0.000000e+00> : vector<32x128xf32>
    %274 = tpu.matmul %1, %273, %cst_85 {dimension_numbers = #tpu.dot_dimension_numbers<[1], [0], [0], [1], [0, 0, 1, 1], [], []>} : vector<32x32xf32>, vector<32x128xf32>, vector<32x128xf32> -> vector<32x128xf32>
    %275 = arith.addf %274, %7 : vector<32x128xf32>
    %cst_86 = arith.constant 2.000000e+00 : f32
    %276 = vector.broadcast %cst_86 : f32 to vector<32x128xf32>
    %277 = arith.mulf %276, %275 : vector<32x128xf32>
    %278 = arith.addf %267, %277 : vector<32x128xf32>
    %279 = vector.broadcast %262 : f32 to vector<32x128xf32>
    %280 = arith.mulf %279, %275 : vector<32x128xf32>
    %281 = arith.addf %260, %280 : vector<32x128xf32>
    %cst_87 = arith.constant dense<0.000000e+00> : vector<32x128xf32>
    %282 = tpu.matmul %0, %281, %cst_87 {dimension_numbers = #tpu.dot_dimension_numbers<[1], [0], [0], [1], [0, 0, 1, 1], [], []>} : vector<32x32xf32>, vector<32x128xf32>, vector<32x128xf32> -> vector<32x128xf32>
    %283 = arith.addf %282, %4 : vector<32x128xf32>
    %284 = math.tanh %283 : vector<32x128xf32>
    %cst_88 = arith.constant dense<0.000000e+00> : vector<32x128xf32>
    %285 = tpu.matmul %1, %284, %cst_88 {dimension_numbers = #tpu.dot_dimension_numbers<[1], [0], [0], [1], [0, 0, 1, 1], [], []>} : vector<32x32xf32>, vector<32x128xf32>, vector<32x128xf32> -> vector<32x128xf32>
    %286 = arith.addf %285, %7 : vector<32x128xf32>
    %cst_89 = arith.constant 2.000000e+00 : f32
    %287 = vector.broadcast %cst_89 : f32 to vector<32x128xf32>
    %288 = arith.mulf %287, %286 : vector<32x128xf32>
    %289 = arith.addf %278, %288 : vector<32x128xf32>
    %290 = vector.broadcast %261 : f32 to vector<32x128xf32>
    %291 = arith.mulf %290, %286 : vector<32x128xf32>
    %292 = arith.addf %260, %291 : vector<32x128xf32>
    %cst_90 = arith.constant dense<0.000000e+00> : vector<32x128xf32>
    %293 = tpu.matmul %0, %292, %cst_90 {dimension_numbers = #tpu.dot_dimension_numbers<[1], [0], [0], [1], [0, 0, 1, 1], [], []>} : vector<32x32xf32>, vector<32x128xf32>, vector<32x128xf32> -> vector<32x128xf32>
    %294 = arith.addf %293, %4 : vector<32x128xf32>
    %295 = math.tanh %294 : vector<32x128xf32>
    %cst_91 = arith.constant dense<0.000000e+00> : vector<32x128xf32>
    %296 = tpu.matmul %1, %295, %cst_91 {dimension_numbers = #tpu.dot_dimension_numbers<[1], [0], [0], [1], [0, 0, 1, 1], [], []>} : vector<32x32xf32>, vector<32x128xf32>, vector<32x128xf32> -> vector<32x128xf32>
    %297 = arith.addf %296, %7 : vector<32x128xf32>
    %298 = arith.addf %289, %297 : vector<32x128xf32>
    %cst_92 = arith.constant 0.166666672 : f32
    %299 = arith.mulf %261, %cst_92 : f32
    %300 = vector.broadcast %299 : f32 to vector<32x128xf32>
    %301 = arith.mulf %300, %298 : vector<32x128xf32>
    %302 = arith.addf %260, %301 : vector<32x128xf32>
    %c0_93 = arith.constant 0 : index
    %c0_94 = arith.constant 0 : index
    %303 = vector.load %arg9[%c0_93, %c0_94] : memref<32x4xf32, #tpu.memory_space<vmem>>, vector<32x4xf32>
    %c0_95 = arith.constant 0 : index
    %c0_96 = arith.constant 0 : index
    %304 = vector.load %arg2[%c0_95, %c0_96] : memref<4x128xf32, #tpu.memory_space<vmem>>, vector<4x128xf32>
    %cst_97 = arith.constant dense<0.000000e+00> : vector<32x128xf32>
    %305 = tpu.matmul %303, %304, %cst_97 {dimension_numbers = #tpu.dot_dimension_numbers<[1], [0], [0], [1], [0, 0, 1, 1], [], []>} : vector<32x4xf32>, vector<4x128xf32>, vector<32x128xf32> -> vector<32x128xf32>
    %c0_98 = arith.constant 0 : index
    %c0_99 = arith.constant 0 : index
    %306 = vector.load %arg10[%c0_98, %c0_99] : memref<32x32xf32, #tpu.memory_space<vmem>>, vector<32x32xf32>
    %cst_100 = arith.constant dense<0.000000e+00> : vector<32x128xf32>
    %307 = tpu.matmul %306, %302, %cst_100 {dimension_numbers = #tpu.dot_dimension_numbers<[1], [0], [0], [1], [0, 0, 1, 1], [], []>} : vector<32x32xf32>, vector<32x128xf32>, vector<32x128xf32> -> vector<32x128xf32>
    %308 = arith.addf %305, %307 : vector<32x128xf32>
    %c0_101 = arith.constant 0 : index
    %c0_102 = arith.constant 0 : index
    %309 = vector.load %arg11[%c0_101, %c0_102] : memref<32x1xf32, #tpu.memory_space<vmem>>, vector<32x1xf32>
    %310 = vector.shape_cast %309 : vector<32x1xf32> to vector<32x1xf32>
    %311 = vector.broadcast %310 : vector<32x1xf32> to vector<32x128xf32>
    %312 = arith.addf %308, %311 : vector<32x128xf32>
    %313 = arith.negf %312 : vector<32x128xf32>
    %314 = math.exp %313 : vector<32x128xf32>
    %cst_103 = arith.constant 1.000000e+00 : f32
    %315 = vector.broadcast %cst_103 : f32 to vector<32x128xf32>
    %316 = arith.addf %315, %314 : vector<32x128xf32>
    %317 = arith.divf %315, %316 : vector<32x128xf32>
    %c0_104 = arith.constant 0 : index
    %c0_105 = arith.constant 0 : index
    %318 = vector.load %arg4[%c0_104, %c0_105] : memref<32x128xf32, #tpu.memory_space<vmem>>, vector<32x128xf32>
    %319 = arith.mulf %317, %318 : vector<32x128xf32>
    %320 = arith.mulf %317, %317 : vector<32x128xf32>
    %321 = arith.addf %319, %320 : vector<32x128xf32>
    %322 = math.tanh %321 : vector<32x128xf32>
    %323 = arith.mulf %317, %322 : vector<32x128xf32>
    %c0_106 = arith.constant 0 : index
    %c0_107 = arith.constant 0 : index
    %324 = vector.load %arg12[%c0_106, %c0_107] : memref<8x32xf32, #tpu.memory_space<vmem>>, vector<8x32xf32>
    %cst_108 = arith.constant dense<0.000000e+00> : vector<8x128xf32>
    %325 = tpu.matmul %324, %323, %cst_108 {dimension_numbers = #tpu.dot_dimension_numbers<[1], [0], [0], [1], [0, 0, 1, 1], [], []>} : vector<8x32xf32>, vector<32x128xf32>, vector<8x128xf32> -> vector<8x128xf32>
    %c0_109 = arith.constant 0 : index
    %c0_110 = arith.constant 0 : index
    %326 = vector.load %arg13[%c0_109, %c0_110] : memref<8x1xf32, #tpu.memory_space<vmem>>, vector<8x1xf32>
    %327 = vector.shape_cast %326 : vector<8x1xf32> to vector<8x1xf32>
    %328 = vector.broadcast %327 : vector<8x1xf32> to vector<8x128xf32>
    %329 = arith.addf %325, %328 : vector<8x128xf32>
    %c0_111 = arith.constant 0 : index
    %c0_112 = arith.constant 0 : index
    %330 = vector.load %arg14[%c0_111, %c0_112] : memref<8x128xf32, #tpu.memory_space<vmem>>, vector<8x128xf32>
    tpu.vector_store %arg14[%c0_111, %c0_112], %329 {strides = array<i32>} : memref<8x128xf32, #tpu.memory_space<vmem>>, vector<8x128xf32>,
    %c0_113 = arith.constant 0 : index
    %c0_114 = arith.constant 0 : index
    %331 = vector.load %arg15[%c0_113, %c0_114] : memref<32x128xf32, #tpu.memory_space<vmem>>, vector<32x128xf32>
    tpu.vector_store %arg15[%c0_113, %c0_114], %323 {strides = array<i32>} : memref<32x128xf32, #tpu.memory_space<vmem>>, vector<32x128xf32>,
    %c0_115 = arith.constant 0 : index
    %c0_116 = arith.constant 0 : index
    %332 = vector.load %arg16[%c0_115, %c0_116] : memref<32x128xf32, #tpu.memory_space<vmem>>, vector<32x128xf32>
    tpu.vector_store %arg16[%c0_115, %c0_116], %321 {strides = array<i32>} : memref<32x128xf32, #tpu.memory_space<vmem>>, vector<32x128xf32>,
    return
  }
  func.func @transform_0(%arg0: i32) -> i32 {
    %c0_i32 = arith.constant 0 : i32
    %c0_i32_0 = arith.constant 0 : i32
    return %c0_i32 : i32
  }
  func.func @transform_1(%arg0: i32) -> (i32, i32) {
    %c0_i32 = arith.constant 0 : i32
    %c0_i32_0 = arith.constant 0 : i32
    return %c0_i32, %arg0 : i32, i32
  }
  func.func @transform_2(%arg0: i32) -> (i32, i32) {
    %c0_i32 = arith.constant 0 : i32
    %c0_i32_0 = arith.constant 0 : i32
    return %c0_i32, %arg0 : i32, i32
  }
  func.func @transform_3(%arg0: i32) -> (i32, i32) {
    %c0_i32 = arith.constant 0 : i32
    %c0_i32_0 = arith.constant 0 : i32
    return %c0_i32, %arg0 : i32, i32
  }
  func.func @transform_4(%arg0: i32) -> (i32, i32) {
    %c0_i32 = arith.constant 0 : i32
    %c0_i32_0 = arith.constant 0 : i32
    %c0_i32_1 = arith.constant 0 : i32
    return %c0_i32, %c0_i32_0 : i32, i32
  }
  func.func @transform_5(%arg0: i32) -> (i32, i32) {
    %c0_i32 = arith.constant 0 : i32
    %c0_i32_0 = arith.constant 0 : i32
    %c0_i32_1 = arith.constant 0 : i32
    return %c0_i32, %c0_i32_0 : i32, i32
  }
  func.func @transform_6(%arg0: i32) -> (i32, i32) {
    %c0_i32 = arith.constant 0 : i32
    %c0_i32_0 = arith.constant 0 : i32
    %c0_i32_1 = arith.constant 0 : i32
    return %c0_i32, %c0_i32_0 : i32, i32
  }
  func.func @transform_7(%arg0: i32) -> (i32, i32) {
    %c0_i32 = arith.constant 0 : i32
    %c0_i32_0 = arith.constant 0 : i32
    %c0_i32_1 = arith.constant 0 : i32
    return %c0_i32, %c0_i32_0 : i32, i32
  }
  func.func @transform_8(%arg0: i32) -> (i32, i32) {
    %c0_i32 = arith.constant 0 : i32
    %c0_i32_0 = arith.constant 0 : i32
    %c0_i32_1 = arith.constant 0 : i32
    return %c0_i32, %c0_i32_0 : i32, i32
  }
  func.func @transform_9(%arg0: i32) -> (i32, i32) {
    %c0_i32 = arith.constant 0 : i32
    %c0_i32_0 = arith.constant 0 : i32
    %c0_i32_1 = arith.constant 0 : i32
    return %c0_i32, %c0_i32_0 : i32, i32
  }
  func.func @transform_10(%arg0: i32) -> (i32, i32) {
    %c0_i32 = arith.constant 0 : i32
    %c0_i32_0 = arith.constant 0 : i32
    %c0_i32_1 = arith.constant 0 : i32
    return %c0_i32, %c0_i32_0 : i32, i32
  }
  func.func @transform_11(%arg0: i32) -> (i32, i32) {
    %c0_i32 = arith.constant 0 : i32
    %c0_i32_0 = arith.constant 0 : i32
    %c0_i32_1 = arith.constant 0 : i32
    return %c0_i32, %c0_i32_0 : i32, i32
  }
  func.func @transform_12(%arg0: i32) -> (i32, i32) {
    %c0_i32 = arith.constant 0 : i32
    %c0_i32_0 = arith.constant 0 : i32
    %c0_i32_1 = arith.constant 0 : i32
    return %c0_i32, %c0_i32_0 : i32, i32
  }
  func.func @transform_13(%arg0: i32) -> (i32, i32) {
    %c0_i32 = arith.constant 0 : i32
    %c0_i32_0 = arith.constant 0 : i32
    return %c0_i32, %arg0 : i32, i32
  }
  func.func @transform_14(%arg0: i32) -> (i32, i32) {
    %c0_i32 = arith.constant 0 : i32
    %c0_i32_0 = arith.constant 0 : i32
    return %c0_i32, %arg0 : i32, i32
  }
  func.func @transform_15(%arg0: i32) -> (i32, i32) {
    %c0_i32 = arith.constant 0 : i32
    %c0_i32_0 = arith.constant 0 : i32
    return %c0_i32, %arg0 : i32, i32
  }
}

</mosaic_0001>

<bundles_post_ra>
// kernel: tpu_custom_call.1
= control target key start
LH: loop header
LB: loop body
LE: loop exit
PB: predicated region body
PF: predicated region fallthrough
CT: control target
= control target key end

     0   :  { %21 = vsyncpa [#allocation5], 0  ;;  %s9716_s0 = inlined_call_operand.vmem [shape: f32[7], index: 0, kind: input, shape index: {}]   ;;  %s9717_s1 = inlined_call_operand.hbm [shape: f32[4,128], index: 1, kind: input, shape index: {}]   ;;  %s9718_s2 = inlined_call_operand.vmem [shape: f32[32,128], index: 2, kind: input, shape index: {}]   ;;  %s9719_s3 = inlined_call_operand.vmem [shape: f32[32,128], index: 3, kind: input, shape index: {}]   ;;  %s9720_s4 = inlined_call_operand.vmem [shape: f32[32,32], index: 4, kind: input, shape index: {}]   ;;  %s9721_s5 = inlined_call_operand.vmem [shape: f32[32,1], index: 5, kind: input, shape index: {}]   ;;  %s9722_s6 = inlined_call_operand.vmem [shape: f32[32,32], index: 6, kind: input, shape index: {}]   ;;  %s9723_s7 = inlined_call_operand.vmem [shape: f32[32,1], index: 7, kind: input, shape index: {}]   ;;  %s9724_s8 = inlined_call_operand.vmem [shape: f32[32,4], index: 8, kind: input, shape index: {}]   ;;  %s9725_s9 = inlined_call_operand.vmem [shape: f32[32,32], index: 9, kind: input, shape index: {}]   ;;  %s9726_s10 = inlined_call_operand.vmem [shape: f32[32,1], index: 10, kind: input, shape index: {}]   ;;  %s9727_s11 = inlined_call_operand.vmem [shape: f32[8,32], index: 11, kind: input, shape index: {}]   ;;  %s9728_s12 = inlined_call_operand.vmem [shape: f32[8,1], index: 12, kind: input, shape index: {}]   ;;  %s9729_s13 = inlined_call_operand.hbm [shape: f32[8,128], index: 13, kind: output, shape index: {0}]   ;;  %s9730_s14 = inlined_call_operand.hbm [shape: f32[32,128], index: 14, kind: output, shape index: {1}]   ;;  %s9731_s15 = inlined_call_operand.hbm [shape: f32[32,128], index: 15, kind: output, shape index: {2}]  }
   0x1   :  { %22 = vsyncpa [#allocation3], 0 }
   0x2   :  { %23 = vsyncpa [#allocation4], 0 }
   0x3   :  { %24 = vsyncpa [#allocation9], 0  ;;  %s31_s20 = sshll.u32 %s9716_s0, 4  ;;  %s32_s20 = int_to_ptr.vmem [resolvable:$true] %s31_s20 }
   0x4   :  { %s8134_s21 = scalar_lea.vmem %s32_s20, 16  ;;  %p8139_p1 = scmp.lt.s32.totalorder %s32_s20, %s32_s20 }
   0x5   :  { %p8135_p0 = scmp.ne.s32.totalorder %s32_s20, %s8134_s21  ;;  %p8140_p2 = scmp.lt.s32.totalorder %s8134_s21, %s8134_s21 }
   0x7   :  { %p8141_p3 = por %p8140_p2, %p8139_p1 }
   0x9   :  { %p8142_p4 = pnand %p8141_p3, %p8135_p0 }
   0xb   :  { %8145 = shalt.err (!%p8142_p4)
}
   0xc   :  { %s8242_s22 = smov [#allocation2]   ;;  %s8243_s23 = smov [#allocation6]  }
   0xd   :  { %34 = dma.vmem_to_smem %s32_s20, 16, %s8242_s22, [#allocation5]  }
   0xe   :  { %s41_s24 = sshll.u32 %s8243_s23, 4  ;;  %s8146_s27 = scalar_lea.hbm %s9717_s1, 64  ;;  %s42_s24 = int_to_ptr.vmem [resolvable:$true] %s41_s24 }
   0xf   :  { %p8147_p5 = scmp.ne.s32.totalorder %s9717_s1, %s8146_s27  ;;  %p8150_p6 = scmp.lt.u32.totalorder %s8146_s27, %s9717_s1 }
  0x11   :  { %p8152_p7 = pnand %p8150_p6, %p8147_p5 }
  0x13   :  { %8155 = shalt.err (!%p8152_p7)
}
  0x14   :  { %s8156_s16 = scalar_lea.vmem %s42_s24, 64  ;;  %p8161_p9 = scmp.lt.s32.totalorder %s42_s24, %s42_s24 }
  0x15   :  { %p8157_p8 = scmp.ne.s32.totalorder %s42_s24, %s8156_s16  ;;  %p8162_p10 = scmp.lt.s32.totalorder %s8156_s16, %s8156_s16 }
  0x17   :  { %p8163_p11 = por %p8162_p10, %p8161_p9 }
  0x19   :  { %p8164_p12 = pnand %p8163_p11, %p8157_p8 }
  0x1b   :  { %8167 = shalt.err (!%p8164_p12)
}
  0x1c   :  { %44 = dma.hbm_to_vmem [thread:$0]  %s9717_s1, 64, %s42_s24, [#allocation3]  }
  0x1d   :  { %8234 = dma.done.wait [#allocation5], 16  }
  0x1e   :  { %8235 = vsyncadd [#allocation5], 4294967280 }
  0x1f   :  { %8236 = dma.done.wait [#allocation3], 64  }
  0x20   :  { %8237 = vsyncadd [#allocation3], 4294967232 }
  0x21   :  { %73 = sfence }
  0x22   :  { %v8351_v0 = vld [vmem:[%s9718_s2] sm:$0xff]  ;;  %v8356_v1 = vld [vmem:[%s9718_s2 + $0x8] sm:$0xff]  ;;  %v8361_v2 = vld [vmem:[%s9718_s2 + $0x10] sm:$0xff]  ;;  %vm136_vm0 = vcmask 261120   ;;  %v8244_v6 = vmov 0   ;;  %s8483_s27 = sld [smem:[#allocation2]] }
  0x23   :  { %v7384_v3 = vpack.c.bf16 %v8356_v1, %v8351_v0  ;;  %v8368_v4 = vld [vmem:[%s9718_s2 + $0x18] sm:$0xff]  ;;  %v8373_v5 = vld [vmem:[%s9720_s4] sm:$0xff]  ;;  %7861 = vset.pattern.permute.xlu0 %v8244_v6  ;;  %7862 = vset.pattern.permute.xlu1 %v8244_v6  ;;  %v84_v9 = vld [vmem:[%s9721_s5 + $0x10] sm:$0xff]  ;;  %s8646_s2 = sld [smem:[#allocation2 + $0x1]]  ;;  %s8806_s18 = sld [smem:[#allocation2 + $0x2]]  ;;  %vm5556_vm1 = vcmask 1043456  }
  0x24   :  { %v7388_v7 = vpack.c.bf16 %v8368_v4, %v8361_v2  ;;  %6575 = vmatprep.mubr.msk.f32.mxu1 %vm136_vm0, %v8373_v5  ;;  %v82_v8 = vld [vmem:[%s9721_s5] sm:$0xff]  ;;  %6603 = vmatprep.mubr.msk.f32.mxu0 %vm136_vm0, %v8373_v5  ;;  %v83_v10 = vld [vmem:[%s9721_s5 + $0x8] sm:$0xff]  ;;  %v85_v11 = vld [vmem:[%s9721_s5 + $0x18] sm:$0xff]  ;;  %s9151_s16 = sld [smem:[#allocation2 + $0x4]]  ;;  %vm5543_vm2 = vcmask 31744   ;;  %vm8246_vm3 = vmmov 0  }
  0x25   :  { %7385 = vmatprep.subr.bf16.mxu1 %v7384_v3  ;;  %88 = vperm.xlu0 %7861, %v82_v8   ;;  %v8396_v12 = vld [vmem:[%s9720_s4 + $0x8] sm:$0xff]  ;;  %v106_v13 = vld [vmem:[%s9723_s7] sm:$0xff]  ;;  %v8404_v14 = vld [vmem:[%s9720_s4 + $0x10] sm:$0xff]  ;;  %s8248_s26 = smov [#allocation8]  }
  0x26   :  { %7387 = vmatpush3.bf16.msra.mxu1 %v7384_v3  ;;  %98 = vperm.xlu1 %7862, %v84_v9   ;;  %v107_v15 = vld [vmem:[%s9723_s7 + $0x8] sm:$0xff]  ;;  %v8416_v16 = vld [vmem:[%s9720_s4 + $0x18] sm:$0xff]  ;;  %v108_v17 = vld [vmem:[%s9723_s7 + $0x10] sm:$0xff] }
  0x27   :  { %7389 = vmatprep.subr.bf16.mxu1 %v7388_v7  ;;  %v109_v18 = vld [vmem:[%s9723_s7 + $0x18] sm:$0xff]  ;;  %v5645_v19 = vld [vmem:[%s9726_s10] sm:$0xff]  ;;  %v5646_v20 = vld [vmem:[%s9726_s10 + $0x8] sm:$0xff] }
  0x28   :  { %v5647_v21 = vld [vmem:[%s9726_s10 + $0x10] sm:$0xff]  ;;  %v5648_v22 = vld [vmem:[%s9726_s10 + $0x18] sm:$0xff]  ;;  %v5722_v23 = vld [vmem:[%s9728_s12] sm:$0xff]  ;;  %s135_s28 = smul.f32 0.5, %s8483_s27 }
  0x29   :  { %93 = vperm.xlu0 %7861, %v83_v10   ;;  %v8444_v24 = vld [vmem:[%s9722_s6] sm:$0xff]  ;;  %v8463_v43 = vld [vmem:[%s9722_s6 + $0x8] sm:$0xff]  ;;  %v8468_v44 = vld [vmem:[%s9722_s6 + $0x10] sm:$0xff]  ;;  %s903_s29 = smul.f32 0.16666667, %s8483_s27 }
  0x2a   :  { %7391 = vmatpush3.bf16.msra.mxu1 %v7388_v7  ;;  %103 = vperm.xlu1 %7862, %v85_v11   ;;  %v8477_v45 = vld [vmem:[%s9722_s6 + $0x18] sm:$0xff]  ;;  %v8490_v49 = vstv %s135_s28  ;;  %s914_s0 = smul.f32 0.5, %s8646_s2 }
  0x2b   :  { %s1657_s30 = smul.f32 0.16666667, %s8646_s2 }
  0x2c   :  { %s1668_s19 = smul.f32 0.5, %s8806_s18 }
  0x2d   :  { %6576 = vmatmul.mubr.msk.f32.vlgmr.msra.gmra.mrb[0].mxu1 %vm136_vm0, %v8396_v12  ;;  %112 = vperm.xlu0 %7861, %v106_v13   ;;  %s3176_s17 = smul.f32 0.5, %s9151_s16 }
  0x2e   :  { %6578 = vmatprep.mubr.msk.f32.mxu1 %vm136_vm0, %v8404_v14  ;;  %117 = vperm.xlu1 %7862, %v107_v15  }
  0x31   :  { %6579 = vmatmul.mubr.msk.f32.gmra.mrb[2].mxu1 %vm136_vm0, %v8416_v16  ;;  %122 = vperm.xlu0 %7861, %v108_v17  }
  0x32   :  { %127 = vperm.xlu1 %7862, %v109_v18   ;;  %6589 = vmatprep.mubr.msk.f32.mxu1 %vm136_vm0, %v8444_v24 }
  0x35   :  { %5651 = vperm.xlu0 %7861, %v5645_v19  }
  0x36   :  { %5656 = vperm.xlu1 %7862, %v5646_v20  }
  0x39   :  { %5661 = vperm.xlu0 %7861, %v5647_v21  }
  0x3a   :  { %5666 = vperm.xlu1 %7862, %v5648_v22  }
  0x3d   :  { %5725 = vperm.xlu0 %7861, %v5722_v23  }
  0xa4   :  { %v8448_v25 = vpop.permute.xlu0 %88 }
  0xa5   :  { %v8450_v26 = vpop.permute.xlu1 %98 }
  0xa8   :  { %v8452_v27 = vpop.permute.xlu0 %93 }
  0xa9   :  { %v8456_v32 = vpop.permute.xlu1 %103 }
  0xac   :  { %v8488_v47 = vpop.permute.xlu0 %112 }
  0xad   :  { %v8486_v46 = vpop.permute.xlu1 %117 }
  0xb0   :  { %v8504_v57 = vpop.permute.xlu0 %122 }
  0xb1   :  { %v8500_v54 = vpop.permute.xlu1 %127 }
 0x100   :  { %v6577_v28 = vpop.f32.mrb[0].mxu1 }
 0x101   :  { %v221_v29 = vadd.f32 %v6577_v28, %v8452_v27  ;;  %v215_v30 = vpop.f32.mrb[1].mxu1 }
 0x102   :  { %v216_v31 = vadd.f32 %v215_v30, %v8448_v25 }
 0x103   :  { %7863 = vtanh.f32 %v221_v29 }
 0x104   :  { %7865 = vtanh.f32 %v216_v31  ;;  %v6580_v33 = vpop.f32.mrb[2].mxu1 }
 0x105   :  { %v231_v34 = vadd.f32 %v6580_v33, %v8456_v32  ;;  %v225_v35 = vpop.f32.mrb[3].mxu1 }
 0x106   :  { %v226_v36 = vadd.f32 %v225_v35, %v8450_v26 }
 0x107   :  { %7867 = vtanh.f32 %v231_v34 }
 0x108   :  { %7869 = vtanh.f32 %v226_v36 }
 0x10d   :  { %v7864_v37 = vpop.eup %7863 }
 0x10e   :  { %v7866_v38 = vpop.eup %7865 }
 0x10f   :  { %v7392_v39 = vpack.c.bf16 %v7864_v37, %v7866_v38 }
 0x111   :  { %v7868_v40 = vpop.eup %7867  ;;  %7393 = vmatprep.subr.bf16.mxu1 %v7392_v39 }
 0x112   :  { %v7870_v41 = vpop.eup %7869  ;;  %7395 = vmatpush3.bf16.msra.mxu1 %v7392_v39 }
 0x113   :  { %v7396_v42 = vpack.c.bf16 %v7868_v40, %v7870_v41 }
 0x115   :  { %7397 = vmatprep.subr.bf16.mxu1 %v7396_v42 }
 0x116   :  { %7399 = vmatpush3.bf16.msra.mxu1 %v7396_v42 }
 0x119   :  { %6590 = vmatmul.mubr.msk.f32.vlgmr.msra.gmra.mrb[4].mxu1 %vm136_vm0, %v8463_v43 }
 0x11a   :  { %6592 = vmatprep.mubr.msk.f32.mxu1 %vm136_vm0, %v8468_v44 }
 0x11d   :  { %6593 = vmatmul.mubr.msk.f32.gmra.mrb[6].mxu1 %vm136_vm0, %v8477_v45 }
 0x11e   :  { %6617 = vmatprep.mubr.msk.f32.mxu1 %vm136_vm0, %v8444_v24 }
 0x1ec   :  { %v6591_v48 = vpop.f32.mrb[4].mxu1 }
 0x1ed   :  { %v8493_v50 = vadd.f32 %v6591_v48, %v8486_v46  ;;  %v316_v51 = vpop.f32.mrb[5].mxu1 }
 0x1ee   :  { %v8496_v52 = vadd.f32 %v316_v51, %v8488_v47 }
 0x1ef   :  { %v337_v53 = vmul.f32 %v8490_v49, %v8493_v50 }
 0x1f0   :  { %v336_v55 = vmul.f32 %v8490_v49, %v8496_v52  ;;  %v6594_v56 = vpop.f32.mrb[6].mxu1 }
 0x1f1   :  { %v8507_v58 = vadd.f32 %v6594_v56, %v8500_v54  ;;  %v326_v59 = vpop.f32.mrb[7].mxu1  ;;  %v341_v60 = vadd.f32 %v337_v53, %v8356_v1 }
 0x1f2   :  { %v8511_v61 = vadd.f32 %v326_v59, %v8504_v57  ;;  %v340_v62 = vadd.f32 %v336_v55, %v8351_v0 }
 0x1f3   :  { %v339_v63 = vmul.f32 %v8490_v49, %v8507_v58 }
 0x1f4   :  { %v338_v3 = vmul.f32 %v8490_v49, %v8511_v61  ;;  %v7400_v6 = vpack.c.bf16 %v341_v60, %v340_v62 }
 0x1f5   :  { %v343_v7 = vadd.f32 %v339_v63, %v8368_v4 }
 0x1f6   :  { %v342_v8 = vadd.f32 %v338_v3, %v8361_v2  ;;  %7401 = vmatprep.subr.bf16.mxu0 %v7400_v6 }
 0x1f7   :  { %7403 = vmatpush3.bf16.msra.mxu0 %v7400_v6 }
 0x1f8   :  { %v7404_v9 = vpack.c.bf16 %v343_v7, %v342_v8 }
 0x1fa   :  { %7405 = vmatprep.subr.bf16.mxu0 %v7404_v9 }
 0x1fb   :  { %7407 = vmatpush3.bf16.msra.mxu0 %v7404_v9 }
 0x1fe   :  { %6604 = vmatmul.mubr.msk.f32.vlgmr.msra.gmra.mrb[0].mxu0 %vm136_vm0, %v8396_v12 }
 0x1ff   :  { %6606 = vmatprep.mubr.msk.f32.mxu0 %vm136_vm0, %v8404_v14 }
 0x202   :  { %6607 = vmatmul.mubr.msk.f32.gmra.mrb[2].mxu0 %vm136_vm0, %v8416_v16 }
 0x203   :  { %6631 = vmatprep.mubr.msk.f32.mxu0 %vm136_vm0, %v8373_v5 }
 0x2d1   :  { %v6605_v10 = vpop.f32.mrb[0].mxu0 }
 0x2d2   :  { %v416_v11 = vadd.f32 %v6605_v10, %v8452_v27  ;;  %v410_v13 = vpop.f32.mrb[1].mxu0 }
 0x2d3   :  { %v411_v15 = vadd.f32 %v410_v13, %v8448_v25 }
 0x2d4   :  { %7871 = vtanh.f32 %v416_v11 }
 0x2d5   :  { %7873 = vtanh.f32 %v411_v15  ;;  %v6608_v17 = vpop.f32.mrb[2].mxu0 }
 0x2d6   :  { %v426_v18 = vadd.f32 %v6608_v17, %v8456_v32  ;;  %v420_v19 = vpop.f32.mrb[3].mxu0 }
 0x2d7   :  { %v421_v20 = vadd.f32 %v420_v19, %v8450_v26 }
 0x2d8   :  { %7875 = vtanh.f32 %v426_v18 }
 0x2d9   :  { %7877 = vtanh.f32 %v421_v20 }
 0x2de   :  { %v7872_v21 = vpop.eup %7871 }
 0x2df   :  { %v7874_v22 = vpop.eup %7873 }
 0x2e0   :  { %v7408_v23 = vpack.c.bf16 %v7872_v21, %v7874_v22  ;;  %v716_v22 = vstv %s8483_s27  ;;  %s5825_s27 = sshll.u32 %s8248_s26, 4  ;;  %s5826_s27 = int_to_ptr.vmem [resolvable:$true] %s5825_s27 }
 0x2e1   :  { %p8173_p0 = scmp.lt.s32.totalorder %s5826_s27, %s5826_s27 }
 0x2e2   :  { %v7876_v28 = vpop.eup %7875  ;;  %7409 = vmatprep.subr.bf16.mxu1 %v7408_v23 }
 0x2e3   :  { %v7878_v29 = vpop.eup %7877  ;;  %7411 = vmatpush3.bf16.msra.mxu1 %v7408_v23 }
 0x2e4   :  { %v7412_v30 = vpack.c.bf16 %v7876_v28, %v7878_v29 }
 0x2e6   :  { %7413 = vmatprep.subr.bf16.mxu1 %v7412_v30 }
 0x2e7   :  { %7415 = vmatpush3.bf16.msra.mxu1 %v7412_v30 }
 0x2ea   :  { %6618 = vmatmul.mubr.msk.f32.vlgmr.msra.gmra.mrb[8].mxu1 %vm136_vm0, %v8463_v43 }
 0x2eb   :  { %6620 = vmatprep.mubr.msk.f32.mxu1 %vm136_vm0, %v8468_v44 }
 0x2ee   :  { %6621 = vmatmul.mubr.msk.f32.gmra.mrb[10].mxu1 %vm136_vm0, %v8477_v45 }
 0x2ef   :  { %6645 = vmatprep.mubr.msk.f32.mxu1 %vm136_vm0, %v8444_v24 }
 0x3bd   :  { %v6619_v31 = vpop.f32.mrb[8].mxu1 }
 0x3be   :  { %v505_v33 = vadd.f32 %v6619_v31, %v8486_v46  ;;  %v499_v34 = vpop.f32.mrb[9].mxu1 }
 0x3bf   :  { %v500_v35 = vadd.f32 %v499_v34, %v8488_v47 }
 0x3c0   :  { %v527_v36 = vmul.f32 %v505_v33, %v8490_v49  ;;  %v519_v19 = vmul.f32 2.0, %v505_v33 }
 0x3c1   :  { %v526_v37 = vmul.f32 %v500_v35, %v8490_v49  ;;  %v6622_v38 = vpop.f32.mrb[10].mxu1  ;;  %v518_v20 = vmul.f32 2.0, %v500_v35 }
 0x3c2   :  { %v531_v39 = vadd.f32 %v527_v36, %v8356_v1  ;;  %v515_v40 = vadd.f32 %v6622_v38, %v8500_v54  ;;  %v509_v41 = vpop.f32.mrb[11].mxu1  ;;  %v523_v30 = vadd.f32 %v519_v19, %v8493_v50 }
 0x3c3   :  { %v530_v42 = vadd.f32 %v526_v37, %v8351_v0  ;;  %v510_v48 = vadd.f32 %v509_v41, %v8504_v57  ;;  %v522_v37 = vadd.f32 %v518_v20, %v8496_v52 }
 0x3c4   :  { %v529_v51 = vmul.f32 %v515_v40, %v8490_v49  ;;  %v521_v31 = vmul.f32 2.0, %v515_v40 }
 0x3c5   :  { %v528_v53 = vmul.f32 %v510_v48, %v8490_v49  ;;  %v7416_v55 = vpack.c.bf16 %v531_v39, %v530_v42  ;;  %v520_v38 = vmul.f32 2.0, %v510_v48 }
 0x3c6   :  { %v533_v56 = vadd.f32 %v529_v51, %v8368_v4  ;;  %v525_v40 = vadd.f32 %v521_v31, %v8507_v58  ;;  %v904_v31 = vstv %s903_s29  ;;  %s2411_s29 = smul.f32 0.16666667, %s8806_s18 }
 0x3c7   :  { %v532_v59 = vadd.f32 %v528_v53, %v8361_v2  ;;  %7417 = vmatprep.subr.bf16.mxu0 %v7416_v55  ;;  %v524_v52 = vadd.f32 %v520_v38, %v8511_v61 }
 0x3c8   :  { %7419 = vmatpush3.bf16.msra.mxu0 %v7416_v55 }
 0x3c9   :  { %v7420_v60 = vpack.c.bf16 %v533_v56, %v532_v59 }
 0x3cb   :  { %7421 = vmatprep.subr.bf16.mxu0 %v7420_v60 }
 0x3cc   :  { %7423 = vmatpush3.bf16.msra.mxu0 %v7420_v60 }
 0x3cf   :  { %6632 = vmatmul.mubr.msk.f32.vlgmr.msra.gmra.mrb[4].mxu0 %vm136_vm0, %v8396_v12 }
 0x3d0   :  { %6634 = vmatprep.mubr.msk.f32.mxu0 %vm136_vm0, %v8404_v14 }
 0x3d3   :  { %6635 = vmatmul.mubr.msk.f32.gmra.mrb[6].mxu0 %vm136_vm0, %v8416_v16 }
 0x3d4   :  { %6659 = vmatprep.mubr.msk.f32.mxu0 %vm136_vm0, %v8373_v5 }
 0x4a2   :  { %v6633_v49 = vpop.f32.mrb[4].mxu0 }
 0x4a3   :  { %v606_v62 = vadd.f32 %v6633_v49, %v8452_v27  ;;  %v600_v63 = vpop.f32.mrb[5].mxu0 }
 0x4a4   :  { %v601_v3 = vadd.f32 %v600_v63, %v8448_v25 }
 0x4a5   :  { %7879 = vtanh.f32 %v606_v62 }
 0x4a6   :  { %7881 = vtanh.f32 %v601_v3  ;;  %v6636_v6 = vpop.f32.mrb[6].mxu0 }
 0x4a7   :  { %v616_v7 = vadd.f32 %v6636_v6, %v8456_v32  ;;  %v610_v8 = vpop.f32.mrb[7].mxu0 }
 0x4a8   :  { %v611_v9 = vadd.f32 %v610_v8, %v8450_v26 }
 0x4a9   :  { %7883 = vtanh.f32 %v616_v7 }
 0x4aa   :  { %7885 = vtanh.f32 %v611_v9 }
 0x4af   :  { %v7880_v10 = vpop.eup %7879 }
 0x4b0   :  { %v7882_v11 = vpop.eup %7881 }
 0x4b1   :  { %v7424_v13 = vpack.c.bf16 %v7880_v10, %v7882_v11 }
 0x4b3   :  { %v7884_v15 = vpop.eup %7883  ;;  %7425 = vmatprep.subr.bf16.mxu1 %v7424_v13 }
 0x4b4   :  { %v7886_v17 = vpop.eup %7885  ;;  %7427 = vmatpush3.bf16.msra.mxu1 %v7424_v13 }
 0x4b5   :  { %v7428_v18 = vpack.c.bf16 %v7884_v15, %v7886_v17 }
 0x4b7   :  { %7429 = vmatprep.subr.bf16.mxu1 %v7428_v18 }
 0x4b8   :  { %7431 = vmatpush3.bf16.msra.mxu1 %v7428_v18 }
 0x4bb   :  { %6646 = vmatmul.mubr.msk.f32.vlgmr.msra.gmra.mrb[12].mxu1 %vm136_vm0, %v8463_v43 }
 0x4bc   :  { %6648 = vmatprep.mubr.msk.f32.mxu1 %vm136_vm0, %v8468_v44 }
 0x4bf   :  { %6649 = vmatmul.mubr.msk.f32.gmra.mrb[14].mxu1 %vm136_vm0, %v8477_v45 }
 0x4c0   :  { %6673 = vmatprep.mubr.msk.f32.mxu1 %vm136_vm0, %v8444_v24 }
 0x58e   :  { %v6647_v21 = vpop.f32.mrb[12].mxu1 }
 0x58f   :  { %v695_v23 = vadd.f32 %v6647_v21, %v8486_v46  ;;  %v689_v28 = vpop.f32.mrb[13].mxu1 }
 0x590   :  { %v690_v29 = vadd.f32 %v689_v28, %v8488_v47 }
 0x591   :  { %v709_v34 = vmul.f32 2.0, %v695_v23  ;;  %v718_v36 = vmul.f32 %v716_v22, %v695_v23 }
 0x592   :  { %v708_v39 = vmul.f32 2.0, %v690_v29  ;;  %v717_v41 = vmul.f32 %v716_v22, %v690_v29  ;;  %v6650_v42 = vpop.f32.mrb[14].mxu1 }
 0x593   :  { %v722_v33 = vadd.f32 %v718_v36, %v8356_v1  ;;  %v705_v35 = vadd.f32 %v6650_v42, %v8500_v54  ;;  %v699_v51 = vpop.f32.mrb[15].mxu1  ;;  %v713_v53 = vadd.f32 %v709_v34, %v523_v30 }
 0x594   :  { %v721_v55 = vadd.f32 %v717_v41, %v8351_v0  ;;  %v700_v56 = vadd.f32 %v699_v51, %v8504_v57  ;;  %v712_v50 = vadd.f32 %v708_v39, %v522_v37 }
 0x595   :  { %v711_v59 = vmul.f32 2.0, %v705_v35  ;;  %v720_v60 = vmul.f32 %v716_v22, %v705_v35 }
 0x596   :  { %v710_v48 = vmul.f32 2.0, %v700_v56  ;;  %v719_v49 = vmul.f32 %v716_v22, %v700_v56  ;;  %v7432_v62 = vpack.c.bf16 %v722_v33, %v721_v55 }
 0x597   :  { %v724_v63 = vadd.f32 %v720_v60, %v8368_v4  ;;  %v715_v3 = vadd.f32 %v711_v59, %v525_v40 }
 0x598   :  { %v723_v6 = vadd.f32 %v719_v49, %v8361_v2  ;;  %7433 = vmatprep.subr.bf16.mxu0 %v7432_v62  ;;  %v714_v7 = vadd.f32 %v710_v48, %v524_v52 }
 0x599   :  { %7435 = vmatpush3.bf16.msra.mxu0 %v7432_v62 }
 0x59a   :  { %v7436_v8 = vpack.c.bf16 %v724_v63, %v723_v6 }
 0x59c   :  { %7437 = vmatprep.subr.bf16.mxu0 %v7436_v8 }
 0x59d   :  { %7439 = vmatpush3.bf16.msra.mxu0 %v7436_v8 }
 0x5a0   :  { %6660 = vmatmul.mubr.msk.f32.vlgmr.msra.gmra.mrb[8].mxu0 %vm136_vm0, %v8396_v12 }
 0x5a1   :  { %6662 = vmatprep.mubr.msk.f32.mxu0 %vm136_vm0, %v8404_v14 }
 0x5a4   :  { %6663 = vmatmul.mubr.msk.f32.gmra.mrb[10].mxu0 %vm136_vm0, %v8416_v16 }
 0x5a5   :  { %6687 = vmatprep.mubr.msk.f32.mxu0 %vm136_vm0, %v8373_v5 }
 0x673   :  { %v6661_v58 = vpop.f32.mrb[8].mxu0 }
 0x674   :  { %v797_v61 = vadd.f32 %v6661_v58, %v8452_v27  ;;  %v791_v9 = vpop.f32.mrb[9].mxu0 }
 0x675   :  { %v792_v10 = vadd.f32 %v791_v9, %v8448_v25 }
 0x676   :  { %7887 = vtanh.f32 %v797_v61 }
 0x677   :  { %7889 = vtanh.f32 %v792_v10  ;;  %v6664_v11 = vpop.f32.mrb[10].mxu0 }
 0x678   :  { %v807_v13 = vadd.f32 %v6664_v11, %v8456_v32  ;;  %v801_v15 = vpop.f32.mrb[11].mxu0  ;;  %v8649_v11 = vstv %s914_s0 }
 0x679   :  { %v802_v17 = vadd.f32 %v801_v15, %v8450_v26 }
 0x67a   :  { %7891 = vtanh.f32 %v807_v13 }
 0x67b   :  { %7893 = vtanh.f32 %v802_v17 }
 0x680   :  { %v7888_v18 = vpop.eup %7887 }
 0x681   :  { %v7890_v19 = vpop.eup %7889 }
 0x682   :  { %v7440_v20 = vpack.c.bf16 %v7888_v18, %v7890_v19 }
 0x684   :  { %v7892_v21 = vpop.eup %7891  ;;  %7441 = vmatprep.subr.bf16.mxu1 %v7440_v20 }
 0x685   :  { %v7894_v22 = vpop.eup %7893  ;;  %7443 = vmatpush3.bf16.msra.mxu1 %v7440_v20 }
 0x686   :  { %v7444_v23 = vpack.c.bf16 %v7892_v21, %v7894_v22 }
 0x688   :  { %7445 = vmatprep.subr.bf16.mxu1 %v7444_v23 }
 0x689   :  { %7447 = vmatpush3.bf16.msra.mxu1 %v7444_v23 }
 0x68c   :  { %6674 = vmatmul.mubr.msk.f32.vlgmr.msra.gmra.mrb[16].mxu1 %vm136_vm0, %v8463_v43 }
 0x68d   :  { %6676 = vmatprep.mubr.msk.f32.mxu1 %vm136_vm0, %v8468_v44 }
 0x690   :  { %6677 = vmatmul.mubr.msk.f32.gmra.mrb[18].mxu1 %vm136_vm0, %v8477_v45 }
 0x691   :  { %6701 = vmatprep.mubr.msk.f32.mxu1 %vm136_vm0, %v8444_v24 }
 0x75f   :  { %v6675_v28 = vpop.f32.mrb[16].mxu1 }
 0x760   :  { %v886_v29 = vadd.f32 %v6675_v28, %v8486_v46  ;;  %v880_v30 = vpop.f32.mrb[17].mxu1 }
 0x761   :  { %v881_v34 = vadd.f32 %v880_v30, %v8488_v47 }
 0x762   :  { %v900_v36 = vadd.f32 %v886_v29, %v713_v53 }
 0x763   :  { %v899_v37 = vadd.f32 %v881_v34, %v712_v50  ;;  %v6678_v38 = vpop.f32.mrb[18].mxu1 }
 0x764   :  { %v906_v39 = vmul.f32 %v904_v31, %v900_v36  ;;  %v896_v41 = vadd.f32 %v6678_v38, %v8500_v54  ;;  %v890_v42 = vpop.f32.mrb[19].mxu1 }
 0x765   :  { %v905_v33 = vmul.f32 %v904_v31, %v899_v37  ;;  %v891_v35 = vadd.f32 %v890_v42, %v8504_v57 }
 0x766   :  { %v8611_v51 = vadd.f32 %v906_v39, %v8356_v1  ;;  %v902_v55 = vadd.f32 %v896_v41, %v715_v3 }
 0x767   :  { %v8614_v56 = vadd.f32 %v905_v33, %v8351_v0  ;;  %v901_v40 = vadd.f32 %v891_v35, %v714_v7 }
 0x768   :  { %v908_v59 = vmul.f32 %v904_v31, %v902_v55 }
 0x769   :  { %v907_v60 = vmul.f32 %v904_v31, %v901_v40  ;;  %v7448_v53 = vpack.c.bf16 %v8611_v51, %v8614_v56 }
 0x76a   :  { %v8619_v50 = vadd.f32 %v908_v59, %v8368_v4 }
 0x76b   :  { %v8622_v52 = vadd.f32 %v907_v60, %v8361_v2  ;;  %7449 = vmatprep.subr.bf16.mxu0 %v7448_v53 }
 0x76c   :  { %7451 = vmatpush3.bf16.msra.mxu0 %v7448_v53 }
 0x76d   :  { %v7452_v1 = vpack.c.bf16 %v8619_v50, %v8622_v52 }
 0x76f   :  { %7453 = vmatprep.subr.bf16.mxu0 %v7452_v1 }
 0x770   :  { %7455 = vmatpush3.bf16.msra.mxu0 %v7452_v1 }
 0x773   :  { %6688 = vmatmul.mubr.msk.f32.vlgmr.msra.gmra.mrb[12].mxu0 %vm136_vm0, %v8396_v12 }
 0x774   :  { %6690 = vmatprep.mubr.msk.f32.mxu0 %vm136_vm0, %v8404_v14 }
 0x777   :  { %6691 = vmatmul.mubr.msk.f32.gmra.mrb[14].mxu0 %vm136_vm0, %v8416_v16 }
 0x778   :  { %6715 = vmatprep.mubr.msk.f32.mxu0 %vm136_vm0, %v8373_v5 }
 0x846   :  { %v6689_v0 = vpop.f32.mrb[12].mxu0 }
 0x847   :  { %v987_v2 = vadd.f32 %v6689_v0, %v8452_v27  ;;  %v981_v4 = vpop.f32.mrb[13].mxu0 }
 0x848   :  { %v982_v48 = vadd.f32 %v981_v4, %v8448_v25 }
 0x849   :  { %7895 = vtanh.f32 %v987_v2 }
 0x84a   :  { %7897 = vtanh.f32 %v982_v48  ;;  %v6692_v49 = vpop.f32.mrb[14].mxu0 }
 0x84b   :  { %v997_v62 = vadd.f32 %v6692_v49, %v8456_v32  ;;  %v991_v63 = vpop.f32.mrb[15].mxu0 }
 0x84c   :  { %v992_v3 = vadd.f32 %v991_v63, %v8450_v26 }
 0x84d   :  { %7899 = vtanh.f32 %v997_v62 }
 0x84e   :  { %7901 = vtanh.f32 %v992_v3 }
 0x853   :  { %v7896_v6 = vpop.eup %7895 }
 0x854   :  { %v7898_v7 = vpop.eup %7897 }
 0x855   :  { %v7456_v8 = vpack.c.bf16 %v7896_v6, %v7898_v7 }
 0x857   :  { %v7900_v58 = vpop.eup %7899  ;;  %7457 = vmatprep.subr.bf16.mxu1 %v7456_v8 }
 0x858   :  { %v7902_v61 = vpop.eup %7901  ;;  %7459 = vmatpush3.bf16.msra.mxu1 %v7456_v8 }
 0x859   :  { %v7460_v9 = vpack.c.bf16 %v7900_v58, %v7902_v61 }
 0x85b   :  { %7461 = vmatprep.subr.bf16.mxu1 %v7460_v9 }
 0x85c   :  { %7463 = vmatpush3.bf16.msra.mxu1 %v7460_v9 }
 0x85f   :  { %6702 = vmatmul.mubr.msk.f32.vlgmr.msra.gmra.mrb[20].mxu1 %vm136_vm0, %v8463_v43 }
 0x860   :  { %6704 = vmatprep.mubr.msk.f32.mxu1 %vm136_vm0, %v8468_v44 }
 0x863   :  { %6705 = vmatmul.mubr.msk.f32.gmra.mrb[22].mxu1 %vm136_vm0, %v8477_v45 }
 0x864   :  { %6729 = vmatprep.mubr.msk.f32.mxu1 %vm136_vm0, %v8444_v24 }
 0x932   :  { %v6703_v10 = vpop.f32.mrb[20].mxu1 }
 0x933   :  { %v8652_v13 = vadd.f32 %v6703_v10, %v8486_v46  ;;  %v1070_v15 = vpop.f32.mrb[21].mxu1 }
 0x934   :  { %v8655_v17 = vadd.f32 %v1070_v15, %v8488_v47 }
 0x935   :  { %v1091_v18 = vmul.f32 %v8649_v11, %v8652_v13 }
 0x936   :  { %v1090_v19 = vmul.f32 %v8649_v11, %v8655_v17  ;;  %v6706_v20 = vpop.f32.mrb[22].mxu1 }
 0x937   :  { %v1095_v21 = vadd.f32 %v1091_v18, %v8611_v51  ;;  %v8663_v22 = vadd.f32 %v6706_v20, %v8500_v54  ;;  %v1080_v23 = vpop.f32.mrb[23].mxu1 }
 0x938   :  { %v1094_v28 = vadd.f32 %v1090_v19, %v8614_v56  ;;  %v8667_v29 = vadd.f32 %v1080_v23, %v8504_v57 }
 0x939   :  { %v1093_v30 = vmul.f32 %v8649_v11, %v8663_v22 }
 0x93a   :  { %v1092_v31 = vmul.f32 %v8649_v11, %v8667_v29  ;;  %v7464_v34 = vpack.c.bf16 %v1095_v21, %v1094_v28 }
 0x93b   :  { %v1097_v36 = vadd.f32 %v1093_v30, %v8619_v50 }
 0x93c   :  { %v1096_v37 = vadd.f32 %v1092_v31, %v8622_v52  ;;  %7465 = vmatprep.subr.bf16.mxu0 %v7464_v34 }
 0x93d   :  { %7467 = vmatpush3.bf16.msra.mxu0 %v7464_v34 }
 0x93e   :  { %v7468_v38 = vpack.c.bf16 %v1097_v36, %v1096_v37 }
 0x940   :  { %7469 = vmatprep.subr.bf16.mxu0 %v7468_v38 }
 0x941   :  { %7471 = vmatpush3.bf16.msra.mxu0 %v7468_v38 }
 0x944   :  { %6716 = vmatmul.mubr.msk.f32.vlgmr.msra.gmra.mrb[16].mxu0 %vm136_vm0, %v8396_v12 }
 0x945   :  { %6718 = vmatprep.mubr.msk.f32.mxu0 %vm136_vm0, %v8404_v14 }
 0x948   :  { %6719 = vmatmul.mubr.msk.f32.gmra.mrb[18].mxu0 %vm136_vm0, %v8416_v16 }
 0x949   :  { %6743 = vmatprep.mubr.msk.f32.mxu0 %vm136_vm0, %v8373_v5 }
 0xa17   :  { %v6717_v39 = vpop.f32.mrb[16].mxu0 }
 0xa18   :  { %v1170_v41 = vadd.f32 %v6717_v39, %v8452_v27  ;;  %v1164_v42 = vpop.f32.mrb[17].mxu0 }
 0xa19   :  { %v1165_v33 = vadd.f32 %v1164_v42, %v8448_v25 }
 0xa1a   :  { %7903 = vtanh.f32 %v1170_v41 }
 0xa1b   :  { %7905 = vtanh.f32 %v1165_v33  ;;  %v6720_v35 = vpop.f32.mrb[18].mxu0 }
 0xa1c   :  { %v1180_v55 = vadd.f32 %v6720_v35, %v8456_v32  ;;  %v1174_v40 = vpop.f32.mrb[19].mxu0 }
 0xa1d   :  { %v1175_v59 = vadd.f32 %v1174_v40, %v8450_v26 }
 0xa1e   :  { %7907 = vtanh.f32 %v1180_v55 }
 0xa1f   :  { %7909 = vtanh.f32 %v1175_v59 }
 0xa24   :  { %v7904_v60 = vpop.eup %7903 }
 0xa25   :  { %v7906_v53 = vpop.eup %7905 }
 0xa26   :  { %v7472_v1 = vpack.c.bf16 %v7904_v60, %v7906_v53  ;;  %v1470_v53 = vstv %s8646_s2  ;;  %s8996_s2 = sld [smem:[#allocation2 + $0x3]] }
 0xa28   :  { %v7908_v0 = vpop.eup %7907  ;;  %7473 = vmatprep.subr.bf16.mxu1 %v7472_v1 }
 0xa29   :  { %v7910_v2 = vpop.eup %7909  ;;  %7475 = vmatpush3.bf16.msra.mxu1 %v7472_v1 }
 0xa2a   :  { %v7476_v4 = vpack.c.bf16 %v7908_v0, %v7910_v2 }
 0xa2c   :  { %7477 = vmatprep.subr.bf16.mxu1 %v7476_v4  ;;  %s2422_s0 = smul.f32 0.5, %s8996_s2 }
 0xa2d   :  { %7479 = vmatpush3.bf16.msra.mxu1 %v7476_v4 }
 0xa30   :  { %6730 = vmatmul.mubr.msk.f32.vlgmr.msra.gmra.mrb[24].mxu1 %vm136_vm0, %v8463_v43 }
 0xa31   :  { %6732 = vmatprep.mubr.msk.f32.mxu1 %vm136_vm0, %v8468_v44 }
 0xa34   :  { %6733 = vmatmul.mubr.msk.f32.gmra.mrb[26].mxu1 %vm136_vm0, %v8477_v45 }
 0xa35   :  { %6757 = vmatprep.mubr.msk.f32.mxu1 %vm136_vm0, %v8444_v24 }
 0xb03   :  { %v6731_v48 = vpop.f32.mrb[24].mxu1 }
 0xb04   :  { %v1259_v49 = vadd.f32 %v6731_v48, %v8486_v46  ;;  %v1253_v62 = vpop.f32.mrb[25].mxu1 }
 0xb05   :  { %v1254_v63 = vadd.f32 %v1253_v62, %v8488_v47 }
 0xb06   :  { %v1281_v3 = vmul.f32 %v1259_v49, %v8649_v11  ;;  %v1273_v40 = vmul.f32 2.0, %v1259_v49 }
 0xb07   :  { %v1280_v6 = vmul.f32 %v1254_v63, %v8649_v11  ;;  %v6734_v7 = vpop.f32.mrb[26].mxu1  ;;  %v1272_v59 = vmul.f32 2.0, %v1254_v63 }
 0xb08   :  { %v1285_v8 = vadd.f32 %v1281_v3, %v8611_v51  ;;  %v1269_v58 = vadd.f32 %v6734_v7, %v8500_v54  ;;  %v1263_v61 = vpop.f32.mrb[27].mxu1  ;;  %v1277_v4 = vadd.f32 %v1273_v40, %v8652_v13 }
 0xb09   :  { %v1284_v9 = vadd.f32 %v1280_v6, %v8614_v56  ;;  %v1264_v10 = vadd.f32 %v1263_v61, %v8504_v57  ;;  %v1276_v6 = vadd.f32 %v1272_v59, %v8655_v17 }
 0xb0a   :  { %v1283_v15 = vmul.f32 %v1269_v58, %v8649_v11  ;;  %v1275_v48 = vmul.f32 2.0, %v1269_v58 }
 0xb0b   :  { %v1282_v18 = vmul.f32 %v1264_v10, %v8649_v11  ;;  %v7480_v19 = vpack.c.bf16 %v1285_v8, %v1284_v9  ;;  %v1274_v7 = vmul.f32 2.0, %v1264_v10 }
 0xb0c   :  { %v1287_v20 = vadd.f32 %v1283_v15, %v8619_v50  ;;  %v1279_v58 = vadd.f32 %v1275_v48, %v8663_v22 }
 0xb0d   :  { %v1286_v21 = vadd.f32 %v1282_v18, %v8622_v52  ;;  %7481 = vmatprep.subr.bf16.mxu0 %v7480_v19  ;;  %v1278_v17 = vadd.f32 %v1274_v7, %v8667_v29 }
 0xb0e   :  { %7483 = vmatpush3.bf16.msra.mxu0 %v7480_v19 }
 0xb0f   :  { %v7484_v23 = vpack.c.bf16 %v1287_v20, %v1286_v21 }
 0xb11   :  { %7485 = vmatprep.subr.bf16.mxu0 %v7484_v23 }
 0xb12   :  { %7487 = vmatpush3.bf16.msra.mxu0 %v7484_v23 }
 0xb15   :  { %6744 = vmatmul.mubr.msk.f32.vlgmr.msra.gmra.mrb[20].mxu0 %vm136_vm0, %v8396_v12 }
 0xb16   :  { %6746 = vmatprep.mubr.msk.f32.mxu0 %vm136_vm0, %v8404_v14 }
 0xb19   :  { %6747 = vmatmul.mubr.msk.f32.gmra.mrb[22].mxu0 %vm136_vm0, %v8416_v16 }
 0xb1a   :  { %6771 = vmatprep.mubr.msk.f32.mxu0 %vm136_vm0, %v8373_v5 }
 0xbe8   :  { %v6745_v11 = vpop.f32.mrb[20].mxu0 }
 0xbe9   :  { %v1360_v28 = vadd.f32 %v6745_v11, %v8452_v27  ;;  %v1354_v30 = vpop.f32.mrb[21].mxu0 }
 0xbea   :  { %v1355_v31 = vadd.f32 %v1354_v30, %v8448_v25 }
 0xbeb   :  { %7911 = vtanh.f32 %v1360_v28 }
 0xbec   :  { %7913 = vtanh.f32 %v1355_v31  ;;  %v6748_v34 = vpop.f32.mrb[22].mxu0 }
 0xbed   :  { %v1370_v36 = vadd.f32 %v6748_v34, %v8456_v32  ;;  %v1364_v37 = vpop.f32.mrb[23].mxu0 }
 0xbee   :  { %v1365_v38 = vadd.f32 %v1364_v37, %v8450_v26 }
 0xbef   :  { %7915 = vtanh.f32 %v1370_v36 }
 0xbf0   :  { %7917 = vtanh.f32 %v1365_v38 }
 0xbf5   :  { %v7912_v39 = vpop.eup %7911 }
 0xbf6   :  { %v7914_v41 = vpop.eup %7913 }
 0xbf7   :  { %v7488_v42 = vpack.c.bf16 %v7912_v39, %v7914_v41 }
 0xbf9   :  { %v7916_v33 = vpop.eup %7915  ;;  %7489 = vmatprep.subr.bf16.mxu1 %v7488_v42 }
 0xbfa   :  { %v7918_v35 = vpop.eup %7917  ;;  %7491 = vmatpush3.bf16.msra.mxu1 %v7488_v42 }
 0xbfb   :  { %v7492_v55 = vpack.c.bf16 %v7916_v33, %v7918_v35 }
 0xbfd   :  { %7493 = vmatprep.subr.bf16.mxu1 %v7492_v55 }
 0xbfe   :  { %7495 = vmatpush3.bf16.msra.mxu1 %v7492_v55 }
 0xc01   :  { %6758 = vmatmul.mubr.msk.f32.vlgmr.msra.gmra.mrb[28].mxu1 %vm136_vm0, %v8463_v43 }
 0xc02   :  { %6760 = vmatprep.mubr.msk.f32.mxu1 %vm136_vm0, %v8468_v44 }
 0xc05   :  { %6761 = vmatmul.mubr.msk.f32.gmra.mrb[30].mxu1 %vm136_vm0, %v8477_v45 }
 0xc06   :  { %6785 = vmatprep.mubr.msk.f32.mxu1 %vm136_vm0, %v8444_v24 }
 0xcd4   :  { %v6759_v60 = vpop.f32.mrb[28].mxu1 }
 0xcd5   :  { %v1449_v1 = vadd.f32 %v6759_v60, %v8486_v46  ;;  %v1443_v0 = vpop.f32.mrb[29].mxu1 }
 0xcd6   :  { %v1444_v2 = vadd.f32 %v1443_v0, %v8488_v47 }
 0xcd7   :  { %v1463_v62 = vmul.f32 2.0, %v1449_v1  ;;  %v1472_v3 = vmul.f32 %v1470_v53, %v1449_v1 }
 0xcd8   :  { %v1462_v8 = vmul.f32 2.0, %v1444_v2  ;;  %v1471_v61 = vmul.f32 %v1470_v53, %v1444_v2  ;;  %v6762_v9 = vpop.f32.mrb[30].mxu1 }
 0xcd9   :  { %v1476_v49 = vadd.f32 %v1472_v3, %v8611_v51  ;;  %v1459_v63 = vadd.f32 %v6762_v9, %v8500_v54  ;;  %v1453_v15 = vpop.f32.mrb[31].mxu1  ;;  %v1467_v18 = vadd.f32 %v1463_v62, %v1277_v4  ;;  %v1658_v4 = vstv %s1657_s30  ;;  %s3165_s30 = smul.f32 0.16666667, %s8996_s2 }
 0xcda   :  { %v1475_v19 = vadd.f32 %v1471_v61, %v8614_v56  ;;  %v1454_v20 = vadd.f32 %v1453_v15, %v8504_v57  ;;  %v1466_v13 = vadd.f32 %v1462_v8, %v1276_v6 }
 0xcdb   :  { %v1465_v21 = vmul.f32 2.0, %v1459_v63  ;;  %v1474_v23 = vmul.f32 %v1470_v53, %v1459_v63 }
 0xcdc   :  { %v1464_v10 = vmul.f32 2.0, %v1454_v20  ;;  %v1473_v11 = vmul.f32 %v1470_v53, %v1454_v20  ;;  %v7496_v28 = vpack.c.bf16 %v1476_v49, %v1475_v19 }
 0xcdd   :  { %v1478_v30 = vadd.f32 %v1474_v23, %v8619_v50  ;;  %v1469_v31 = vadd.f32 %v1465_v21, %v1279_v58 }
 0xcde   :  { %v1477_v34 = vadd.f32 %v1473_v11, %v8622_v52  ;;  %7497 = vmatprep.subr.bf16.mxu0 %v7496_v28  ;;  %v1468_v36 = vadd.f32 %v1464_v10, %v1278_v17 }
 0xcdf   :  { %7499 = vmatpush3.bf16.msra.mxu0 %v7496_v28 }
 0xce0   :  { %v7500_v37 = vpack.c.bf16 %v1478_v30, %v1477_v34 }
 0xce2   :  { %7501 = vmatprep.subr.bf16.mxu0 %v7500_v37 }
 0xce3   :  { %7503 = vmatpush3.bf16.msra.mxu0 %v7500_v37 }
 0xce6   :  { %6772 = vmatmul.mubr.msk.f32.vlgmr.msra.gmra.mrb[24].mxu0 %vm136_vm0, %v8396_v12 }
 0xce7   :  { %6774 = vmatprep.mubr.msk.f32.mxu0 %vm136_vm0, %v8404_v14 }
 0xcea   :  { %6775 = vmatmul.mubr.msk.f32.gmra.mrb[26].mxu0 %vm136_vm0, %v8416_v16 }
 0xceb   :  { %6799 = vmatprep.mubr.msk.f32.mxu0 %vm136_vm0, %v8373_v5 }
 0xdb9   :  { %v6773_v22 = vpop.f32.mrb[24].mxu0 }
 0xdba   :  { %v1551_v29 = vadd.f32 %v6773_v22, %v8452_v27  ;;  %v1545_v38 = vpop.f32.mrb[25].mxu0 }
 0xdbb   :  { %v1546_v39 = vadd.f32 %v1545_v38, %v8448_v25 }
 0xdbc   :  { %7919 = vtanh.f32 %v1551_v29  ;;  %v8809_v29 = vstv %s1668_s19 }
 0xdbd   :  { %7921 = vtanh.f32 %v1546_v39  ;;  %v6776_v41 = vpop.f32.mrb[26].mxu0 }
 0xdbe   :  { %v1561_v42 = vadd.f32 %v6776_v41, %v8456_v32  ;;  %v1555_v33 = vpop.f32.mrb[27].mxu0 }
 0xdbf   :  { %v1556_v35 = vadd.f32 %v1555_v33, %v8450_v26 }
 0xdc0   :  { %7923 = vtanh.f32 %v1561_v42 }
 0xdc1   :  { %7925 = vtanh.f32 %v1556_v35 }
 0xdc6   :  { %v7920_v55 = vpop.eup %7919 }
 0xdc7   :  { %v7922_v40 = vpop.eup %7921 }
 0xdc8   :  { %v7504_v5 = vpack.c.bf16 %v7920_v55, %v7922_v40 }
 0xdca   :  { %v7924_v59 = vpop.eup %7923  ;;  %7505 = vmatprep.subr.bf16.mxu1 %v7504_v5 }
 0xdcb   :  { %v7926_v60 = vpop.eup %7925  ;;  %7507 = vmatpush3.bf16.msra.mxu1 %v7504_v5 }
 0xdcc   :  { %v7508_v53 = vpack.c.bf16 %v7924_v59, %v7926_v60 }
 0xdce   :  { %7509 = vmatprep.subr.bf16.mxu1 %v7508_v53 }
 0xdcf   :  { %7511 = vmatpush3.bf16.msra.mxu1 %v7508_v53 }
 0xdd2   :  { %6786 = vmatmul.mubr.msk.f32.vlgmr.msra.gmra.mrb[32].mxu1 %vm136_vm0, %v8463_v43 }
 0xdd3   :  { %6788 = vmatprep.mubr.msk.f32.mxu1 %vm136_vm0, %v8468_v44 }
 0xdd6   :  { %6789 = vmatmul.mubr.msk.f32.gmra.mrb[34].mxu1 %vm136_vm0, %v8477_v45 }
 0xdd7   :  { %6813 = vmatprep.mubr.msk.f32.mxu1 %vm136_vm0, %v8444_v24 }
 0xea5   :  { %v6787_v1 = vpop.f32.mrb[32].mxu1 }
 0xea6   :  { %v1640_v0 = vadd.f32 %v6787_v1, %v8486_v46  ;;  %v1634_v2 = vpop.f32.mrb[33].mxu1 }
 0xea7   :  { %v1635_v48 = vadd.f32 %v1634_v2, %v8488_v47  ;;  %v8845_v2 = vld [vmem:[%s9720_s4 + $0x10] sm:$0xff] }
 0xea8   :  { %v1654_v62 = vadd.f32 %v1640_v0, %v1467_v18  ;;  %v8838_v0 = vld [vmem:[%s9720_s4 + $0x8] sm:$0xff] }
 0xea9   :  { %v1653_v3 = vadd.f32 %v1635_v48, %v1466_v13  ;;  %v6790_v6 = vpop.f32.mrb[34].mxu1 }
 0xeaa   :  { %v1660_v7 = vmul.f32 %v1658_v4, %v1654_v62  ;;  %v1650_v8 = vadd.f32 %v6790_v6, %v8500_v54  ;;  %v1644_v61 = vpop.f32.mrb[35].mxu1 }
 0xeab   :  { %v1659_v9 = vmul.f32 %v1658_v4, %v1653_v3  ;;  %v1645_v49 = vadd.f32 %v1644_v61, %v8504_v57 }
 0xeac   :  { %v8766_v63 = vadd.f32 %v1660_v7, %v8611_v51  ;;  %v1656_v15 = vadd.f32 %v1650_v8, %v1469_v31 }
 0xead   :  { %v8769_v19 = vadd.f32 %v1659_v9, %v8614_v56  ;;  %v1655_v20 = vadd.f32 %v1645_v49, %v1468_v36  ;;  %v8790_v56 = vld [vmem:[%s9720_s4] sm:$0xff] }
 0xeae   :  { %v1662_v58 = vmul.f32 %v1658_v4, %v1656_v15 }
 0xeaf   :  { %v1661_v21 = vmul.f32 %v1658_v4, %v1655_v20  ;;  %v7512_v18 = vpack.c.bf16 %v8766_v63, %v8769_v19  ;;  %v8852_v4 = vld [vmem:[%s9720_s4 + $0x18] sm:$0xff] }
 0xeb0   :  { %v8774_v13 = vadd.f32 %v1662_v58, %v8619_v50 }
 0xeb1   :  { %v8777_v23 = vadd.f32 %v1661_v21, %v8622_v52  ;;  %7513 = vmatprep.subr.bf16.mxu0 %v7512_v18 }
 0xeb2   :  { %7515 = vmatpush3.bf16.msra.mxu0 %v7512_v18 }
 0xeb3   :  { %v7516_v51 = vpack.c.bf16 %v8774_v13, %v8777_v23 }
 0xeb5   :  { %7517 = vmatprep.subr.bf16.mxu0 %v7516_v51 }
 0xeb6   :  { %7519 = vmatpush3.bf16.msra.mxu0 %v7516_v51  ;;  %v8865_v51 = vld [vmem:[%s9722_s6 + $0x8] sm:$0xff] }
 0xeb9   :  { %6800 = vmatmul.mubr.msk.f32.vlgmr.msra.gmra.mrb[28].mxu0 %vm136_vm0, %v8396_v12 }
 0xeba   :  { %6802 = vmatprep.mubr.msk.f32.mxu0 %vm136_vm0, %v8404_v14 }
 0xebd   :  { %6803 = vmatmul.mubr.msk.f32.gmra.mrb[30].mxu0 %vm136_vm0, %v8416_v16 }
 0xebe   :  { %6827 = vmatprep.mubr.msk.f32.mxu0 %vm136_vm0, %v8790_v56 }
 0xf8c   :  { %v6801_v50 = vpop.f32.mrb[28].mxu0 }
 0xf8d   :  { %v1741_v52 = vadd.f32 %v6801_v50, %v8452_v27  ;;  %v1735_v17 = vpop.f32.mrb[29].mxu0  ;;  %v8872_v50 = vld [vmem:[%s9722_s6 + $0x10] sm:$0xff] }
 0xf8e   :  { %v1736_v12 = vadd.f32 %v1735_v17, %v8448_v25  ;;  %v8886_v17 = vld [vmem:[%s9722_s6] sm:$0xff] }
 0xf8f   :  { %7927 = vtanh.f32 %v1741_v52  ;;  %v8879_v52 = vld [vmem:[%s9722_s6 + $0x18] sm:$0xff] }
 0xf90   :  { %7929 = vtanh.f32 %v1736_v12  ;;  %v6804_v14 = vpop.f32.mrb[30].mxu0 }
 0xf91   :  { %v1751_v10 = vadd.f32 %v6804_v14, %v8456_v32  ;;  %v1745_v16 = vpop.f32.mrb[31].mxu0 }
 0xf92   :  { %v1746_v11 = vadd.f32 %v1745_v16, %v8450_v26 }
 0xf93   :  { %7931 = vtanh.f32 %v1751_v10 }
 0xf94   :  { %7933 = vtanh.f32 %v1746_v11 }
 0xf99   :  { %v7928_v28 = vpop.eup %7927 }
 0xf9a   :  { %v7930_v30 = vpop.eup %7929 }
 0xf9b   :  { %v7520_v31 = vpack.c.bf16 %v7928_v28, %v7930_v30 }
 0xf9d   :  { %v7932_v34 = vpop.eup %7931  ;;  %7521 = vmatprep.subr.bf16.mxu1 %v7520_v31 }
 0xf9e   :  { %v7934_v36 = vpop.eup %7933  ;;  %7523 = vmatpush3.bf16.msra.mxu1 %v7520_v31 }
 0xf9f   :  { %v7524_v37 = vpack.c.bf16 %v7932_v34, %v7934_v36 }
 0xfa1   :  { %7525 = vmatprep.subr.bf16.mxu1 %v7524_v37 }
 0xfa2   :  { %7527 = vmatpush3.bf16.msra.mxu1 %v7524_v37 }
 0xfa5   :  { %6814 = vmatmul.mubr.msk.f32.vlgmr.msra.gmra.mrb[36].mxu1 %vm136_vm0, %v8463_v43 }
 0xfa6   :  { %6816 = vmatprep.mubr.msk.f32.mxu1 %vm136_vm0, %v8468_v44 }
 0xfa9   :  { %6817 = vmatmul.mubr.msk.f32.gmra.mrb[38].mxu1 %vm136_vm0, %v8477_v45 }
 0xfaa   :  { %6841 = vmatprep.mubr.msk.f32.mxu1 %vm136_vm0, %v8444_v24 }
0x1078   :  { %v6815_v22 = vpop.f32.mrb[36].mxu1 }
0x1079   :  { %v8812_v38 = vadd.f32 %v6815_v22, %v8486_v46  ;;  %v1824_v43 = vpop.f32.mrb[37].mxu1 }
0x107a   :  { %v8815_v39 = vadd.f32 %v1824_v43, %v8488_v47 }
0x107b   :  { %v1845_v44 = vmul.f32 %v8809_v29, %v8812_v38 }
0x107c   :  { %v1844_v24 = vmul.f32 %v8809_v29, %v8815_v39  ;;  %v6818_v45 = vpop.f32.mrb[38].mxu1 }
0x107d   :  { %v1849_v41 = vadd.f32 %v1845_v44, %v8766_v63  ;;  %v8823_v42 = vadd.f32 %v6818_v45, %v8500_v54  ;;  %v1834_v33 = vpop.f32.mrb[39].mxu1 }
0x107e   :  { %v1848_v35 = vadd.f32 %v1844_v24, %v8769_v19  ;;  %v8827_v55 = vadd.f32 %v1834_v33, %v8504_v57 }
0x107f   :  { %v1847_v40 = vmul.f32 %v8809_v29, %v8823_v42 }
0x1080   :  { %v1846_v5 = vmul.f32 %v8809_v29, %v8827_v55  ;;  %v7528_v59 = vpack.c.bf16 %v1849_v41, %v1848_v35 }
0x1081   :  { %v1851_v60 = vadd.f32 %v1847_v40, %v8774_v13 }
0x1082   :  { %v1850_v53 = vadd.f32 %v1846_v5, %v8777_v23  ;;  %7529 = vmatprep.subr.bf16.mxu0 %v7528_v59 }
0x1083   :  { %7531 = vmatpush3.bf16.msra.mxu0 %v7528_v59 }
0x1084   :  { %v7532_v1 = vpack.c.bf16 %v1851_v60, %v1850_v53 }
0x1086   :  { %7533 = vmatprep.subr.bf16.mxu0 %v7532_v1 }
0x1087   :  { %7535 = vmatpush3.bf16.msra.mxu0 %v7532_v1 }
0x108a   :  { %6828 = vmatmul.mubr.msk.f32.vlgmr.msra.gmra.mrb[32].mxu0 %vm136_vm0, %v8838_v0 }
0x108b   :  { %6830 = vmatprep.mubr.msk.f32.mxu0 %vm136_vm0, %v8845_v2 }
0x108e   :  { %6831 = vmatmul.mubr.msk.f32.gmra.mrb[34].mxu0 %vm136_vm0, %v8852_v4 }
0x108f   :  { %6855 = vmatprep.mubr.msk.f32.mxu0 %vm136_vm0, %v8790_v56 }
0x115d   :  { %v6829_v48 = vpop.f32.mrb[32].mxu0 }
0x115e   :  { %v1924_v62 = vadd.f32 %v6829_v48, %v8452_v27  ;;  %v1918_v3 = vpop.f32.mrb[33].mxu0 }
0x115f   :  { %v1919_v6 = vadd.f32 %v1918_v3, %v8448_v25 }
0x1160   :  { %7935 = vtanh.f32 %v1924_v62 }
0x1161   :  { %7937 = vtanh.f32 %v1919_v6  ;;  %v6832_v7 = vpop.f32.mrb[34].mxu0 }
0x1162   :  { %v1934_v8 = vadd.f32 %v6832_v7, %v8456_v32  ;;  %v1928_v61 = vpop.f32.mrb[35].mxu0 }
0x1163   :  { %v1929_v9 = vadd.f32 %v1928_v61, %v8450_v26 }
0x1164   :  { %7939 = vtanh.f32 %v1934_v8 }
0x1165   :  { %7941 = vtanh.f32 %v1929_v9 }
0x116a   :  { %v7936_v49 = vpop.eup %7935 }
0x116b   :  { %v7938_v15 = vpop.eup %7937 }
0x116c   :  { %v7536_v20 = vpack.c.bf16 %v7936_v49, %v7938_v15  ;;  %v2224_v15 = vstv %s8806_s18 }
0x116e   :  { %v7940_v58 = vpop.eup %7939  ;;  %7537 = vmatprep.subr.bf16.mxu1 %v7536_v20 }
0x116f   :  { %v7942_v21 = vpop.eup %7941  ;;  %7539 = vmatpush3.bf16.msra.mxu1 %v7536_v20 }
0x1170   :  { %v7540_v18 = vpack.c.bf16 %v7940_v58, %v7942_v21 }
0x1172   :  { %7541 = vmatprep.subr.bf16.mxu1 %v7540_v18 }
0x1173   :  { %7543 = vmatpush3.bf16.msra.mxu1 %v7540_v18 }
0x1176   :  { %6842 = vmatmul.mubr.msk.f32.vlgmr.msra.gmra.mrb[40].mxu1 %vm136_vm0, %v8865_v51 }
0x1177   :  { %6844 = vmatprep.mubr.msk.f32.mxu1 %vm136_vm0, %v8872_v50 }
0x117a   :  { %6845 = vmatmul.mubr.msk.f32.gmra.mrb[42].mxu1 %vm136_vm0, %v8879_v52 }
0x117b   :  { %6869 = vmatprep.mubr.msk.f32.mxu1 %vm136_vm0, %v8886_v17 }
0x1249   :  { %v6843_v12 = vpop.f32.mrb[40].mxu1 }
0x124a   :  { %v2013_v14 = vadd.f32 %v6843_v12, %v8486_v46  ;;  %v2007_v10 = vpop.f32.mrb[41].mxu1 }
0x124b   :  { %v2008_v16 = vadd.f32 %v2007_v10, %v8488_v47 }
0x124c   :  { %v2035_v11 = vmul.f32 %v2013_v14, %v8809_v29  ;;  %v2027_v61 = vmul.f32 2.0, %v2013_v14 }
0x124d   :  { %v2034_v28 = vmul.f32 %v2008_v16, %v8809_v29  ;;  %v6846_v30 = vpop.f32.mrb[42].mxu1  ;;  %v2026_v9 = vmul.f32 2.0, %v2008_v16 }
0x124e   :  { %v2039_v31 = vadd.f32 %v2035_v11, %v8766_v63  ;;  %v2023_v34 = vadd.f32 %v6846_v30, %v8500_v54  ;;  %v2017_v36 = vpop.f32.mrb[43].mxu1  ;;  %v2031_v18 = vadd.f32 %v2027_v61, %v8812_v38 }
0x124f   :  { %v2038_v37 = vadd.f32 %v2034_v28, %v8769_v19  ;;  %v2018_v22 = vadd.f32 %v2017_v36, %v8504_v57  ;;  %v2030_v28 = vadd.f32 %v2026_v9, %v8815_v39 }
0x1250   :  { %v2037_v43 = vmul.f32 %v2023_v34, %v8809_v29  ;;  %v2029_v12 = vmul.f32 2.0, %v2023_v34 }
0x1251   :  { %v2036_v44 = vmul.f32 %v2018_v22, %v8809_v29  ;;  %v7544_v24 = vpack.c.bf16 %v2039_v31, %v2038_v37  ;;  %v2028_v30 = vmul.f32 2.0, %v2018_v22 }
0x1252   :  { %v2041_v45 = vadd.f32 %v2037_v43, %v8774_v13  ;;  %v2033_v34 = vadd.f32 %v2029_v12, %v8823_v42  ;;  %v2412_v12 = vstv %s2411_s29  ;;  %s3919_s29 = smul.f32 0.16666667, %s9151_s16 }
0x1253   :  { %v2040_v41 = vadd.f32 %v2036_v44, %v8777_v23  ;;  %7545 = vmatprep.subr.bf16.mxu0 %v7544_v24  ;;  %v2032_v39 = vadd.f32 %v2028_v30, %v8827_v55 }
0x1254   :  { %7547 = vmatpush3.bf16.msra.mxu0 %v7544_v24 }
0x1255   :  { %v7548_v33 = vpack.c.bf16 %v2041_v45, %v2040_v41 }
0x1257   :  { %7549 = vmatprep.subr.bf16.mxu0 %v7548_v33 }
0x1258   :  { %7551 = vmatpush3.bf16.msra.mxu0 %v7548_v33 }
0x125b   :  { %6856 = vmatmul.mubr.msk.f32.vlgmr.msra.gmra.mrb[36].mxu0 %vm136_vm0, %v8838_v0 }
0x125c   :  { %6858 = vmatprep.mubr.msk.f32.mxu0 %vm136_vm0, %v8845_v2 }
0x125f   :  { %6859 = vmatmul.mubr.msk.f32.gmra.mrb[38].mxu0 %vm136_vm0, %v8852_v4 }
0x1260   :  { %6883 = vmatprep.mubr.msk.f32.mxu0 %vm136_vm0, %v8790_v56 }
0x132e   :  { %v6857_v29 = vpop.f32.mrb[36].mxu0 }
0x132f   :  { %v2114_v35 = vadd.f32 %v6857_v29, %v8452_v27  ;;  %v2108_v40 = vpop.f32.mrb[37].mxu0 }
0x1330   :  { %v2109_v5 = vadd.f32 %v2108_v40, %v8448_v25 }
0x1331   :  { %7943 = vtanh.f32 %v2114_v35 }
0x1332   :  { %7945 = vtanh.f32 %v2109_v5  ;;  %v6860_v59 = vpop.f32.mrb[38].mxu0 }
0x1333   :  { %v2124_v60 = vadd.f32 %v6860_v59, %v8456_v32  ;;  %v2118_v53 = vpop.f32.mrb[39].mxu0 }
0x1334   :  { %v2119_v1 = vadd.f32 %v2118_v53, %v8450_v26 }
0x1335   :  { %7947 = vtanh.f32 %v2124_v60 }
0x1336   :  { %7949 = vtanh.f32 %v2119_v1 }
0x133b   :  { %v7944_v48 = vpop.eup %7943 }
0x133c   :  { %v7946_v62 = vpop.eup %7945 }
0x133d   :  { %v7552_v3 = vpack.c.bf16 %v7944_v48, %v7946_v62 }
0x133f   :  { %v7948_v6 = vpop.eup %7947  ;;  %7553 = vmatprep.subr.bf16.mxu1 %v7552_v3 }
0x1340   :  { %v7950_v7 = vpop.eup %7949  ;;  %7555 = vmatpush3.bf16.msra.mxu1 %v7552_v3 }
0x1341   :  { %v7556_v8 = vpack.c.bf16 %v7948_v6, %v7950_v7 }
0x1343   :  { %7557 = vmatprep.subr.bf16.mxu1 %v7556_v8 }
0x1344   :  { %7559 = vmatpush3.bf16.msra.mxu1 %v7556_v8 }
0x1347   :  { %6870 = vmatmul.mubr.msk.f32.vlgmr.msra.gmra.mrb[44].mxu1 %vm136_vm0, %v8865_v51 }
0x1348   :  { %6872 = vmatprep.mubr.msk.f32.mxu1 %vm136_vm0, %v8872_v50 }
0x134b   :  { %6873 = vmatmul.mubr.msk.f32.gmra.mrb[46].mxu1 %vm136_vm0, %v8879_v52 }
0x134c   :  { %6897 = vmatprep.mubr.msk.f32.mxu1 %vm136_vm0, %v8886_v17 }
0x141a   :  { %v6871_v49 = vpop.f32.mrb[44].mxu1 }
0x141b   :  { %v2203_v20 = vadd.f32 %v6871_v49, %v8486_v46  ;;  %v2197_v58 = vpop.f32.mrb[45].mxu1 }
0x141c   :  { %v2198_v21 = vadd.f32 %v2197_v58, %v8488_v47 }
0x141d   :  { %v2217_v10 = vmul.f32 2.0, %v2203_v20  ;;  %v2226_v11 = vmul.f32 %v2224_v15, %v2203_v20 }
0x141e   :  { %v2216_v31 = vmul.f32 2.0, %v2198_v21  ;;  %v2225_v36 = vmul.f32 %v2224_v15, %v2198_v21  ;;  %v6874_v37 = vpop.f32.mrb[46].mxu1 }
0x141f   :  { %v2230_v14 = vadd.f32 %v2226_v11, %v8766_v63  ;;  %v2213_v16 = vadd.f32 %v6874_v37, %v8500_v54  ;;  %v2207_v43 = vpop.f32.mrb[47].mxu1  ;;  %v2221_v44 = vadd.f32 %v2217_v10, %v2031_v18 }
0x1420   :  { %v2229_v24 = vadd.f32 %v2225_v36, %v8769_v19  ;;  %v2208_v45 = vadd.f32 %v2207_v43, %v8504_v57  ;;  %v2220_v38 = vadd.f32 %v2216_v31, %v2030_v28 }
0x1421   :  { %v2219_v41 = vmul.f32 2.0, %v2213_v16  ;;  %v2228_v33 = vmul.f32 %v2224_v15, %v2213_v16 }
0x1422   :  { %v2218_v22 = vmul.f32 2.0, %v2208_v45  ;;  %v2227_v29 = vmul.f32 %v2224_v15, %v2208_v45  ;;  %v7560_v35 = vpack.c.bf16 %v2230_v14, %v2229_v24 }
0x1423   :  { %v2232_v40 = vadd.f32 %v2228_v33, %v8774_v13  ;;  %v2223_v5 = vadd.f32 %v2219_v41, %v2033_v34 }
0x1424   :  { %v2231_v59 = vadd.f32 %v2227_v29, %v8777_v23  ;;  %7561 = vmatprep.subr.bf16.mxu0 %v7560_v35  ;;  %v2222_v60 = vadd.f32 %v2218_v22, %v2032_v39 }
0x1425   :  { %7563 = vmatpush3.bf16.msra.mxu0 %v7560_v35 }
0x1426   :  { %v7564_v53 = vpack.c.bf16 %v2232_v40, %v2231_v59 }
0x1428   :  { %7565 = vmatprep.subr.bf16.mxu0 %v7564_v53 }
0x1429   :  { %7567 = vmatpush3.bf16.msra.mxu0 %v7564_v53 }
0x142c   :  { %6884 = vmatmul.mubr.msk.f32.vlgmr.msra.gmra.mrb[40].mxu0 %vm136_vm0, %v8838_v0 }
0x142d   :  { %6886 = vmatprep.mubr.msk.f32.mxu0 %vm136_vm0, %v8845_v2 }
0x1430   :  { %6887 = vmatmul.mubr.msk.f32.gmra.mrb[42].mxu0 %vm136_vm0, %v8852_v4 }
0x1431   :  { %6911 = vmatprep.mubr.msk.f32.mxu0 %vm136_vm0, %v8790_v56 }
0x14ff   :  { %v6885_v42 = vpop.f32.mrb[40].mxu0 }
0x1500   :  { %v2305_v55 = vadd.f32 %v6885_v42, %v8452_v27  ;;  %v2299_v1 = vpop.f32.mrb[41].mxu0 }
0x1501   :  { %v2300_v48 = vadd.f32 %v2299_v1, %v8448_v25 }
0x1502   :  { %7951 = vtanh.f32 %v2305_v55 }
0x1503   :  { %7953 = vtanh.f32 %v2300_v48  ;;  %v6888_v62 = vpop.f32.mrb[42].mxu0 }
0x1504   :  { %v2315_v3 = vadd.f32 %v6888_v62, %v8456_v32  ;;  %v2309_v6 = vpop.f32.mrb[43].mxu0  ;;  %v8999_v62 = vstv %s2422_s0 }
0x1505   :  { %v2310_v7 = vadd.f32 %v2309_v6, %v8450_v26 }
0x1506   :  { %7955 = vtanh.f32 %v2315_v3 }
0x1507   :  { %7957 = vtanh.f32 %v2310_v7 }
0x150c   :  { %v7952_v8 = vpop.eup %7951 }
0x150d   :  { %v7954_v61 = vpop.eup %7953 }
0x150e   :  { %v7568_v9 = vpack.c.bf16 %v7952_v8, %v7954_v61 }
0x1510   :  { %v7956_v49 = vpop.eup %7955  ;;  %7569 = vmatprep.subr.bf16.mxu1 %v7568_v9 }
0x1511   :  { %v7958_v15 = vpop.eup %7957  ;;  %7571 = vmatpush3.bf16.msra.mxu1 %v7568_v9 }
0x1512   :  { %v7572_v20 = vpack.c.bf16 %v7956_v49, %v7958_v15 }
0x1514   :  { %7573 = vmatprep.subr.bf16.mxu1 %v7572_v20 }
0x1515   :  { %7575 = vmatpush3.bf16.msra.mxu1 %v7572_v20 }
0x1518   :  { %6898 = vmatmul.mubr.msk.f32.vlgmr.msra.gmra.mrb[48].mxu1 %vm136_vm0, %v8865_v51 }
0x1519   :  { %6900 = vmatprep.mubr.msk.f32.mxu1 %vm136_vm0, %v8872_v50 }
0x151c   :  { %6901 = vmatmul.mubr.msk.f32.gmra.mrb[50].mxu1 %vm136_vm0, %v8879_v52 }
0x151d   :  { %6925 = vmatprep.mubr.msk.f32.mxu1 %vm136_vm0, %v8886_v17 }
0x15eb   :  { %v6899_v58 = vpop.f32.mrb[48].mxu1 }
0x15ec   :  { %v2394_v21 = vadd.f32 %v6899_v58, %v8486_v46  ;;  %v2388_v18 = vpop.f32.mrb[49].mxu1 }
0x15ed   :  { %v2389_v10 = vadd.f32 %v2388_v18, %v8488_v47 }
0x15ee   :  { %v2408_v11 = vadd.f32 %v2394_v21, %v2221_v44 }
0x15ef   :  { %v2407_v28 = vadd.f32 %v2389_v10, %v2220_v38  ;;  %v6902_v30 = vpop.f32.mrb[50].mxu1 }
0x15f0   :  { %v2414_v31 = vmul.f32 %v2412_v12, %v2408_v11  ;;  %v2404_v36 = vadd.f32 %v6902_v30, %v8500_v54  ;;  %v2398_v37 = vpop.f32.mrb[51].mxu1 }
0x15f1   :  { %v2413_v14 = vmul.f32 %v2412_v12, %v2407_v28  ;;  %v2399_v16 = vadd.f32 %v2398_v37, %v8504_v57 }
0x15f2   :  { %v8961_v43 = vadd.f32 %v2414_v31, %v8766_v63  ;;  %v2410_v24 = vadd.f32 %v2404_v36, %v2223_v5 }
0x15f3   :  { %v8964_v45 = vadd.f32 %v2413_v14, %v8769_v19  ;;  %v2409_v34 = vadd.f32 %v2399_v16, %v2222_v60 }
0x15f4   :  { %v2416_v41 = vmul.f32 %v2412_v12, %v2410_v24 }
0x15f5   :  { %v2415_v33 = vmul.f32 %v2412_v12, %v2409_v34  ;;  %v7576_v44 = vpack.c.bf16 %v8961_v43, %v8964_v45 }
0x15f6   :  { %v8969_v38 = vadd.f32 %v2416_v41, %v8774_v13 }
0x15f7   :  { %v8972_v39 = vadd.f32 %v2415_v33, %v8777_v23  ;;  %7577 = vmatprep.subr.bf16.mxu0 %v7576_v44 }
0x15f8   :  { %7579 = vmatpush3.bf16.msra.mxu0 %v7576_v44 }
0x15f9   :  { %v7580_v63 = vpack.c.bf16 %v8969_v38, %v8972_v39 }
0x15fb   :  { %7581 = vmatprep.subr.bf16.mxu0 %v7580_v63 }
0x15fc   :  { %7583 = vmatpush3.bf16.msra.mxu0 %v7580_v63 }
0x15ff   :  { %6912 = vmatmul.mubr.msk.f32.vlgmr.msra.gmra.mrb[44].mxu0 %vm136_vm0, %v8838_v0 }
0x1600   :  { %6914 = vmatprep.mubr.msk.f32.mxu0 %vm136_vm0, %v8845_v2 }
0x1603   :  { %6915 = vmatmul.mubr.msk.f32.gmra.mrb[46].mxu0 %vm136_vm0, %v8852_v4 }
0x1604   :  { %6939 = vmatprep.mubr.msk.f32.mxu0 %vm136_vm0, %v8790_v56 }
0x16d2   :  { %v6913_v19 = vpop.f32.mrb[44].mxu0 }
0x16d3   :  { %v2495_v13 = vadd.f32 %v6913_v19, %v8452_v27  ;;  %v2489_v23 = vpop.f32.mrb[45].mxu0 }
0x16d4   :  { %v2490_v22 = vadd.f32 %v2489_v23, %v8448_v25 }
0x16d5   :  { %7959 = vtanh.f32 %v2495_v13 }
0x16d6   :  { %7961 = vtanh.f32 %v2490_v22  ;;  %v6916_v29 = vpop.f32.mrb[46].mxu0 }
0x16d7   :  { %v2505_v35 = vadd.f32 %v6916_v29, %v8456_v32  ;;  %v2499_v40 = vpop.f32.mrb[47].mxu0 }
0x16d8   :  { %v2500_v5 = vadd.f32 %v2499_v40, %v8450_v26 }
0x16d9   :  { %7963 = vtanh.f32 %v2505_v35 }
0x16da   :  { %7965 = vtanh.f32 %v2500_v5 }
0x16df   :  { %v7960_v59 = vpop.eup %7959 }
0x16e0   :  { %v7962_v60 = vpop.eup %7961 }
0x16e1   :  { %v7584_v53 = vpack.c.bf16 %v7960_v59, %v7962_v60 }
0x16e3   :  { %v7964_v42 = vpop.eup %7963  ;;  %7585 = vmatprep.subr.bf16.mxu1 %v7584_v53 }
0x16e4   :  { %v7966_v55 = vpop.eup %7965  ;;  %7587 = vmatpush3.bf16.msra.mxu1 %v7584_v53 }
0x16e5   :  { %v7588_v1 = vpack.c.bf16 %v7964_v42, %v7966_v55 }
0x16e7   :  { %7589 = vmatprep.subr.bf16.mxu1 %v7588_v1 }
0x16e8   :  { %7591 = vmatpush3.bf16.msra.mxu1 %v7588_v1 }
0x16eb   :  { %6926 = vmatmul.mubr.msk.f32.vlgmr.msra.gmra.mrb[52].mxu1 %vm136_vm0, %v8865_v51 }
0x16ec   :  { %6928 = vmatprep.mubr.msk.f32.mxu1 %vm136_vm0, %v8872_v50 }
0x16ef   :  { %6929 = vmatmul.mubr.msk.f32.gmra.mrb[54].mxu1 %vm136_vm0, %v8879_v52 }
0x16f0   :  { %6953 = vmatprep.mubr.msk.f32.mxu1 %vm136_vm0, %v8886_v17 }
0x17be   :  { %v6927_v48 = vpop.f32.mrb[52].mxu1 }
0x17bf   :  { %v9002_v3 = vadd.f32 %v6927_v48, %v8486_v46  ;;  %v2578_v6 = vpop.f32.mrb[53].mxu1 }
0x17c0   :  { %v9005_v7 = vadd.f32 %v2578_v6, %v8488_v47 }
0x17c1   :  { %v2599_v8 = vmul.f32 %v8999_v62, %v9002_v3 }
0x17c2   :  { %v2598_v61 = vmul.f32 %v8999_v62, %v9005_v7  ;;  %v6930_v9 = vpop.f32.mrb[54].mxu1 }
0x17c3   :  { %v2603_v49 = vadd.f32 %v2599_v8, %v8961_v43  ;;  %v9013_v15 = vadd.f32 %v6930_v9, %v8500_v54  ;;  %v2588_v20 = vpop.f32.mrb[55].mxu1 }
0x17c4   :  { %v2602_v58 = vadd.f32 %v2598_v61, %v8964_v45  ;;  %v9017_v21 = vadd.f32 %v2588_v20, %v8504_v57 }
0x17c5   :  { %v2601_v18 = vmul.f32 %v8999_v62, %v9013_v15 }
0x17c6   :  { %v2600_v12 = vmul.f32 %v8999_v62, %v9017_v21  ;;  %v7592_v10 = vpack.c.bf16 %v2603_v49, %v2602_v58 }
0x17c7   :  { %v2605_v11 = vadd.f32 %v2601_v18, %v8969_v38 }
0x17c8   :  { %v2604_v28 = vadd.f32 %v2600_v12, %v8972_v39  ;;  %7593 = vmatprep.subr.bf16.mxu0 %v7592_v10 }
0x17c9   :  { %7595 = vmatpush3.bf16.msra.mxu0 %v7592_v10 }
0x17ca   :  { %v7596_v30 = vpack.c.bf16 %v2605_v11, %v2604_v28 }
0x17cc   :  { %7597 = vmatprep.subr.bf16.mxu0 %v7596_v30 }
0x17cd   :  { %7599 = vmatpush3.bf16.msra.mxu0 %v7596_v30 }
0x17d0   :  { %6940 = vmatmul.mubr.msk.f32.vlgmr.msra.gmra.mrb[48].mxu0 %vm136_vm0, %v8838_v0 }
0x17d1   :  { %6942 = vmatprep.mubr.msk.f32.mxu0 %vm136_vm0, %v8845_v2 }
0x17d4   :  { %6943 = vmatmul.mubr.msk.f32.gmra.mrb[50].mxu0 %vm136_vm0, %v8852_v4 }
0x17d5   :  { %6967 = vmatprep.mubr.msk.f32.mxu0 %vm136_vm0, %v8790_v56 }
0x18a3   :  { %v6941_v31 = vpop.f32.mrb[48].mxu0 }
0x18a4   :  { %v2678_v36 = vadd.f32 %v6941_v31, %v8452_v27  ;;  %v2672_v37 = vpop.f32.mrb[49].mxu0 }
0x18a5   :  { %v2673_v14 = vadd.f32 %v2672_v37, %v8448_v25 }
0x18a6   :  { %7967 = vtanh.f32 %v2678_v36 }
0x18a7   :  { %7969 = vtanh.f32 %v2673_v14  ;;  %v6944_v16 = vpop.f32.mrb[50].mxu0 }
0x18a8   :  { %v2688_v24 = vadd.f32 %v6944_v16, %v8456_v32  ;;  %v2682_v34 = vpop.f32.mrb[51].mxu0 }
0x18a9   :  { %v2683_v41 = vadd.f32 %v2682_v34, %v8450_v26 }
0x18aa   :  { %7971 = vtanh.f32 %v2688_v24 }
0x18ab   :  { %7973 = vtanh.f32 %v2683_v41 }
0x18b0   :  { %v7968_v33 = vpop.eup %7967 }
0x18b1   :  { %v7970_v44 = vpop.eup %7969 }
0x18b2   :  { %v7600_v63 = vpack.c.bf16 %v7968_v33, %v7970_v44  ;;  %v2978_v44 = vstv %s8996_s2  ;;  %s9346_s2 = sld [smem:[#allocation2 + $0x5]] }
0x18b4   :  { %v7972_v19 = vpop.eup %7971  ;;  %7601 = vmatprep.subr.bf16.mxu1 %v7600_v63 }
0x18b5   :  { %v7974_v13 = vpop.eup %7973  ;;  %7603 = vmatpush3.bf16.msra.mxu1 %v7600_v63 }
0x18b6   :  { %v7604_v23 = vpack.c.bf16 %v7972_v19, %v7974_v13 }
0x18b8   :  { %7605 = vmatprep.subr.bf16.mxu1 %v7604_v23  ;;  %s3930_s0 = smul.f32 0.5, %s9346_s2 }
0x18b9   :  { %7607 = vmatpush3.bf16.msra.mxu1 %v7604_v23 }
0x18bc   :  { %6954 = vmatmul.mubr.msk.f32.vlgmr.msra.gmra.mrb[56].mxu1 %vm136_vm0, %v8865_v51 }
0x18bd   :  { %6956 = vmatprep.mubr.msk.f32.mxu1 %vm136_vm0, %v8872_v50 }
0x18c0   :  { %6957 = vmatmul.mubr.msk.f32.gmra.mrb[58].mxu1 %vm136_vm0, %v8879_v52 }
0x18c1   :  { %6981 = vmatprep.mubr.msk.f32.mxu1 %vm136_vm0, %v8886_v17 }
0x198f   :  { %v6955_v22 = vpop.f32.mrb[56].mxu1 }
0x1990   :  { %v2767_v29 = vadd.f32 %v6955_v22, %v8486_v46  ;;  %v2761_v35 = vpop.f32.mrb[57].mxu1 }
0x1991   :  { %v2762_v40 = vadd.f32 %v2761_v35, %v8488_v47 }
0x1992   :  { %v2789_v5 = vmul.f32 %v2767_v29, %v8999_v62  ;;  %v2781_v34 = vmul.f32 2.0, %v2767_v29 }
0x1993   :  { %v2788_v59 = vmul.f32 %v2762_v40, %v8999_v62  ;;  %v6958_v60 = vpop.f32.mrb[58].mxu1  ;;  %v2780_v41 = vmul.f32 2.0, %v2762_v40 }
0x1994   :  { %v2793_v53 = vadd.f32 %v2789_v5, %v8961_v43  ;;  %v2777_v42 = vadd.f32 %v6958_v60, %v8500_v54  ;;  %v2771_v55 = vpop.f32.mrb[59].mxu1  ;;  %v2785_v23 = vadd.f32 %v2781_v34, %v9002_v3 }
0x1995   :  { %v2792_v1 = vadd.f32 %v2788_v59, %v8964_v45  ;;  %v2772_v48 = vadd.f32 %v2771_v55, %v8504_v57  ;;  %v2784_v59 = vadd.f32 %v2780_v41, %v9005_v7 }
0x1996   :  { %v2791_v6 = vmul.f32 %v2777_v42, %v8999_v62  ;;  %v2783_v22 = vmul.f32 2.0, %v2777_v42 }
0x1997   :  { %v2790_v8 = vmul.f32 %v2772_v48, %v8999_v62  ;;  %v7608_v61 = vpack.c.bf16 %v2793_v53, %v2792_v1  ;;  %v2782_v60 = vmul.f32 2.0, %v2772_v48 }
0x1998   :  { %v2795_v9 = vadd.f32 %v2791_v6, %v8969_v38  ;;  %v2787_v42 = vadd.f32 %v2783_v22, %v9013_v15  ;;  %v3166_v22 = vstv %s3165_s30  ;;  %s4673_s30 = smul.f32 0.16666667, %s9346_s2 }
0x1999   :  { %v2794_v49 = vadd.f32 %v2790_v8, %v8972_v39  ;;  %7609 = vmatprep.subr.bf16.mxu0 %v7608_v61  ;;  %v2786_v7 = vadd.f32 %v2782_v60, %v9017_v21 }
0x199a   :  { %7611 = vmatpush3.bf16.msra.mxu0 %v7608_v61 }
0x199b   :  { %v7612_v20 = vpack.c.bf16 %v2795_v9, %v2794_v49 }
0x199d   :  { %7613 = vmatprep.subr.bf16.mxu0 %v7612_v20 }
0x199e   :  { %7615 = vmatpush3.bf16.msra.mxu0 %v7612_v20 }
0x19a1   :  { %6968 = vmatmul.mubr.msk.f32.vlgmr.msra.gmra.mrb[52].mxu0 %vm136_vm0, %v8838_v0 }
0x19a2   :  { %6970 = vmatprep.mubr.msk.f32.mxu0 %vm136_vm0, %v8845_v2 }
0x19a5   :  { %6971 = vmatmul.mubr.msk.f32.gmra.mrb[54].mxu0 %vm136_vm0, %v8852_v4 }
0x19a6   :  { %6995 = vmatprep.mubr.msk.f32.mxu0 %vm136_vm0, %v8790_v56 }
0x1a74   :  { %v6969_v62 = vpop.f32.mrb[52].mxu0 }
0x1a75   :  { %v2868_v58 = vadd.f32 %v6969_v62, %v8452_v27  ;;  %v2862_v18 = vpop.f32.mrb[53].mxu0 }
0x1a76   :  { %v2863_v12 = vadd.f32 %v2862_v18, %v8448_v25 }
0x1a77   :  { %7975 = vtanh.f32 %v2868_v58 }
0x1a78   :  { %7977 = vtanh.f32 %v2863_v12  ;;  %v6972_v10 = vpop.f32.mrb[54].mxu0 }
0x1a79   :  { %v2878_v11 = vadd.f32 %v6972_v10, %v8456_v32  ;;  %v2872_v28 = vpop.f32.mrb[55].mxu0 }
0x1a7a   :  { %v2873_v30 = vadd.f32 %v2872_v28, %v8450_v26 }
0x1a7b   :  { %7979 = vtanh.f32 %v2878_v11 }
0x1a7c   :  { %7981 = vtanh.f32 %v2873_v30 }
0x1a81   :  { %v7976_v31 = vpop.eup %7975 }
0x1a82   :  { %v7978_v36 = vpop.eup %7977 }
0x1a83   :  { %v7616_v37 = vpack.c.bf16 %v7976_v31, %v7978_v36 }
0x1a85   :  { %v7980_v14 = vpop.eup %7979  ;;  %7617 = vmatprep.subr.bf16.mxu1 %v7616_v37 }
0x1a86   :  { %v7982_v16 = vpop.eup %7981  ;;  %7619 = vmatpush3.bf16.msra.mxu1 %v7616_v37 }
0x1a87   :  { %v7620_v24 = vpack.c.bf16 %v7980_v14, %v7982_v16 }
0x1a89   :  { %7621 = vmatprep.subr.bf16.mxu1 %v7620_v24 }
0x1a8a   :  { %7623 = vmatpush3.bf16.msra.mxu1 %v7620_v24 }
0x1a8d   :  { %6982 = vmatmul.mubr.msk.f32.vlgmr.msra.gmra.mrb[60].mxu1 %vm136_vm0, %v8865_v51 }
0x1a8e   :  { %6984 = vmatprep.mubr.msk.f32.mxu1 %vm136_vm0, %v8872_v50 }
0x1a91   :  { %6985 = vmatmul.mubr.msk.f32.gmra.mrb[62].mxu1 %vm136_vm0, %v8879_v52 }
0x1a92   :  { %7009 = vmatprep.mubr.msk.f32.mxu1 %vm136_vm0, %v8886_v17 }
0x1b60   :  { %v6983_v33 = vpop.f32.mrb[60].mxu1 }
0x1b61   :  { %v2957_v63 = vadd.f32 %v6983_v33, %v8486_v46  ;;  %v2951_v19 = vpop.f32.mrb[61].mxu1 }
0x1b62   :  { %v2952_v13 = vadd.f32 %v2951_v19, %v8488_v47 }
0x1b63   :  { %v2971_v35 = vmul.f32 2.0, %v2957_v63  ;;  %v2980_v5 = vmul.f32 %v2978_v44, %v2957_v63 }
0x1b64   :  { %v2970_v53 = vmul.f32 2.0, %v2952_v13  ;;  %v2979_v55 = vmul.f32 %v2978_v44, %v2952_v13  ;;  %v6986_v1 = vpop.f32.mrb[62].mxu1 }
0x1b65   :  { %v2984_v29 = vadd.f32 %v2980_v5, %v8961_v43  ;;  %v2967_v40 = vadd.f32 %v6986_v1, %v8500_v54  ;;  %v2961_v6 = vpop.f32.mrb[63].mxu1  ;;  %v2975_v8 = vadd.f32 %v2971_v35, %v2785_v23 }
0x1b66   :  { %v2983_v61 = vadd.f32 %v2979_v55, %v8964_v45  ;;  %v2962_v9 = vadd.f32 %v2961_v6, %v8504_v57  ;;  %v2974_v3 = vadd.f32 %v2970_v53, %v2784_v59 }
0x1b67   :  { %v2973_v49 = vmul.f32 2.0, %v2967_v40  ;;  %v2982_v20 = vmul.f32 %v2978_v44, %v2967_v40 }
0x1b68   :  { %v2972_v48 = vmul.f32 2.0, %v2962_v9  ;;  %v2981_v62 = vmul.f32 %v2978_v44, %v2962_v9  ;;  %v7624_v58 = vpack.c.bf16 %v2984_v29, %v2983_v61 }
0x1b69   :  { %v2986_v18 = vadd.f32 %v2982_v20, %v8969_v38  ;;  %v2977_v12 = vadd.f32 %v2973_v49, %v2787_v42 }
0x1b6a   :  { %v2985_v10 = vadd.f32 %v2981_v62, %v8972_v39  ;;  %7625 = vmatprep.subr.bf16.mxu0 %v7624_v58  ;;  %v2976_v11 = vadd.f32 %v2972_v48, %v2786_v7 }
0x1b6b   :  { %7627 = vmatpush3.bf16.msra.mxu0 %v7624_v58 }
0x1b6c   :  { %v7628_v28 = vpack.c.bf16 %v2986_v18, %v2985_v10 }
0x1b6e   :  { %7629 = vmatprep.subr.bf16.mxu0 %v7628_v28 }
0x1b6f   :  { %7631 = vmatpush3.bf16.msra.mxu0 %v7628_v28 }
0x1b72   :  { %6996 = vmatmul.mubr.msk.f32.vlgmr.msra.gmra.mrb[56].mxu0 %vm136_vm0, %v8838_v0 }
0x1b73   :  { %6998 = vmatprep.mubr.msk.f32.mxu0 %vm136_vm0, %v8845_v2 }
0x1b76   :  { %6999 = vmatmul.mubr.msk.f32.gmra.mrb[58].mxu0 %vm136_vm0, %v8852_v4 }
0x1b77   :  { %7023 = vmatprep.mubr.msk.f32.mxu0 %vm136_vm0, %v8790_v56 }
0x1c45   :  { %v6997_v15 = vpop.f32.mrb[56].mxu0 }
0x1c46   :  { %v3059_v21 = vadd.f32 %v6997_v15, %v8452_v27  ;;  %v3053_v30 = vpop.f32.mrb[57].mxu0 }
0x1c47   :  { %v3054_v31 = vadd.f32 %v3053_v30, %v8448_v25 }
0x1c48   :  { %7983 = vtanh.f32 %v3059_v21 }
0x1c49   :  { %7985 = vtanh.f32 %v3054_v31  ;;  %v7000_v36 = vpop.f32.mrb[58].mxu0  ;;  %v9154_v31 = vstv %s3176_s17 }
0x1c4a   :  { %v3069_v37 = vadd.f32 %v7000_v36, %v8456_v32  ;;  %v3063_v14 = vpop.f32.mrb[59].mxu0 }
0x1c4b   :  { %v3064_v16 = vadd.f32 %v3063_v14, %v8450_v26 }
0x1c4c   :  { %7987 = vtanh.f32 %v3069_v37 }
0x1c4d   :  { %7989 = vtanh.f32 %v3064_v16 }
0x1c52   :  { %v7984_v24 = vpop.eup %7983 }
0x1c53   :  { %v7986_v34 = vpop.eup %7985 }
0x1c54   :  { %v7632_v41 = vpack.c.bf16 %v7984_v24, %v7986_v34 }
0x1c56   :  { %v7988_v33 = vpop.eup %7987  ;;  %7633 = vmatprep.subr.bf16.mxu1 %v7632_v41 }
0x1c57   :  { %v7990_v44 = vpop.eup %7989  ;;  %7635 = vmatpush3.bf16.msra.mxu1 %v7632_v41 }
0x1c58   :  { %v7636_v63 = vpack.c.bf16 %v7988_v33, %v7990_v44 }
0x1c5a   :  { %7637 = vmatprep.subr.bf16.mxu1 %v7636_v63 }
0x1c5b   :  { %7639 = vmatpush3.bf16.msra.mxu1 %v7636_v63 }
0x1c5e   :  { %7010 = vmatmul.mubr.msk.f32.vlgmr.msra.gmra.mrb[64].mxu1 %vm136_vm0, %v8865_v51 }
0x1c5f   :  { %7012 = vmatprep.mubr.msk.f32.mxu1 %vm136_vm0, %v8872_v50 }
0x1c62   :  { %7013 = vmatmul.mubr.msk.f32.gmra.mrb[66].mxu1 %vm136_vm0, %v8879_v52 }
0x1c63   :  { %7037 = vmatprep.mubr.msk.f32.mxu1 %vm136_vm0, %v8886_v17 }
0x1d31   :  { %v7011_v19 = vpop.f32.mrb[64].mxu1 }
0x1d32   :  { %v3148_v13 = vadd.f32 %v7011_v19, %v8486_v46  ;;  %v3142_v23 = vpop.f32.mrb[65].mxu1 }
0x1d33   :  { %v3143_v35 = vadd.f32 %v3142_v23, %v8488_v47 }
0x1d34   :  { %v3162_v5 = vadd.f32 %v3148_v13, %v2975_v8 }
0x1d35   :  { %v3161_v59 = vadd.f32 %v3143_v35, %v2974_v3  ;;  %v7014_v60 = vpop.f32.mrb[66].mxu1 }
0x1d36   :  { %v3168_v53 = vmul.f32 %v3166_v22, %v3162_v5  ;;  %v3158_v55 = vadd.f32 %v7014_v60, %v8500_v54  ;;  %v3152_v1 = vpop.f32.mrb[67].mxu1  ;;  %v9189_v60 = vld [vmem:[%s9720_s4] sm:$0xff] }
0x1d37   :  { %v3167_v29 = vmul.f32 %v3166_v22, %v3161_v59  ;;  %v3153_v40 = vadd.f32 %v3152_v1, %v8504_v57 }
0x1d38   :  { %v9116_v6 = vadd.f32 %v3168_v53, %v8961_v43  ;;  %v3164_v61 = vadd.f32 %v3158_v55, %v2977_v12 }
0x1d39   :  { %v9119_v9 = vadd.f32 %v3167_v29, %v8964_v45  ;;  %v3163_v42 = vadd.f32 %v3153_v40, %v2976_v11 }
0x1d3a   :  { %v3170_v49 = vmul.f32 %v3166_v22, %v3164_v61 }
0x1d3b   :  { %v3169_v20 = vmul.f32 %v3166_v22, %v3163_v42  ;;  %v7640_v8 = vpack.c.bf16 %v9116_v6, %v9119_v9 }
0x1d3c   :  { %v9124_v3 = vadd.f32 %v3170_v49, %v8969_v38 }
0x1d3d   :  { %v9127_v7 = vadd.f32 %v3169_v20, %v8972_v39  ;;  %7641 = vmatprep.subr.bf16.mxu0 %v7640_v8 }
0x1d3e   :  { %7643 = vmatpush3.bf16.msra.mxu0 %v7640_v8 }
0x1d3f   :  { %v7644_v43 = vpack.c.bf16 %v9124_v3, %v9127_v7 }
0x1d41   :  { %7645 = vmatprep.subr.bf16.mxu0 %v7644_v43 }
0x1d42   :  { %7647 = vmatpush3.bf16.msra.mxu0 %v7644_v43 }
0x1d45   :  { %7024 = vmatmul.mubr.msk.f32.vlgmr.msra.gmra.mrb[60].mxu0 %vm136_vm0, %v8838_v0 }
0x1d46   :  { %7026 = vmatprep.mubr.msk.f32.mxu0 %vm136_vm0, %v8845_v2 }
0x1d49   :  { %7027 = vmatmul.mubr.msk.f32.gmra.mrb[62].mxu0 %vm136_vm0, %v8852_v4 }
0x1d4a   :  { %7051 = vmatprep.mubr.msk.f32.mxu0 %vm136_vm0, %v8790_v56 }
0x1e18   :  { %v7025_v45 = vpop.f32.mrb[60].mxu0 }
0x1e19   :  { %v3249_v38 = vadd.f32 %v7025_v45, %v8452_v27  ;;  %v3243_v39 = vpop.f32.mrb[61].mxu0 }
0x1e1a   :  { %v3244_v48 = vadd.f32 %v3243_v39, %v8448_v25 }
0x1e1b   :  { %7991 = vtanh.f32 %v3249_v38 }
0x1e1c   :  { %7993 = vtanh.f32 %v3244_v48  ;;  %v7028_v62 = vpop.f32.mrb[62].mxu0 }
0x1e1d   :  { %v3259_v58 = vadd.f32 %v7028_v62, %v8456_v32  ;;  %v3253_v18 = vpop.f32.mrb[63].mxu0 }
0x1e1e   :  { %v3254_v12 = vadd.f32 %v3253_v18, %v8450_v26 }
0x1e1f   :  { %7995 = vtanh.f32 %v3259_v58 }
0x1e20   :  { %7997 = vtanh.f32 %v3254_v12 }
0x1e25   :  { %v7992_v10 = vpop.eup %7991 }
0x1e26   :  { %v7994_v11 = vpop.eup %7993 }
0x1e27   :  { %v7648_v28 = vpack.c.bf16 %v7992_v10, %v7994_v11 }
0x1e29   :  { %v7996_v56 = vpop.eup %7995  ;;  %7649 = vmatprep.subr.bf16.mxu1 %v7648_v28 }
0x1e2a   :  { %v7998_v15 = vpop.eup %7997  ;;  %7651 = vmatpush3.bf16.msra.mxu1 %v7648_v28 }
0x1e2b   :  { %v7652_v21 = vpack.c.bf16 %v7996_v56, %v7998_v15 }
0x1e2d   :  { %7653 = vmatprep.subr.bf16.mxu1 %v7652_v21 }
0x1e2e   :  { %7655 = vmatpush3.bf16.msra.mxu1 %v7652_v21 }
0x1e31   :  { %7038 = vmatmul.mubr.msk.f32.vlgmr.msra.gmra.mrb[68].mxu1 %vm136_vm0, %v8865_v51 }
0x1e32   :  { %7040 = vmatprep.mubr.msk.f32.mxu1 %vm136_vm0, %v8872_v50 }
0x1e35   :  { %7041 = vmatmul.mubr.msk.f32.gmra.mrb[70].mxu1 %vm136_vm0, %v8879_v52 }
0x1e36   :  { %7065 = vmatprep.mubr.msk.f32.mxu1 %vm136_vm0, %v8886_v17 }
0x1f04   :  { %v7039_v30 = vpop.f32.mrb[68].mxu1 }
0x1f05   :  { %v9157_v36 = vadd.f32 %v7039_v30, %v8486_v46  ;;  %v3332_v37 = vpop.f32.mrb[69].mxu1  ;;  %v9220_v30 = vld [vmem:[%s9720_s4 + $0x8] sm:$0xff] }
0x1f06   :  { %v9160_v14 = vadd.f32 %v3332_v37, %v8488_v47  ;;  %v9234_v37 = vld [vmem:[%s9720_s4 + $0x18] sm:$0xff] }
0x1f07   :  { %v3353_v16 = vmul.f32 %v9154_v31, %v9157_v36 }
0x1f08   :  { %v3352_v24 = vmul.f32 %v9154_v31, %v9160_v14  ;;  %v7042_v34 = vpop.f32.mrb[70].mxu1 }
0x1f09   :  { %v3357_v41 = vadd.f32 %v3353_v16, %v9116_v6  ;;  %v9168_v33 = vadd.f32 %v7042_v34, %v8500_v54  ;;  %v3342_v44 = vpop.f32.mrb[71].mxu1 }
0x1f0a   :  { %v3356_v63 = vadd.f32 %v3352_v24, %v9119_v9  ;;  %v9172_v19 = vadd.f32 %v3342_v44, %v8504_v57 }
0x1f0b   :  { %v3355_v13 = vmul.f32 %v9154_v31, %v9168_v33 }
0x1f0c   :  { %v3354_v23 = vmul.f32 %v9154_v31, %v9172_v19  ;;  %v7656_v22 = vpack.c.bf16 %v3357_v41, %v3356_v63 }
0x1f0d   :  { %v3359_v35 = vadd.f32 %v3355_v13, %v9124_v3 }
0x1f0e   :  { %v3358_v5 = vadd.f32 %v3354_v23, %v9127_v7  ;;  %7657 = vmatprep.subr.bf16.mxu0 %v7656_v22 }
0x1f0f   :  { %7659 = vmatpush3.bf16.msra.mxu0 %v7656_v22 }
0x1f10   :  { %v7660_v59 = vpack.c.bf16 %v3359_v35, %v3358_v5 }
0x1f12   :  { %7661 = vmatprep.subr.bf16.mxu0 %v7660_v59 }
0x1f13   :  { %7663 = vmatpush3.bf16.msra.mxu0 %v7660_v59 }
0x1f16   :  { %7052 = vmatmul.mubr.msk.f32.vlgmr.msra.gmra.mrb[64].mxu0 %vm136_vm0, %v8838_v0 }
0x1f17   :  { %7054 = vmatprep.mubr.msk.f32.mxu0 %vm136_vm0, %v8845_v2 }
0x1f1a   :  { %7055 = vmatmul.mubr.msk.f32.gmra.mrb[66].mxu0 %vm136_vm0, %v8852_v4 }
0x1f1b   :  { %7079 = vmatprep.mubr.msk.f32.mxu0 %vm136_vm0, %v9189_v60 }
0x1fe9   :  { %v7053_v53 = vpop.f32.mrb[64].mxu0 }
0x1fea   :  { %v3432_v55 = vadd.f32 %v7053_v53, %v8452_v27  ;;  %v3426_v1 = vpop.f32.mrb[65].mxu0 }
0x1feb   :  { %v3427_v0 = vadd.f32 %v3426_v1, %v8448_v25  ;;  %v9247_v1 = vld [vmem:[%s9722_s6 + $0x8] sm:$0xff] }
0x1fec   :  { %7999 = vtanh.f32 %v3432_v55 }
0x1fed   :  { %8001 = vtanh.f32 %v3427_v0  ;;  %v7056_v2 = vpop.f32.mrb[66].mxu0  ;;  %v9254_v0 = vld [vmem:[%s9722_s6 + $0x10] sm:$0xff] }
0x1fee   :  { %v3442_v29 = vadd.f32 %v7056_v2, %v8456_v32  ;;  %v3436_v4 = vpop.f32.mrb[67].mxu0  ;;  %v9261_v2 = vld [vmem:[%s9722_s6 + $0x18] sm:$0xff] }
0x1fef   :  { %v3437_v40 = vadd.f32 %v3436_v4, %v8450_v26 }
0x1ff0   :  { %8003 = vtanh.f32 %v3442_v29  ;;  %v9268_v29 = vld [vmem:[%s9722_s6] sm:$0xff] }
0x1ff1   :  { %8005 = vtanh.f32 %v3437_v40 }
0x1ff6   :  { %v8000_v61 = vpop.eup %7999 }
0x1ff7   :  { %v8002_v42 = vpop.eup %8001 }
0x1ff8   :  { %v7664_v49 = vpack.c.bf16 %v8000_v61, %v8002_v42  ;;  %v3732_v42 = vstv %s9151_s16  ;;  %s9501_s16 = sld [smem:[#allocation2 + $0x6]] }
0x1ffa   :  { %v8004_v20 = vpop.eup %8003  ;;  %7665 = vmatprep.subr.bf16.mxu1 %v7664_v49 }
0x1ffb   :  { %v8006_v8 = vpop.eup %8005  ;;  %7667 = vmatpush3.bf16.msra.mxu1 %v7664_v49 }
0x1ffc   :  { %v7668_v43 = vpack.c.bf16 %v8004_v20, %v8006_v8 }
0x1ffe   :  { %7669 = vmatprep.subr.bf16.mxu1 %v7668_v43  ;;  %s4684_s17 = smul.f32 0.5, %s9501_s16 }
0x1fff   :  { %7671 = vmatpush3.bf16.msra.mxu1 %v7668_v43  ;;  %s5427_s28 = smul.f32 0.16666667, %s9501_s16 }
0x2002   :  { %7066 = vmatmul.mubr.msk.f32.vlgmr.msra.gmra.mrb[72].mxu1 %vm136_vm0, %v8865_v51 }
0x2003   :  { %7068 = vmatprep.mubr.msk.f32.mxu1 %vm136_vm0, %v8872_v50 }
0x2006   :  { %7069 = vmatmul.mubr.msk.f32.gmra.mrb[74].mxu1 %vm136_vm0, %v8879_v52 }
0x2007   :  { %7093 = vmatprep.mubr.msk.f32.mxu1 %vm136_vm0, %v8886_v17 }
0x20d5   :  { %v7067_v45 = vpop.f32.mrb[72].mxu1 }
0x20d6   :  { %v3521_v38 = vadd.f32 %v7067_v45, %v8486_v46  ;;  %v3515_v39 = vpop.f32.mrb[73].mxu1 }
0x20d7   :  { %v3516_v48 = vadd.f32 %v3515_v39, %v8488_v47 }
0x20d8   :  { %v3543_v62 = vmul.f32 %v3521_v38, %v9154_v31  ;;  %v3535_v4 = vmul.f32 2.0, %v3521_v38 }
0x20d9   :  { %v3542_v58 = vmul.f32 %v3516_v48, %v9154_v31  ;;  %v7070_v51 = vpop.f32.mrb[74].mxu1  ;;  %v3534_v40 = vmul.f32 2.0, %v3516_v48 }
0x20da   :  { %v3547_v18 = vadd.f32 %v3543_v62, %v9116_v6  ;;  %v3531_v50 = vadd.f32 %v7070_v51, %v8500_v54  ;;  %v3525_v12 = vpop.f32.mrb[75].mxu1  ;;  %v3539_v43 = vadd.f32 %v3535_v4, %v9157_v36 }
0x20db   :  { %v3546_v52 = vadd.f32 %v3542_v58, %v9119_v9  ;;  %v3526_v17 = vadd.f32 %v3525_v12, %v8504_v57  ;;  %v3538_v58 = vadd.f32 %v3534_v40, %v9160_v14 }
0x20dc   :  { %v3545_v10 = vmul.f32 %v3531_v50, %v9154_v31  ;;  %v3537_v45 = vmul.f32 2.0, %v3531_v50 }
0x20dd   :  { %v3544_v11 = vmul.f32 %v3526_v17, %v9154_v31  ;;  %v7672_v28 = vpack.c.bf16 %v3547_v18, %v3546_v52  ;;  %v9227_v31 = vld [vmem:[%s9720_s4 + $0x10] sm:$0xff]  ;;  %v3536_v51 = vmul.f32 2.0, %v3526_v17 }
0x20de   :  { %v3549_v56 = vadd.f32 %v3545_v10, %v9124_v3  ;;  %v3541_v50 = vadd.f32 %v3537_v45, %v9168_v33  ;;  %v3920_v45 = vstv %s3919_s29 }
0x20df   :  { %v3548_v15 = vadd.f32 %v3544_v11, %v9127_v7  ;;  %7673 = vmatprep.subr.bf16.mxu0 %v7672_v28  ;;  %v3540_v14 = vadd.f32 %v3536_v51, %v9172_v19 }
0x20e0   :  { %7675 = vmatpush3.bf16.msra.mxu0 %v7672_v28 }
0x20e1   :  { %v7676_v21 = vpack.c.bf16 %v3549_v56, %v3548_v15 }
0x20e3   :  { %7677 = vmatprep.subr.bf16.mxu0 %v7676_v21 }
0x20e4   :  { %7679 = vmatpush3.bf16.msra.mxu0 %v7676_v21 }
0x20e7   :  { %7080 = vmatmul.mubr.msk.f32.vlgmr.msra.gmra.mrb[68].mxu0 %vm136_vm0, %v9220_v30 }
0x20e8   :  { %7082 = vmatprep.mubr.msk.f32.mxu0 %vm136_vm0, %v9227_v31 }
0x20eb   :  { %7083 = vmatmul.mubr.msk.f32.gmra.mrb[70].mxu0 %vm136_vm0, %v9234_v37 }
0x20ec   :  { %7107 = vmatprep.mubr.msk.f32.mxu0 %vm136_vm0, %v9189_v60 }
0x21ba   :  { %v7081_v16 = vpop.f32.mrb[68].mxu0 }
0x21bb   :  { %v3622_v24 = vadd.f32 %v7081_v16, %v8452_v27  ;;  %v3616_v34 = vpop.f32.mrb[69].mxu0 }
0x21bc   :  { %v3617_v41 = vadd.f32 %v3616_v34, %v8448_v25 }
0x21bd   :  { %8007 = vtanh.f32 %v3622_v24 }
0x21be   :  { %8009 = vtanh.f32 %v3617_v41  ;;  %v7084_v44 = vpop.f32.mrb[70].mxu0 }
0x21bf   :  { %v3632_v63 = vadd.f32 %v7084_v44, %v8456_v32  ;;  %v3626_v13 = vpop.f32.mrb[71].mxu0 }
0x21c0   :  { %v3627_v23 = vadd.f32 %v3626_v13, %v8450_v26 }
0x21c1   :  { %8011 = vtanh.f32 %v3632_v63 }
0x21c2   :  { %8013 = vtanh.f32 %v3627_v23 }
0x21c7   :  { %v8008_v22 = vpop.eup %8007 }
0x21c8   :  { %v8010_v35 = vpop.eup %8009 }
0x21c9   :  { %v7680_v5 = vpack.c.bf16 %v8008_v22, %v8010_v35 }
0x21cb   :  { %v8012_v59 = vpop.eup %8011  ;;  %7681 = vmatprep.subr.bf16.mxu1 %v7680_v5 }
0x21cc   :  { %v8014_v53 = vpop.eup %8013  ;;  %7683 = vmatpush3.bf16.msra.mxu1 %v7680_v5 }
0x21cd   :  { %v7684_v55 = vpack.c.bf16 %v8012_v59, %v8014_v53 }
0x21cf   :  { %7685 = vmatprep.subr.bf16.mxu1 %v7684_v55 }
0x21d0   :  { %7687 = vmatpush3.bf16.msra.mxu1 %v7684_v55 }
0x21d3   :  { %7094 = vmatmul.mubr.msk.f32.vlgmr.msra.gmra.mrb[76].mxu1 %vm136_vm0, %v9247_v1 }
0x21d4   :  { %7096 = vmatprep.mubr.msk.f32.mxu1 %vm136_vm0, %v9254_v0 }
0x21d7   :  { %7097 = vmatmul.mubr.msk.f32.gmra.mrb[78].mxu1 %vm136_vm0, %v9261_v2 }
0x21d8   :  { %7121 = vmatprep.mubr.msk.f32.mxu1 %vm136_vm0, %v9268_v29 }
0x22a6   :  { %v7095_v61 = vpop.f32.mrb[76].mxu1 }
0x22a7   :  { %v3711_v49 = vadd.f32 %v7095_v61, %v8486_v46  ;;  %v3705_v20 = vpop.f32.mrb[77].mxu1 }
0x22a8   :  { %v3706_v8 = vadd.f32 %v3705_v20, %v8488_v47 }
0x22a9   :  { %v3725_v39 = vmul.f32 2.0, %v3711_v49  ;;  %v3734_v62 = vmul.f32 %v3732_v42, %v3711_v49 }
0x22aa   :  { %v3724_v18 = vmul.f32 2.0, %v3706_v8  ;;  %v3733_v12 = vmul.f32 %v3732_v42, %v3706_v8  ;;  %v7098_v52 = vpop.f32.mrb[78].mxu1 }
0x22ab   :  { %v3738_v38 = vadd.f32 %v3734_v62, %v9116_v6  ;;  %v3721_v48 = vadd.f32 %v7098_v52, %v8500_v54  ;;  %v3715_v10 = vpop.f32.mrb[79].mxu1  ;;  %v3729_v11 = vadd.f32 %v3725_v39, %v3539_v43 }
0x22ac   :  { %v3737_v28 = vadd.f32 %v3733_v12, %v9119_v9  ;;  %v3716_v56 = vadd.f32 %v3715_v10, %v8504_v57  ;;  %v3728_v36 = vadd.f32 %v3724_v18, %v3538_v58 }
0x22ad   :  { %v3727_v15 = vmul.f32 2.0, %v3721_v48  ;;  %v3736_v21 = vmul.f32 %v3732_v42, %v3721_v48 }
0x22ae   :  { %v3726_v17 = vmul.f32 2.0, %v3716_v56  ;;  %v3735_v16 = vmul.f32 %v3732_v42, %v3716_v56  ;;  %v7688_v24 = vpack.c.bf16 %v3738_v38, %v3737_v28 }
0x22af   :  { %v3740_v34 = vadd.f32 %v3736_v21, %v9124_v3  ;;  %v3731_v41 = vadd.f32 %v3727_v15, %v3541_v50 }
0x22b0   :  { %v3739_v44 = vadd.f32 %v3735_v16, %v9127_v7  ;;  %7689 = vmatprep.subr.bf16.mxu0 %v7688_v24  ;;  %v3730_v63 = vadd.f32 %v3726_v17, %v3540_v14 }
0x22b1   :  { %7691 = vmatpush3.bf16.msra.mxu0 %v7688_v24 }
0x22b2   :  { %v7692_v13 = vpack.c.bf16 %v3740_v34, %v3739_v44 }
0x22b4   :  { %7693 = vmatprep.subr.bf16.mxu0 %v7692_v13 }
0x22b5   :  { %7695 = vmatpush3.bf16.msra.mxu0 %v7692_v13 }
0x22b8   :  { %7108 = vmatmul.mubr.msk.f32.vlgmr.msra.gmra.mrb[72].mxu0 %vm136_vm0, %v9220_v30 }
0x22b9   :  { %7110 = vmatprep.mubr.msk.f32.mxu0 %vm136_vm0, %v9227_v31 }
0x22bc   :  { %7111 = vmatmul.mubr.msk.f32.gmra.mrb[74].mxu0 %vm136_vm0, %v9234_v37 }
0x22bd   :  { %7135 = vmatprep.mubr.msk.f32.mxu0 %vm136_vm0, %v9189_v60 }
0x238b   :  { %v7109_v33 = vpop.f32.mrb[72].mxu0 }
0x238c   :  { %v3813_v19 = vadd.f32 %v7109_v33, %v8452_v27  ;;  %v3807_v23 = vpop.f32.mrb[73].mxu0 }
0x238d   :  { %v3808_v22 = vadd.f32 %v3807_v23, %v8448_v25 }
0x238e   :  { %8015 = vtanh.f32 %v3813_v19 }
0x238f   :  { %8017 = vtanh.f32 %v3808_v22  ;;  %v7112_v35 = vpop.f32.mrb[74].mxu0 }
0x2390   :  { %v3823_v5 = vadd.f32 %v7112_v35, %v8456_v32  ;;  %v3817_v59 = vpop.f32.mrb[75].mxu0  ;;  %v9349_v35 = vstv %s3930_s0 }
0x2391   :  { %v3818_v53 = vadd.f32 %v3817_v59, %v8450_v26 }
0x2392   :  { %8019 = vtanh.f32 %v3823_v5 }
0x2393   :  { %8021 = vtanh.f32 %v3818_v53 }
0x2398   :  { %v8016_v55 = vpop.eup %8015 }
0x2399   :  { %v8018_v4 = vpop.eup %8017 }
0x239a   :  { %v7696_v40 = vpack.c.bf16 %v8016_v55, %v8018_v4 }
0x239c   :  { %v8020_v61 = vpop.eup %8019  ;;  %7697 = vmatprep.subr.bf16.mxu1 %v7696_v40 }
0x239d   :  { %v8022_v42 = vpop.eup %8021  ;;  %7699 = vmatpush3.bf16.msra.mxu1 %v7696_v40 }
0x239e   :  { %v7700_v49 = vpack.c.bf16 %v8020_v61, %v8022_v42 }
0x23a0   :  { %7701 = vmatprep.subr.bf16.mxu1 %v7700_v49 }
0x23a1   :  { %7703 = vmatpush3.bf16.msra.mxu1 %v7700_v49 }
0x23a4   :  { %7122 = vmatmul.mubr.msk.f32.vlgmr.msra.gmra.mrb[80].mxu1 %vm136_vm0, %v9247_v1 }
0x23a5   :  { %7124 = vmatprep.mubr.msk.f32.mxu1 %vm136_vm0, %v9254_v0 }
0x23a8   :  { %7125 = vmatmul.mubr.msk.f32.gmra.mrb[82].mxu1 %vm136_vm0, %v9261_v2 }
0x23a9   :  { %7149 = vmatprep.mubr.msk.f32.mxu1 %vm136_vm0, %v9268_v29 }
0x2477   :  { %v7123_v20 = vpop.f32.mrb[80].mxu1 }
0x2478   :  { %v3902_v8 = vadd.f32 %v7123_v20, %v8486_v46  ;;  %v3896_v43 = vpop.f32.mrb[81].mxu1 }
0x2479   :  { %v3897_v39 = vadd.f32 %v3896_v43, %v8488_v47 }
0x247a   :  { %v3916_v62 = vadd.f32 %v3902_v8, %v3729_v11 }
0x247b   :  { %v3915_v58 = vadd.f32 %v3897_v39, %v3728_v36  ;;  %v7126_v51 = vpop.f32.mrb[82].mxu1 }
0x247c   :  { %v3922_v18 = vmul.f32 %v3920_v45, %v3916_v62  ;;  %v3912_v12 = vadd.f32 %v7126_v51, %v8500_v54  ;;  %v3906_v52 = vpop.f32.mrb[83].mxu1 }
0x247d   :  { %v3921_v38 = vmul.f32 %v3920_v45, %v3915_v58  ;;  %v3907_v48 = vadd.f32 %v3906_v52, %v8504_v57 }
0x247e   :  { %v9311_v10 = vadd.f32 %v3922_v18, %v9116_v6  ;;  %v3918_v28 = vadd.f32 %v3912_v12, %v3731_v41 }
0x247f   :  { %v9314_v56 = vadd.f32 %v3921_v38, %v9119_v9  ;;  %v3917_v50 = vadd.f32 %v3907_v48, %v3730_v63 }
0x2480   :  { %v3924_v15 = vmul.f32 %v3920_v45, %v3918_v28 }
0x2481   :  { %v3923_v21 = vmul.f32 %v3920_v45, %v3917_v50  ;;  %v7704_v11 = vpack.c.bf16 %v9311_v10, %v9314_v56 }
0x2482   :  { %v9319_v36 = vadd.f32 %v3924_v15, %v9124_v3 }
0x2483   :  { %v9322_v14 = vadd.f32 %v3923_v21, %v9127_v7  ;;  %7705 = vmatprep.subr.bf16.mxu0 %v7704_v11 }
0x2484   :  { %7707 = vmatpush3.bf16.msra.mxu0 %v7704_v11 }
0x2485   :  { %v7708_v6 = vpack.c.bf16 %v9319_v36, %v9322_v14 }
0x2487   :  { %7709 = vmatprep.subr.bf16.mxu0 %v7708_v6 }
0x2488   :  { %7711 = vmatpush3.bf16.msra.mxu0 %v7708_v6 }
0x248b   :  { %7136 = vmatmul.mubr.msk.f32.vlgmr.msra.gmra.mrb[76].mxu0 %vm136_vm0, %v9220_v30 }
0x248c   :  { %7138 = vmatprep.mubr.msk.f32.mxu0 %vm136_vm0, %v9227_v31 }
0x248f   :  { %7139 = vmatmul.mubr.msk.f32.gmra.mrb[78].mxu0 %vm136_vm0, %v9234_v37 }
0x2490   :  { %7163 = vmatprep.mubr.msk.f32.mxu0 %vm136_vm0, %v9189_v60 }
0x255e   :  { %v7137_v9 = vpop.f32.mrb[76].mxu0 }
0x255f   :  { %v4003_v3 = vadd.f32 %v7137_v9, %v8452_v27  ;;  %v3997_v7 = vpop.f32.mrb[77].mxu0 }
0x2560   :  { %v3998_v17 = vadd.f32 %v3997_v7, %v8448_v25 }
0x2561   :  { %8023 = vtanh.f32 %v4003_v3 }
0x2562   :  { %8025 = vtanh.f32 %v3998_v17  ;;  %v7140_v16 = vpop.f32.mrb[78].mxu0 }
0x2563   :  { %v4013_v24 = vadd.f32 %v7140_v16, %v8456_v32  ;;  %v4007_v34 = vpop.f32.mrb[79].mxu0 }
0x2564   :  { %v4008_v41 = vadd.f32 %v4007_v34, %v8450_v26 }
0x2565   :  { %8027 = vtanh.f32 %v4013_v24 }
0x2566   :  { %8029 = vtanh.f32 %v4008_v41 }
0x256b   :  { %v8024_v44 = vpop.eup %8023 }
0x256c   :  { %v8026_v63 = vpop.eup %8025 }
0x256d   :  { %v7712_v13 = vpack.c.bf16 %v8024_v44, %v8026_v63 }
0x256f   :  { %v8028_v33 = vpop.eup %8027  ;;  %7713 = vmatprep.subr.bf16.mxu1 %v7712_v13 }
0x2570   :  { %v8030_v19 = vpop.eup %8029  ;;  %7715 = vmatpush3.bf16.msra.mxu1 %v7712_v13 }
0x2571   :  { %v7716_v23 = vpack.c.bf16 %v8028_v33, %v8030_v19 }
0x2573   :  { %7717 = vmatprep.subr.bf16.mxu1 %v7716_v23 }
0x2574   :  { %7719 = vmatpush3.bf16.msra.mxu1 %v7716_v23 }
0x2577   :  { %7150 = vmatmul.mubr.msk.f32.vlgmr.msra.gmra.mrb[84].mxu1 %vm136_vm0, %v9247_v1 }
0x2578   :  { %7152 = vmatprep.mubr.msk.f32.mxu1 %vm136_vm0, %v9254_v0 }
0x257b   :  { %7153 = vmatmul.mubr.msk.f32.gmra.mrb[86].mxu1 %vm136_vm0, %v9261_v2 }
0x257c   :  { %7177 = vmatprep.mubr.msk.f32.mxu1 %vm136_vm0, %v9268_v29 }
0x264a   :  { %v7151_v22 = vpop.f32.mrb[84].mxu1 }
0x264b   :  { %v9352_v5 = vadd.f32 %v7151_v22, %v8486_v46  ;;  %v4086_v59 = vpop.f32.mrb[85].mxu1 }
0x264c   :  { %v9355_v53 = vadd.f32 %v4086_v59, %v8488_v47 }
0x264d   :  { %v4107_v55 = vmul.f32 %v9349_v35, %v9352_v5 }
0x264e   :  { %v4106_v4 = vmul.f32 %v9349_v35, %v9355_v53  ;;  %v7154_v40 = vpop.f32.mrb[86].mxu1 }
0x264f   :  { %v4111_v61 = vadd.f32 %v4107_v55, %v9311_v10  ;;  %v9363_v42 = vadd.f32 %v7154_v40, %v8500_v54  ;;  %v4096_v49 = vpop.f32.mrb[87].mxu1 }
0x2650   :  { %v4110_v20 = vadd.f32 %v4106_v4, %v9314_v56  ;;  %v9367_v8 = vadd.f32 %v4096_v49, %v8504_v57 }
0x2651   :  { %v4109_v43 = vmul.f32 %v9349_v35, %v9363_v42 }
0x2652   :  { %v4108_v45 = vmul.f32 %v9349_v35, %v9367_v8  ;;  %v7720_v39 = vpack.c.bf16 %v4111_v61, %v4110_v20 }
0x2653   :  { %v4113_v62 = vadd.f32 %v4109_v43, %v9319_v36 }
0x2654   :  { %v4112_v58 = vadd.f32 %v4108_v45, %v9322_v14  ;;  %7721 = vmatprep.subr.bf16.mxu0 %v7720_v39 }
0x2655   :  { %7723 = vmatpush3.bf16.msra.mxu0 %v7720_v39 }
0x2656   :  { %v7724_v51 = vpack.c.bf16 %v4113_v62, %v4112_v58 }
0x2658   :  { %7725 = vmatprep.subr.bf16.mxu0 %v7724_v51 }
0x2659   :  { %7727 = vmatpush3.bf16.msra.mxu0 %v7724_v51 }
0x265c   :  { %7164 = vmatmul.mubr.msk.f32.vlgmr.msra.gmra.mrb[80].mxu0 %vm136_vm0, %v9220_v30 }
0x265d   :  { %7166 = vmatprep.mubr.msk.f32.mxu0 %vm136_vm0, %v9227_v31 }
0x2660   :  { %7167 = vmatmul.mubr.msk.f32.gmra.mrb[82].mxu0 %vm136_vm0, %v9234_v37 }
0x2661   :  { %7191 = vmatprep.mubr.msk.f32.mxu0 %vm136_vm0, %v9189_v60 }
0x272f   :  { %v7165_v18 = vpop.f32.mrb[80].mxu0 }
0x2730   :  { %v4186_v12 = vadd.f32 %v7165_v18, %v8452_v27  ;;  %v4180_v52 = vpop.f32.mrb[81].mxu0 }
0x2731   :  { %v4181_v38 = vadd.f32 %v4180_v52, %v8448_v25 }
0x2732   :  { %8031 = vtanh.f32 %v4186_v12 }
0x2733   :  { %8033 = vtanh.f32 %v4181_v38  ;;  %v7168_v48 = vpop.f32.mrb[82].mxu0 }
0x2734   :  { %v4196_v28 = vadd.f32 %v7168_v48, %v8456_v32  ;;  %v4190_v50 = vpop.f32.mrb[83].mxu0 }
0x2735   :  { %v4191_v15 = vadd.f32 %v4190_v50, %v8450_v26 }
0x2736   :  { %8035 = vtanh.f32 %v4196_v28 }
0x2737   :  { %8037 = vtanh.f32 %v4191_v15 }
0x273c   :  { %v8032_v21 = vpop.eup %8031 }
0x273d   :  { %v8034_v11 = vpop.eup %8033 }
0x273e   :  { %v7728_v6 = vpack.c.bf16 %v8032_v21, %v8034_v11  ;;  %v4486_v11 = vstv %s9346_s2 }
0x2740   :  { %v8036_v9 = vpop.eup %8035  ;;  %7729 = vmatprep.subr.bf16.mxu1 %v7728_v6 }
0x2741   :  { %v8038_v3 = vpop.eup %8037  ;;  %7731 = vmatpush3.bf16.msra.mxu1 %v7728_v6 }
0x2742   :  { %v7732_v7 = vpack.c.bf16 %v8036_v9, %v8038_v3 }
0x2744   :  { %7733 = vmatprep.subr.bf16.mxu1 %v7732_v7 }
0x2745   :  { %7735 = vmatpush3.bf16.msra.mxu1 %v7732_v7 }
0x2748   :  { %7178 = vmatmul.mubr.msk.f32.vlgmr.msra.gmra.mrb[88].mxu1 %vm136_vm0, %v9247_v1 }
0x2749   :  { %7180 = vmatprep.mubr.msk.f32.mxu1 %vm136_vm0, %v9254_v0 }
0x274c   :  { %7181 = vmatmul.mubr.msk.f32.gmra.mrb[90].mxu1 %vm136_vm0, %v9261_v2 }
0x274d   :  { %7205 = vmatprep.mubr.msk.f32.mxu1 %vm136_vm0, %v9268_v29 }
0x281b   :  { %v7179_v17 = vpop.f32.mrb[88].mxu1 }
0x281c   :  { %v4275_v16 = vadd.f32 %v7179_v17, %v8486_v46  ;;  %v4269_v24 = vpop.f32.mrb[89].mxu1 }
0x281d   :  { %v4270_v34 = vadd.f32 %v4269_v24, %v8488_v47 }
0x281e   :  { %v4297_v41 = vmul.f32 %v4275_v16, %v9349_v35  ;;  %v4289_v50 = vmul.f32 2.0, %v4275_v16 }
0x281f   :  { %v4296_v44 = vmul.f32 %v4270_v34, %v9349_v35  ;;  %v7182_v63 = vpop.f32.mrb[90].mxu1  ;;  %v4288_v15 = vmul.f32 2.0, %v4270_v34 }
0x2820   :  { %v4301_v13 = vadd.f32 %v4297_v41, %v9311_v10  ;;  %v4285_v33 = vadd.f32 %v7182_v63, %v8500_v54  ;;  %v4279_v19 = vpop.f32.mrb[91].mxu1  ;;  %v4293_v7 = vadd.f32 %v4289_v50, %v9352_v5 }
0x2821   :  { %v4300_v23 = vadd.f32 %v4296_v44, %v9314_v56  ;;  %v4280_v22 = vadd.f32 %v4279_v19, %v8504_v57  ;;  %v4292_v44 = vadd.f32 %v4288_v15, %v9355_v53 }
0x2822   :  { %v4299_v59 = vmul.f32 %v4285_v33, %v9349_v35  ;;  %v4291_v17 = vmul.f32 2.0, %v4285_v33 }
0x2823   :  { %v4298_v55 = vmul.f32 %v4280_v22, %v9349_v35  ;;  %v7736_v4 = vpack.c.bf16 %v4301_v13, %v4300_v23  ;;  %v4290_v63 = vmul.f32 2.0, %v4280_v22 }
0x2824   :  { %v4303_v40 = vadd.f32 %v4299_v59, %v9319_v36  ;;  %v4295_v33 = vadd.f32 %v4291_v17, %v9363_v42  ;;  %v4674_v17 = vstv %s4673_s30 }
0x2825   :  { %v4302_v61 = vadd.f32 %v4298_v55, %v9322_v14  ;;  %7737 = vmatprep.subr.bf16.mxu0 %v7736_v4  ;;  %v4294_v53 = vadd.f32 %v4290_v63, %v9367_v8 }
0x2826   :  { %7739 = vmatpush3.bf16.msra.mxu0 %v7736_v4 }
0x2827   :  { %v7740_v49 = vpack.c.bf16 %v4303_v40, %v4302_v61 }
0x2829   :  { %7741 = vmatprep.subr.bf16.mxu0 %v7740_v49 }
0x282a   :  { %7743 = vmatpush3.bf16.msra.mxu0 %v7740_v49 }
0x282d   :  { %7192 = vmatmul.mubr.msk.f32.vlgmr.msra.gmra.mrb[84].mxu0 %vm136_vm0, %v9220_v30 }
0x282e   :  { %7194 = vmatprep.mubr.msk.f32.mxu0 %vm136_vm0, %v9227_v31 }
0x2831   :  { %7195 = vmatmul.mubr.msk.f32.gmra.mrb[86].mxu0 %vm136_vm0, %v9234_v37 }
0x2832   :  { %7219 = vmatprep.mubr.msk.f32.mxu0 %vm136_vm0, %v9189_v60 }
0x2900   :  { %v7193_v35 = vpop.f32.mrb[84].mxu0 }
0x2901   :  { %v4376_v20 = vadd.f32 %v7193_v35, %v8452_v27  ;;  %v4370_v43 = vpop.f32.mrb[85].mxu0 }
0x2902   :  { %v4371_v45 = vadd.f32 %v4370_v43, %v8448_v25 }
0x2903   :  { %8039 = vtanh.f32 %v4376_v20 }
0x2904   :  { %8041 = vtanh.f32 %v4371_v45  ;;  %v7196_v39 = vpop.f32.mrb[86].mxu0 }
0x2905   :  { %v4386_v62 = vadd.f32 %v7196_v39, %v8456_v32  ;;  %v4380_v58 = vpop.f32.mrb[87].mxu0 }
0x2906   :  { %v4381_v51 = vadd.f32 %v4380_v58, %v8450_v26 }
0x2907   :  { %8043 = vtanh.f32 %v4386_v62 }
0x2908   :  { %8045 = vtanh.f32 %v4381_v51 }
0x290d   :  { %v8040_v18 = vpop.eup %8039 }
0x290e   :  { %v8042_v12 = vpop.eup %8041 }
0x290f   :  { %v7744_v52 = vpack.c.bf16 %v8040_v18, %v8042_v12 }
0x2911   :  { %v8044_v38 = vpop.eup %8043  ;;  %7745 = vmatprep.subr.bf16.mxu1 %v7744_v52 }
0x2912   :  { %v8046_v48 = vpop.eup %8045  ;;  %7747 = vmatpush3.bf16.msra.mxu1 %v7744_v52 }
0x2913   :  { %v7748_v28 = vpack.c.bf16 %v8044_v38, %v8046_v48 }
0x2915   :  { %7749 = vmatprep.subr.bf16.mxu1 %v7748_v28 }
0x2916   :  { %7751 = vmatpush3.bf16.msra.mxu1 %v7748_v28 }
0x2919   :  { %7206 = vmatmul.mubr.msk.f32.vlgmr.msra.gmra.mrb[92].mxu1 %vm136_vm0, %v9247_v1 }
0x291a   :  { %7208 = vmatprep.mubr.msk.f32.mxu1 %vm136_vm0, %v9254_v0 }
0x291d   :  { %7209 = vmatmul.mubr.msk.f32.gmra.mrb[94].mxu1 %vm136_vm0, %v9261_v2 }
0x291e   :  { %7233 = vmatprep.mubr.msk.f32.mxu1 %vm136_vm0, %v9268_v29 }
0x29ec   :  { %v7207_v21 = vpop.f32.mrb[92].mxu1 }
0x29ed   :  { %v4465_v6 = vadd.f32 %v7207_v21, %v8486_v46  ;;  %v4459_v9 = vpop.f32.mrb[93].mxu1 }
0x29ee   :  { %v4460_v3 = vadd.f32 %v4459_v9, %v8488_v47 }
0x29ef   :  { %v4479_v24 = vmul.f32 2.0, %v4465_v6  ;;  %v4488_v41 = vmul.f32 %v4486_v11, %v4465_v6 }
0x29f0   :  { %v4478_v13 = vmul.f32 2.0, %v4460_v3  ;;  %v4487_v19 = vmul.f32 %v4486_v11, %v4460_v3  ;;  %v7210_v23 = vpop.f32.mrb[94].mxu1 }
0x29f1   :  { %v4492_v16 = vadd.f32 %v4488_v41, %v9311_v10  ;;  %v4475_v34 = vadd.f32 %v7210_v23, %v8500_v54  ;;  %v4469_v59 = vpop.f32.mrb[95].mxu1  ;;  %v4483_v55 = vadd.f32 %v4479_v24, %v4293_v7 }
0x29f2   :  { %v4491_v4 = vadd.f32 %v4487_v19, %v9314_v56  ;;  %v4470_v40 = vadd.f32 %v4469_v59, %v8504_v57  ;;  %v4482_v5 = vadd.f32 %v4478_v13, %v4292_v44 }
0x29f3   :  { %v4481_v61 = vmul.f32 2.0, %v4475_v34  ;;  %v4490_v49 = vmul.f32 %v4486_v11, %v4475_v34 }
0x29f4   :  { %v4480_v22 = vmul.f32 2.0, %v4470_v40  ;;  %v4489_v35 = vmul.f32 %v4486_v11, %v4470_v40  ;;  %v7752_v20 = vpack.c.bf16 %v4492_v16, %v4491_v4 }
0x29f5   :  { %v4494_v43 = vadd.f32 %v4490_v49, %v9319_v36  ;;  %v4485_v45 = vadd.f32 %v4481_v61, %v4295_v33 }
0x29f6   :  { %v4493_v39 = vadd.f32 %v4489_v35, %v9322_v14  ;;  %7753 = vmatprep.subr.bf16.mxu0 %v7752_v20  ;;  %v4484_v62 = vadd.f32 %v4480_v22, %v4294_v53 }
0x29f7   :  { %7755 = vmatpush3.bf16.msra.mxu0 %v7752_v20 }
0x29f8   :  { %v7756_v58 = vpack.c.bf16 %v4494_v43, %v4493_v39 }
0x29fa   :  { %7757 = vmatprep.subr.bf16.mxu0 %v7756_v58 }
0x29fb   :  { %7759 = vmatpush3.bf16.msra.mxu0 %v7756_v58 }
0x29fe   :  { %7220 = vmatmul.mubr.msk.f32.vlgmr.msra.gmra.mrb[88].mxu0 %vm136_vm0, %v9220_v30 }
0x29ff   :  { %7222 = vmatprep.mubr.msk.f32.mxu0 %vm136_vm0, %v9227_v31 }
0x2a02   :  { %7223 = vmatmul.mubr.msk.f32.gmra.mrb[90].mxu0 %vm136_vm0, %v9234_v37 }
0x2a03   :  { %7247 = vmatprep.mubr.msk.f32.mxu0 %vm136_vm0, %v9189_v60 }
0x2ad1   :  { %v7221_v42 = vpop.f32.mrb[88].mxu0 }
0x2ad2   :  { %v4567_v8 = vadd.f32 %v7221_v42, %v8452_v27  ;;  %v4561_v51 = vpop.f32.mrb[89].mxu0 }
0x2ad3   :  { %v4562_v18 = vadd.f32 %v4561_v51, %v8448_v25 }
0x2ad4   :  { %8047 = vtanh.f32 %v4567_v8 }
0x2ad5   :  { %8049 = vtanh.f32 %v4562_v18  ;;  %v7224_v12 = vpop.f32.mrb[90].mxu0 }
0x2ad6   :  { %v4577_v52 = vadd.f32 %v7224_v12, %v8456_v32  ;;  %v4571_v38 = vpop.f32.mrb[91].mxu0  ;;  %v9504_v12 = vstv %s4684_s17 }
0x2ad7   :  { %v4572_v48 = vadd.f32 %v4571_v38, %v8450_v26 }
0x2ad8   :  { %8051 = vtanh.f32 %v4577_v52 }
0x2ad9   :  { %8053 = vtanh.f32 %v4572_v48 }
0x2ade   :  { %v8048_v28 = vpop.eup %8047 }
0x2adf   :  { %v8050_v50 = vpop.eup %8049 }
0x2ae0   :  { %v7760_v15 = vpack.c.bf16 %v8048_v28, %v8050_v50 }
0x2ae2   :  { %v8052_v21 = vpop.eup %8051  ;;  %7761 = vmatprep.subr.bf16.mxu1 %v7760_v15 }
0x2ae3   :  { %v8054_v11 = vpop.eup %8053  ;;  %7763 = vmatpush3.bf16.msra.mxu1 %v7760_v15 }
0x2ae4   :  { %v7764_v6 = vpack.c.bf16 %v8052_v21, %v8054_v11 }
0x2ae6   :  { %7765 = vmatprep.subr.bf16.mxu1 %v7764_v6 }
0x2ae7   :  { %7767 = vmatpush3.bf16.msra.mxu1 %v7764_v6 }
0x2aea   :  { %7234 = vmatmul.mubr.msk.f32.vlgmr.msra.gmra.mrb[96].mxu1 %vm136_vm0, %v9247_v1 }
0x2aeb   :  { %7236 = vmatprep.mubr.msk.f32.mxu1 %vm136_vm0, %v9254_v0 }
0x2aee   :  { %7237 = vmatmul.mubr.msk.f32.gmra.mrb[98].mxu1 %vm136_vm0, %v9261_v2 }
0x2aef   :  { %7261 = vmatprep.mubr.msk.f32.mxu1 %vm136_vm0, %v9268_v29 }
0x2bbd   :  { %v7235_v9 = vpop.f32.mrb[96].mxu1 }
0x2bbe   :  { %v4656_v3 = vadd.f32 %v7235_v9, %v8486_v46  ;;  %v4650_v7 = vpop.f32.mrb[97].mxu1 }
0x2bbf   :  { %v4651_v24 = vadd.f32 %v4650_v7, %v8488_v47 }
0x2bc0   :  { %v4670_v41 = vadd.f32 %v4656_v3, %v4483_v55 }
0x2bc1   :  { %v4669_v44 = vadd.f32 %v4651_v24, %v4482_v5  ;;  %v7238_v63 = vpop.f32.mrb[98].mxu1 }
0x2bc2   :  { %v4676_v13 = vmul.f32 %v4674_v17, %v4670_v41  ;;  %v4666_v19 = vadd.f32 %v7238_v63, %v8500_v54  ;;  %v4660_v23 = vpop.f32.mrb[99].mxu1 }
0x2bc3   :  { %v4675_v16 = vmul.f32 %v4674_v17, %v4669_v44  ;;  %v4661_v34 = vadd.f32 %v4660_v23, %v8504_v57 }
0x2bc4   :  { %v9466_v59 = vadd.f32 %v4676_v13, %v9311_v10  ;;  %v4672_v4 = vadd.f32 %v4666_v19, %v4485_v45 }
0x2bc5   :  { %v9469_v40 = vadd.f32 %v4675_v16, %v9314_v56  ;;  %v4671_v33 = vadd.f32 %v4661_v34, %v4484_v62 }
0x2bc6   :  { %v4678_v61 = vmul.f32 %v4674_v17, %v4672_v4 }
0x2bc7   :  { %v4677_v49 = vmul.f32 %v4674_v17, %v4671_v33  ;;  %v7768_v55 = vpack.c.bf16 %v9466_v59, %v9469_v40 }
0x2bc8   :  { %v9474_v5 = vadd.f32 %v4678_v61, %v9319_v36 }
0x2bc9   :  { %v9477_v53 = vadd.f32 %v4677_v49, %v9322_v14  ;;  %7769 = vmatprep.subr.bf16.mxu0 %v7768_v55 }
0x2bca   :  { %7771 = vmatpush3.bf16.msra.mxu0 %v7768_v55 }
0x2bcb   :  { %v7772_v10 = vpack.c.bf16 %v9474_v5, %v9477_v53 }
0x2bcd   :  { %7773 = vmatprep.subr.bf16.mxu0 %v7772_v10 }
0x2bce   :  { %7775 = vmatpush3.bf16.msra.mxu0 %v7772_v10 }
0x2bd1   :  { %7248 = vmatmul.mubr.msk.f32.vlgmr.msra.gmra.mrb[92].mxu0 %vm136_vm0, %v9220_v30 }
0x2bd2   :  { %7250 = vmatprep.mubr.msk.f32.mxu0 %vm136_vm0, %v9227_v31 }
0x2bd5   :  { %7251 = vmatmul.mubr.msk.f32.gmra.mrb[94].mxu0 %vm136_vm0, %v9234_v37 }
0x2bd6   :  { %7275 = vmatprep.mubr.msk.f32.mxu0 %vm136_vm0, %v9189_v60 }
0x2ca4   :  { %v7249_v56 = vpop.f32.mrb[92].mxu0 }
0x2ca5   :  { %v4757_v36 = vadd.f32 %v7249_v56, %v8452_v27  ;;  %v4751_v14 = vpop.f32.mrb[93].mxu0 }
0x2ca6   :  { %v4752_v22 = vadd.f32 %v4751_v14, %v8448_v25 }
0x2ca7   :  { %8055 = vtanh.f32 %v4757_v36 }
0x2ca8   :  { %8057 = vtanh.f32 %v4752_v22  ;;  %v7252_v35 = vpop.f32.mrb[94].mxu0 }
0x2ca9   :  { %v4767_v20 = vadd.f32 %v7252_v35, %v8456_v32  ;;  %v4761_v43 = vpop.f32.mrb[95].mxu0 }
0x2caa   :  { %v4762_v45 = vadd.f32 %v4761_v43, %v8450_v26 }
0x2cab   :  { %8059 = vtanh.f32 %v4767_v20 }
0x2cac   :  { %8061 = vtanh.f32 %v4762_v45 }
0x2cb1   :  { %v8056_v39 = vpop.eup %8055 }
0x2cb2   :  { %v8058_v62 = vpop.eup %8057 }
0x2cb3   :  { %v7776_v58 = vpack.c.bf16 %v8056_v39, %v8058_v62 }
0x2cb5   :  { %v8060_v42 = vpop.eup %8059  ;;  %7777 = vmatprep.subr.bf16.mxu1 %v7776_v58 }
0x2cb6   :  { %v8062_v8 = vpop.eup %8061  ;;  %7779 = vmatpush3.bf16.msra.mxu1 %v7776_v58 }
0x2cb7   :  { %v7780_v51 = vpack.c.bf16 %v8060_v42, %v8062_v8 }
0x2cb9   :  { %7781 = vmatprep.subr.bf16.mxu1 %v7780_v51 }
0x2cba   :  { %7783 = vmatpush3.bf16.msra.mxu1 %v7780_v51 }
0x2cbd   :  { %7262 = vmatmul.mubr.msk.f32.vlgmr.msra.gmra.mrb[100].mxu1 %vm136_vm0, %v9247_v1 }
0x2cbe   :  { %7264 = vmatprep.mubr.msk.f32.mxu1 %vm136_vm0, %v9254_v0 }
0x2cc1   :  { %7265 = vmatmul.mubr.msk.f32.gmra.mrb[102].mxu1 %vm136_vm0, %v9261_v2 }
0x2cc2   :  { %7289 = vmatprep.mubr.msk.f32.mxu1 %vm136_vm0, %v9268_v29 }
0x2d90   :  { %v7263_v18 = vpop.f32.mrb[100].mxu1 }
0x2d91   :  { %v9507_v52 = vadd.f32 %v7263_v18, %v8486_v46  ;;  %v4840_v38 = vpop.f32.mrb[101].mxu1 }
0x2d92   :  { %v9510_v48 = vadd.f32 %v4840_v38, %v8488_v47 }
0x2d93   :  { %v4861_v28 = vmul.f32 %v9504_v12, %v9507_v52 }
0x2d94   :  { %v4860_v50 = vmul.f32 %v9504_v12, %v9510_v48  ;;  %v7266_v15 = vpop.f32.mrb[102].mxu1 }
0x2d95   :  { %v4865_v21 = vadd.f32 %v4861_v28, %v9466_v59  ;;  %v9518_v11 = vadd.f32 %v7266_v15, %v8500_v54  ;;  %v4850_v6 = vpop.f32.mrb[103].mxu1 }
0x2d96   :  { %v4864_v9 = vadd.f32 %v4860_v50, %v9469_v40  ;;  %v9522_v3 = vadd.f32 %v4850_v6, %v8504_v57 }
0x2d97   :  { %v4863_v7 = vmul.f32 %v9504_v12, %v9518_v11 }
0x2d98   :  { %v4862_v17 = vmul.f32 %v9504_v12, %v9522_v3  ;;  %v7784_v24 = vpack.c.bf16 %v4865_v21, %v4864_v9 }
0x2d99   :  { %v4867_v41 = vadd.f32 %v4863_v7, %v9474_v5 }
0x2d9a   :  { %v4866_v44 = vadd.f32 %v4862_v17, %v9477_v53  ;;  %7785 = vmatprep.subr.bf16.mxu0 %v7784_v24 }
0x2d9b   :  { %7787 = vmatpush3.bf16.msra.mxu0 %v7784_v24 }
0x2d9c   :  { %v7788_v63 = vpack.c.bf16 %v4867_v41, %v4866_v44 }
0x2d9e   :  { %7789 = vmatprep.subr.bf16.mxu0 %v7788_v63 }
0x2d9f   :  { %7791 = vmatpush3.bf16.msra.mxu0 %v7788_v63 }
0x2da2   :  { %7276 = vmatmul.mubr.msk.f32.vlgmr.msra.gmra.mrb[96].mxu0 %vm136_vm0, %v9220_v30 }
0x2da3   :  { %7278 = vmatprep.mubr.msk.f32.mxu0 %vm136_vm0, %v9227_v31 }
0x2da6   :  { %7279 = vmatmul.mubr.msk.f32.gmra.mrb[98].mxu0 %vm136_vm0, %v9234_v37 }
0x2da7   :  { %7303 = vmatprep.mubr.msk.f32.mxu0 %vm136_vm0, %v9189_v60 }
0x2e75   :  { %v7277_v13 = vpop.f32.mrb[96].mxu0 }
0x2e76   :  { %v4940_v19 = vadd.f32 %v7277_v13, %v8452_v27  ;;  %v4934_v23 = vpop.f32.mrb[97].mxu0 }
0x2e77   :  { %v4935_v16 = vadd.f32 %v4934_v23, %v8448_v25 }
0x2e78   :  { %8063 = vtanh.f32 %v4940_v19 }
0x2e79   :  { %8065 = vtanh.f32 %v4935_v16  ;;  %v7280_v34 = vpop.f32.mrb[98].mxu0 }
0x2e7a   :  { %v4950_v4 = vadd.f32 %v7280_v34, %v8456_v32  ;;  %v4944_v33 = vpop.f32.mrb[99].mxu0 }
0x2e7b   :  { %v4945_v61 = vadd.f32 %v4944_v33, %v8450_v26  ;;  %v5240_v33 = vstv %s9501_s16 }
0x2e7c   :  { %8067 = vtanh.f32 %v4950_v4 }
0x2e7d   :  { %8069 = vtanh.f32 %v4945_v61 }
0x2e82   :  { %v8064_v49 = vpop.eup %8063 }
0x2e83   :  { %v8066_v55 = vpop.eup %8065 }
0x2e84   :  { %v7792_v10 = vpack.c.bf16 %v8064_v49, %v8066_v55 }
0x2e86   :  { %v8068_v60 = vpop.eup %8067  ;;  %7793 = vmatprep.subr.bf16.mxu1 %v7792_v10 }
0x2e87   :  { %v8070_v56 = vpop.eup %8069  ;;  %7795 = vmatpush3.bf16.msra.mxu1 %v7792_v10 }
0x2e88   :  { %v7796_v36 = vpack.c.bf16 %v8068_v60, %v8070_v56 }
0x2e8a   :  { %7797 = vmatprep.subr.bf16.mxu1 %v7796_v36 }
0x2e8b   :  { %7799 = vmatpush3.bf16.msra.mxu1 %v7796_v36 }
0x2e8e   :  { %7290 = vmatmul.mubr.msk.f32.vlgmr.msra.gmra.mrb[104].mxu1 %vm136_vm0, %v9247_v1 }
0x2e8f   :  { %7292 = vmatprep.mubr.msk.f32.mxu1 %vm136_vm0, %v9254_v0 }
0x2e92   :  { %7293 = vmatmul.mubr.msk.f32.gmra.mrb[106].mxu1 %vm136_vm0, %v9261_v2 }
0x2e93   :  { %7317 = vmatprep.mubr.msk.f32.mxu1 %vm136_vm0, %v9268_v29 }
0x2f61   :  { %v7291_v14 = vpop.f32.mrb[104].mxu1 }
0x2f62   :  { %v5029_v22 = vadd.f32 %v7291_v14, %v8486_v46  ;;  %v5023_v35 = vpop.f32.mrb[105].mxu1 }
0x2f63   :  { %v5024_v20 = vadd.f32 %v5023_v35, %v8488_v47 }
0x2f64   :  { %v5051_v43 = vmul.f32 %v5029_v22, %v9504_v12  ;;  %v5043_v16 = vmul.f32 2.0, %v5029_v22 }
0x2f65   :  { %v5050_v45 = vmul.f32 %v5024_v20, %v9504_v12  ;;  %v7294_v39 = vpop.f32.mrb[106].mxu1  ;;  %v5042_v34 = vmul.f32 2.0, %v5024_v20 }
0x2f66   :  { %v5055_v62 = vadd.f32 %v5051_v43, %v9466_v59  ;;  %v5039_v58 = vadd.f32 %v7294_v39, %v8500_v54  ;;  %v5033_v42 = vpop.f32.mrb[107].mxu1 }
0x2f67   :  { %v5054_v8 = vadd.f32 %v5050_v45, %v9469_v40  ;;  %v5034_v51 = vadd.f32 %v5033_v42, %v8504_v57  ;;  %v5046_v56 = vadd.f32 %v5042_v34, %v9510_v48 }
0x2f68   :  { %v5053_v18 = vmul.f32 %v5039_v58, %v9504_v12  ;;  %v5045_v10 = vmul.f32 2.0, %v5039_v58 }
0x2f69   :  { %v5052_v38 = vmul.f32 %v5034_v51, %v9504_v12  ;;  %v7800_v28 = vpack.c.bf16 %v5055_v62, %v5054_v8  ;;  %v8127_v12 = vld [vmem:[%s9720_s4] sm:$0xff] }
0x2f6a   :  { %v5057_v50 = vadd.f32 %v5053_v18, %v9474_v5  ;;  %v5049_v62 = vadd.f32 %v5045_v10, %v9518_v11  ;;  %v8128_v11 = vld [vmem:[%s9720_s4 + $0x8] sm:$0xff] }
0x2f6b   :  { %v5056_v15 = vadd.f32 %v5052_v38, %v9477_v53  ;;  %7801 = vmatprep.subr.bf16.mxu0 %v7800_v28 }
0x2f6c   :  { %7803 = vmatpush3.bf16.msra.mxu0 %v7800_v28 }
0x2f6d   :  { %v7804_v21 = vpack.c.bf16 %v5057_v50, %v5056_v15 }
0x2f6f   :  { %7805 = vmatprep.subr.bf16.mxu0 %v7804_v21 }
0x2f70   :  { %7807 = vmatpush3.bf16.msra.mxu0 %v7804_v21 }
0x2f73   :  { %7304 = vmatmul.mubr.msk.f32.vlgmr.msra.gmra.mrb[100].mxu0 %vm136_vm0, %v9220_v30 }
0x2f74   :  { %7306 = vmatprep.mubr.msk.f32.mxu0 %vm136_vm0, %v9227_v31 }
0x2f77   :  { %7307 = vmatmul.mubr.msk.f32.gmra.mrb[102].mxu0 %vm136_vm0, %v9234_v37 }
0x2f78   :  { %7331 = vmatprep.mubr.msk.f32.mxu0 %vm136_vm0, %v8127_v12  ;;  %v8130_v12 = vld [vmem:[%s9720_s4 + $0x18] sm:$0xff] }
0x3046   :  { %v7305_v6 = vpop.f32.mrb[100].mxu0 }
0x3047   :  { %v5130_v9 = vadd.f32 %v7305_v6, %v8452_v27  ;;  %v5124_v7 = vpop.f32.mrb[101].mxu0 }
0x3048   :  { %v5125_v17 = vadd.f32 %v5124_v7, %v8448_v25 }
0x3049   :  { %8071 = vtanh.f32 %v5130_v9 }
0x304a   :  { %8073 = vtanh.f32 %v5125_v17  ;;  %v7308_v30 = vpop.f32.mrb[102].mxu0 }
0x304b   :  { %v5140_v31 = vadd.f32 %v7308_v30, %v8456_v32  ;;  %v5134_v24 = vpop.f32.mrb[103].mxu0 }
0x304c   :  { %v5135_v37 = vadd.f32 %v5134_v24, %v8450_v26 }
0x304d   :  { %8075 = vtanh.f32 %v5140_v31 }
0x304e   :  { %8077 = vtanh.f32 %v5135_v37 }
0x3053   :  { %v8072_v41 = vpop.eup %8071 }
0x3054   :  { %v8074_v44 = vpop.eup %8073 }
0x3055   :  { %v7808_v63 = vpack.c.bf16 %v8072_v41, %v8074_v44 }
0x3057   :  { %v8076_v13 = vpop.eup %8075  ;;  %7809 = vmatprep.subr.bf16.mxu1 %v7808_v63 }
0x3058   :  { %v8078_v19 = vpop.eup %8077  ;;  %7811 = vmatpush3.bf16.msra.mxu1 %v7808_v63 }
0x3059   :  { %v7812_v23 = vpack.c.bf16 %v8076_v13, %v8078_v19 }
0x305b   :  { %7813 = vmatprep.subr.bf16.mxu1 %v7812_v23 }
0x305c   :  { %7815 = vmatpush3.bf16.msra.mxu1 %v7812_v23  ;;  %v5442_v23 = vld [vmem:[%s9725_s9] sm:$0xff] }
0x305f   :  { %7318 = vmatmul.mubr.msk.f32.vlgmr.msra.gmra.mrb[108].mxu1 %vm136_vm0, %v9247_v1  ;;  %v5047_v1 = vadd.f32 %v5043_v16, %v9507_v52 }
0x3060   :  { %7320 = vmatprep.mubr.msk.f32.mxu1 %vm136_vm0, %v9254_v0 }
0x3063   :  { %7321 = vmatmul.mubr.msk.f32.gmra.mrb[110].mxu1 %vm136_vm0, %v9261_v2  ;;  %v5044_v2 = vmul.f32 2.0, %v5034_v51 }
0x3064   :  { %7345 = vmatprep.mubr.msk.f32.mxu1 %vm136_vm0, %v9268_v29 }
0x3065   :  { %v5048_v48 = vadd.f32 %v5044_v2, %v9522_v3  ;;  %v8129_v3 = vld [vmem:[%s9720_s4 + $0x10] sm:$0xff] }
0x3132   :  { %v7319_v4 = vpop.f32.mrb[108].mxu1 }
0x3133   :  { %v5219_v61 = vadd.f32 %v7319_v4, %v8486_v46  ;;  %v5213_v49 = vpop.f32.mrb[109].mxu1 }
0x3134   :  { %v5214_v55 = vadd.f32 %v5213_v49, %v8488_v47 }
0x3135   :  { %v5233_v60 = vmul.f32 2.0, %v5219_v61  ;;  %v5242_v0 = vmul.f32 %v5240_v33, %v5219_v61 }
0x3136   :  { %v5232_v36 = vmul.f32 2.0, %v5214_v55  ;;  %v5241_v14 = vmul.f32 %v5240_v33, %v5214_v55  ;;  %v7322_v29 = vpop.f32.mrb[110].mxu1 }
0x3137   :  { %v5246_v22 = vadd.f32 %v5242_v0, %v9466_v59  ;;  %v5229_v35 = vadd.f32 %v7322_v29, %v8500_v54  ;;  %v5223_v20 = vpop.f32.mrb[111].mxu1  ;;  %v5237_v43 = vadd.f32 %v5233_v60, %v5047_v1 }
0x3138   :  { %v5245_v45 = vadd.f32 %v5241_v14, %v9469_v40  ;;  %v5224_v39 = vadd.f32 %v5223_v20, %v8504_v57  ;;  %v5236_v52 = vadd.f32 %v5232_v36, %v5046_v56 }
0x3139   :  { %v5235_v58 = vmul.f32 2.0, %v5229_v35  ;;  %v5244_v42 = vmul.f32 %v5240_v33, %v5229_v35 }
0x313a   :  { %v5234_v8 = vmul.f32 2.0, %v5224_v39  ;;  %v5243_v51 = vmul.f32 %v5240_v33, %v5224_v39  ;;  %v7816_v18 = vpack.c.bf16 %v5246_v22, %v5245_v45  ;;  %v5428_v33 = vstv %s5427_s28  ;;  %v5441_v45 = vld [vmem:[#allocation6] sm:$0xf]  ;;  %v5439_v39 = vld [vmem:[%s9724_s8 + $0x10] sm:$0xff]  ;;  %s8168_s28 = scalar_lea.vmem %s5826_s27, 512 }
0x313b   :  { %v5248_v38 = vadd.f32 %v5244_v42, %v9474_v5  ;;  %v5239_v28 = vadd.f32 %v5235_v58, %v5049_v62  ;;  %v8245_v62 = vmov 0.0|0.0   ;;  %v8247_v58 = vmov 0.0   ;;  %v5657_v42 = vpop.permute.xlu1 %5656  ;;  %p8169_p13 = scmp.ne.s32.totalorder %s5826_s27, %s8168_s28  ;;  %p8174_p1 = scmp.lt.s32.totalorder %s8168_s28, %s8168_s28 }
0x313c   :  { %v5247_v50 = vadd.f32 %v5243_v51, %v9477_v53  ;;  %7817 = vmatprep.subr.bf16.mxu0 %v7816_v18  ;;  %v5238_v15 = vadd.f32 %v5234_v8, %v5048_v48  ;;  %v5652_v48 = vpop.permute.xlu0 %5651 }
0x313d   :  { %7819 = vmatpush3.bf16.msra.mxu0 %v7816_v18  ;;  %p8175_p2 = por %p8174_p1, %p8173_p0 }
0x313e   :  { %v7820_v21 = vpack.c.bf16 %v5248_v38, %v5247_v50 }
0x313f   :  { %v5667_v50 = vpop.permute.xlu1 %5666  ;;  %p8176_p3 = pnand %p8175_p2, %p8169_p13 }
0x3140   :  { %7821 = vmatprep.subr.bf16.mxu0 %v7820_v21 }
0x3141   :  { %7823 = vmatpush3.bf16.msra.mxu0 %v7820_v21 }
0x3144   :  { %7332 = vmatmul.mubr.msk.f32.vlgmr.msra.gmra.mrb[104].mxu0 %vm136_vm0, %v8128_v11  ;;  %v5662_v11 = vpop.permute.xlu0 %5661 }
0x3145   :  { %7334 = vmatprep.mubr.msk.f32.mxu0 %vm136_vm0, %v8129_v3 }
0x3148   :  { %7335 = vmatmul.mubr.msk.f32.gmra.mrb[106].mxu0 %vm136_vm0, %v8130_v12 }
0x3149   :  { %7359 = vmatprep.mubr.msk.f32.mxu0 %vm136_vm0, %v5442_v23 }
0x3217   :  { %v7333_v6 = vpop.f32.mrb[104].mxu0 }
0x3218   :  { %v5321_v9 = vadd.f32 %v7333_v6, %v8452_v27  ;;  %v5315_v7 = vpop.f32.mrb[105].mxu0 }
0x3219   :  { %v5316_v17 = vadd.f32 %v5315_v7, %v8448_v25  ;;  %v8131_v25 = vld [vmem:[%s9722_s6 + $0x8] sm:$0xff] }
0x321a   :  { %8079 = vtanh.f32 %v5321_v9 }
0x321b   :  { %8081 = vtanh.f32 %v5316_v17  ;;  %v7336_v30 = vpop.f32.mrb[106].mxu0 }
0x321c   :  { %v5331_v31 = vadd.f32 %v7336_v30, %v8456_v32  ;;  %v5325_v24 = vpop.f32.mrb[107].mxu0  ;;  %v8133_v32 = vld [vmem:[%s9722_s6 + $0x18] sm:$0xff] }
0x321d   :  { %v5326_v37 = vadd.f32 %v5325_v24, %v8450_v26  ;;  %v8132_v26 = vld [vmem:[%s9722_s6 + $0x10] sm:$0xff] }
0x321e   :  { %8083 = vtanh.f32 %v5331_v31 }
0x321f   :  { %8085 = vtanh.f32 %v5326_v37 }
0x3224   :  { %v8080_v41 = vpop.eup %8079 }
0x3225   :  { %v8082_v44 = vpop.eup %8081 }
0x3226   :  { %v7824_v63 = vpack.c.bf16 %v8080_v41, %v8082_v44 }
0x3228   :  { %v8084_v13 = vpop.eup %8083  ;;  %7825 = vmatprep.subr.bf16.mxu1 %v7824_v63 }
0x3229   :  { %v8086_v27 = vpop.eup %8085  ;;  %7827 = vmatpush3.bf16.msra.mxu1 %v7824_v63 }
0x322a   :  { %v7828_v19 = vpack.c.bf16 %v8084_v13, %v8086_v27  ;;  %v5698_v13 = vld [vmem:[%s9719_s3 + $0x8] sm:$0xff]  ;;  %v5697_v27 = vld [vmem:[%s9719_s3] sm:$0xff] }
0x322c   :  { %7829 = vmatprep.subr.bf16.mxu1 %v7828_v19 }
0x322d   :  { %7831 = vmatpush3.bf16.msra.mxu1 %v7828_v19 }
0x322e   :  { %7840 = vmatprep.subr.bf16.mxu1 %v8245_v62 }
0x3230   :  { %7346 = vmatmul.mubr.msk.f32.vlgmr.msra.gmra.mrb[112].mxu1 %vm136_vm0, %v8131_v25 }
0x3231   :  { %7348 = vmatprep.mubr.msk.f32.mxu1 %vm136_vm0, %v8132_v26 }
0x3234   :  { %7349 = vmatmul.mubr.msk.f32.gmra.mrb[114].mxu1 %vm136_vm0, %v8133_v32 }
0x3235   :  { %7381 = vmatprep.mubr.msk.f32.mxu1 %vm8246_vm3, %v8247_v58 }
0x3303   :  { %v7347_v16 = vpop.f32.mrb[112].mxu1 }
0x3304   :  { %v5410_v34 = vadd.f32 %v7347_v16, %v8486_v46  ;;  %v5404_v4 = vpop.f32.mrb[113].mxu1 }
0x3305   :  { %v5405_v61 = vadd.f32 %v5404_v4, %v8488_v47 }
0x3306   :  { %v5424_v49 = vadd.f32 %v5410_v34, %v5237_v43  ;;  %v5700_v34 = vld [vmem:[%s9719_s3 + $0x18] sm:$0xff] }
0x3307   :  { %v5423_v55 = vadd.f32 %v5405_v61, %v5236_v52  ;;  %v7350_v1 = vpop.f32.mrb[114].mxu1  ;;  %v5440_v52 = vld [vmem:[%s9724_s8 + $0x18] sm:$0xff] }
0x3308   :  { %v5430_v10 = vmul.f32 %v5428_v33, %v5424_v49  ;;  %v5420_v60 = vadd.f32 %v7350_v1, %v8500_v54  ;;  %v5414_v0 = vpop.f32.mrb[115].mxu1 }
0x3309   :  { %v5429_v56 = vmul.f32 %v5428_v33, %v5423_v55  ;;  %v5415_v2 = vadd.f32 %v5414_v0, %v8504_v57  ;;  %v5443_v57 = vld [vmem:[%s9725_s9 + $0x8] sm:$0xff] }
0x330a   :  { %v5426_v36 = vadd.f32 %v5420_v60, %v5239_v28  ;;  %v5434_v14 = vadd.f32 %v5430_v10, %v9466_v59  ;;  %v5444_v59 = vld [vmem:[%s9725_s9 + $0x10] sm:$0xff] }
0x330b   :  { %v5425_v29 = vadd.f32 %v5415_v2, %v5238_v15  ;;  %v5433_v46 = vadd.f32 %v5429_v56, %v9469_v40  ;;  %v5445_v40 = vld [vmem:[%s9725_s9 + $0x18] sm:$0xff] }
0x330c   :  { %v5432_v22 = vmul.f32 %v5428_v33, %v5426_v36 }
0x330d   :  { %v5431_v35 = vmul.f32 %v5428_v33, %v5425_v29  ;;  %v7832_v20 = vpack.c.bf16 %v5434_v14, %v5433_v46  ;;  %v5699_v33 = vld [vmem:[%s9719_s3 + $0x10] sm:$0xff] }
0x330e   :  { %v5436_v47 = vadd.f32 %v5432_v22, %v9474_v5  ;;  %v5437_v5 = vld [vmem:[%s9724_s8] sm:$0xff] }
0x330f   :  { %7833 = vmatprep.subr.bf16.mxu0 %v7832_v20  ;;  %v5435_v43 = vadd.f32 %v5431_v35, %v9477_v53  ;;  %v5438_v53 = vld [vmem:[%s9724_s8 + $0x8] sm:$0xff] }
0x3310   :  { %7835 = vmatpush3.bf16.msra.mxu0 %v7832_v20 }
0x3311   :  { %v7836_v54 = vpack.c.bf16 %v5436_v47, %v5435_v43 }
0x3313   :  { %7837 = vmatprep.subr.bf16.mxu0 %v7836_v54 }
0x3314   :  { %7839 = vmatpush3.bf16.msra.mxu0 %v7836_v54 }
0x3315   :  { %7365 = vmatprep.subr.msk.mxu0 %vm5556_vm1, %v5441_v45 }
0x3317   :  { %7360 = vmatmul.mubr.msk.f32.vlgmr.msra.gmra.mrb[108].mxu0 %vm136_vm0, %v5443_v57 }
0x3318   :  { %7366 = vmatpush3.msk.msra.mxu0 %vm5556_vm1, %v5441_v45  ;;  %7362 = vmatprep.mubr.msk.f32.mxu0 %vm136_vm0, %v5444_v59  ;;  %v5721_v45 = vld [vmem:[%s9727_s11] sm:$0xff] }
0x331b   :  { %7363 = vmatmul.mubr.msk.f32.gmra.mrb[110].mxu0 %vm136_vm0, %v5445_v40 }
0x331c   :  { %7367 = vmatprep.mubr.msk.f32.mxu0 %vm5543_vm2, %v5437_v5 }
0x331f   :  { %7368 = vmatmul.mubr.msk.f32.vlgmr.msra.gmra.mrb[108].mxu0 %vm5543_vm2, %v5438_v53 }
0x3320   :  { %7370 = vmatprep.mubr.msk.f32.mxu0 %vm5543_vm2, %v5439_v39 }
0x3323   :  { %7371 = vmatmul.mubr.msk.f32.gmra.mrb[110].mxu0 %vm5543_vm2, %v5440_v52 }
0x33f2   :  { %v7369_v8 = vpop.f32.mrb[108].mxu0 }
0x33f3   :  { %v5670_v51 = vadd.f32 %v7369_v8, %v5657_v42  ;;  %v5626_v18 = vpop.f32.mrb[109].mxu0 }
0x33f4   :  { %v5669_v38 = vadd.f32 %v5652_v48, %v5626_v18 }
0x33f5   :  { %v6097_v28 = vmul.f32 -1.442695, %v5670_v51 }
0x33f6   :  { %v6096_v15 = vmul.f32 -1.442695, %v5669_v38  ;;  %v7372_v21 = vpop.f32.mrb[110].mxu0 }
0x33f7   :  { %8087 = vpow2.f32 %v6097_v28  ;;  %v5672_v3 = vadd.f32 %v7372_v21, %v5667_v50  ;;  %v5636_v12 = vpop.f32.mrb[111].mxu0 }
0x33f8   :  { %8089 = vpow2.f32 %v6096_v15  ;;  %v5671_v6 = vadd.f32 %v5662_v11, %v5636_v12 }
0x33f9   :  { %v6099_v9 = vmul.f32 -1.442695, %v5672_v3 }
0x33fa   :  { %v6098_v7 = vmul.f32 -1.442695, %v5671_v6 }
0x33fb   :  { %8091 = vpow2.f32 %v6099_v9 }
0x33fc   :  { %8093 = vpow2.f32 %v6098_v7 }
0x3401   :  { %v8088_v17 = vpop.eup %8087 }
0x3402   :  { %v8090_v30 = vpop.eup %8089  ;;  %v5686_v31 = vadd.f32 1.0, %v8088_v17 }
0x3403   :  { %v5685_v24 = vadd.f32 1.0, %v8090_v30 }
0x3404   :  { %8095 = vrcp.f32 %v5686_v31 }
0x3405   :  { %v8092_v37 = vpop.eup %8091  ;;  %8097 = vrcp.f32 %v5685_v24 }
0x3406   :  { %v8094_v41 = vpop.eup %8093  ;;  %v5688_v44 = vadd.f32 1.0, %v8092_v37 }
0x3407   :  { %v5687_v63 = vadd.f32 1.0, %v8094_v41 }
0x3408   :  { %8099 = vrcp.f32 %v5688_v44 }
0x3409   :  { %8101 = vrcp.f32 %v5687_v63 }
0x340e   :  { %v8096_v19 = vpop.eup %8095 }
0x340f   :  { %v8098_v25 = vpop.eup %8097  ;;  %v5702_v26 = vmul.f32 %v8096_v19, %v5698_v13  ;;  %v5706_v32 = vmul.f32 %v8096_v19, %v8096_v19 }
0x3410   :  { %v5701_v23 = vmul.f32 %v8098_v25, %v5697_v27  ;;  %v5705_v16 = vmul.f32 %v8098_v25, %v8098_v25 }
0x3411   :  { %v5710_v4 = vadd.f32 %v5706_v32, %v5702_v26 }
0x3412   :  { %v8100_v61 = vpop.eup %8099  ;;  %v5709_v49 = vadd.f32 %v5705_v16, %v5701_v23 }
0x3413   :  { %v8102_v55 = vpop.eup %8101  ;;  %8103 = vtanh.f32 %v5710_v4  ;;  %5807 = vst [vmem:[#allocation10 + $0x8] sm:$0xff] %v5710_v4  ;;  %v5704_v1 = vmul.f32 %v8100_v61, %v5700_v34  ;;  %v5708_v10 = vmul.f32 %v8100_v61, %v8100_v61 }
0x3414   :  { %8105 = vtanh.f32 %v5709_v49  ;;  %5806 = vst [vmem:[#allocation10] sm:$0xff] %v5709_v49  ;;  %v5703_v60 = vmul.f32 %v8102_v55, %v5699_v33  ;;  %v5707_v0 = vmul.f32 %v8102_v55, %v8102_v55 }
0x3415   :  { %v5712_v56 = vadd.f32 %v5708_v10, %v5704_v1 }
0x3416   :  { %v5711_v2 = vadd.f32 %v5707_v0, %v5703_v60 }
0x3417   :  { %8107 = vtanh.f32 %v5712_v56  ;;  %5809 = vst [vmem:[#allocation10 + $0x18] sm:$0xff] %v5712_v56 }
0x3418   :  { %8109 = vtanh.f32 %v5711_v2  ;;  %5808 = vst [vmem:[#allocation10 + $0x10] sm:$0xff] %v5711_v2 }
0x341d   :  { %v8104_v36 = vpop.eup %8103 }
0x341e   :  { %v8106_v14 = vpop.eup %8105  ;;  %v5718_v29 = vmul.f32 %v8104_v36, %v8096_v19 }
0x341f   :  { %v5717_v46 = vmul.f32 %v8106_v14, %v8098_v25 }
0x3420   :  { %5803 = vst [vmem:[#allocation8 + $0x8] sm:$0xff] %v5718_v29 }
0x3421   :  { %v8108_v22 = vpop.eup %8107  ;;  %v7841_v35 = vpack.c.bf16 %v5718_v29, %v5717_v46  ;;  %5802 = vst [vmem:[#allocation8] sm:$0xff] %v5717_v46 }
0x3422   :  { %v8110_v20 = vpop.eup %8109  ;;  %v5720_v47 = vmul.f32 %v8108_v22, %v8100_v61 }
0x3423   :  { %7842 = vmatpush3.bf16.msra.mxu1 %v7841_v35  ;;  %v5719_v43 = vmul.f32 %v8110_v20, %v8102_v55 }
0x3424   :  { %7843 = vmatprep.subr.bf16.mxu1 %v8245_v62  ;;  %5805 = vst [vmem:[#allocation8 + $0x18] sm:$0xff] %v5720_v47 }
0x3425   :  { %v7844_v54 = vpack.c.bf16 %v5720_v47, %v5719_v43  ;;  %5804 = vst [vmem:[#allocation8 + $0x10] sm:$0xff] %v5719_v43 }
0x3427   :  { %7845 = vmatpush3.bf16.msra.mxu1 %v7844_v54 }
0x342a   :  { %7382 = vmatmul.mubr.msk.f32.vlgmr.msra.gmra.mrb[116].mxu1 %vm136_vm0, %v5721_v45 }
0x342b   :  { %8179 = shalt.err (!%p8176_p3)
}
0x342c   :  { %s8180_s2 = scalar_lea.hbm %s9730_s14, 512 }
0x342d   :  { %p8181_p4 = scmp.ne.s32.totalorder %s9730_s14, %s8180_s2  ;;  %p8184_p5 = scmp.lt.u32.totalorder %s8180_s2, %s9730_s14 }
0x342f   :  { %p8186_p6 = pnand %p8184_p5, %p8181_p4 }
0x3431   :  { %8189 = shalt.err (!%p8186_p6)
}
0x3432   :  { %s8249_s17 = smov 128   ;;  %s8250_s18 = smov 8  }
0x3433   :  { %5831 = dma.vmem_to_hbm [thread:$0]  %s5826_s27, 512, %s9730_s14, [#allocation9], %s8249_s17, %s8249_s17, %s8250_s18  }
0x3434   :  { %s8251_s20 = smov [#allocation10]  }
0x3435   :  { %s5837_s21 = sshll.u32 %s8251_s20, 4  ;;  %s5838_s21 = int_to_ptr.vmem [resolvable:$true] %s5837_s21 }
0x3436   :  { %s8190_s22 = scalar_lea.vmem %s5838_s21, 512  ;;  %p8195_p8 = scmp.lt.s32.totalorder %s5838_s21, %s5838_s21 }
0x3437   :  { %p8191_p7 = scmp.ne.s32.totalorder %s5838_s21, %s8190_s22  ;;  %p8196_p9 = scmp.lt.s32.totalorder %s8190_s22, %s8190_s22 }
0x3439   :  { %p8197_p10 = por %p8196_p9, %p8195_p8 }
0x343b   :  { %p8198_p11 = pnand %p8197_p10, %p8191_p7 }
0x343d   :  { %8201 = shalt.err (!%p8198_p11)
}
0x343e   :  { %s8202_s23 = scalar_lea.hbm %s9731_s15, 512 }
0x343f   :  { %p8203_p12 = scmp.ne.s32.totalorder %s9731_s15, %s8202_s23  ;;  %p8206_p13 = scmp.lt.u32.totalorder %s8202_s23, %s9731_s15 }
0x3441   :  { %p8208_p0 = pnand %p8206_p13, %p8203_p12 }
0x3443   :  { %8211 = shalt.err (!%p8208_p0)
}
0x3444   :  { %5843 = dma.vmem_to_hbm [thread:$0]  %s5838_s21, 512, %s9731_s15, [#allocation9], %s8249_s17, %s8249_s17, %s8250_s18   ;;  %v5726_v57 = vpop.permute.xlu0 %5725 }
0x3445   :  { %s8252_s24 = smov [#allocation7]  }
0x3446   :  { %s5816_s3 = sshll.u32 %s8252_s24, 4  ;;  %s5817_s3 = int_to_ptr.vmem [resolvable:$true] %s5816_s3 }
0x3447   :  { %s8212_s5 = scalar_lea.vmem %s5817_s3, 128  ;;  %p8217_p2 = scmp.lt.s32.totalorder %s5817_s3, %s5817_s3 }
0x3448   :  { %p8213_p1 = scmp.ne.s32.totalorder %s5817_s3, %s8212_s5  ;;  %p8218_p3 = scmp.lt.s32.totalorder %s8212_s5, %s8212_s5 }
0x344a   :  { %p8219_p4 = por %p8218_p3, %p8217_p2 }
0x344c   :  { %p8220_p5 = pnand %p8219_p4, %p8213_p1 }
0x34fd   :  { %v5797_v59 = vpop.f32.mrb[116].mxu1 }
0x34fe   :  { %v5798_v40 = vadd.f32 %v5797_v59, %v5726_v57  ;;  %v7383_v5 = vpop.f32.mrb[117].mxu1 }
0x3500   :  { %5801 = vst [vmem:[#allocation7] sm:$0xff] %v5798_v40 }
0x3501   :  { %8223 = shalt.err (!%p8220_p5)
}
0x3502   :  { %s8224_s28 = scalar_lea.hbm %s9729_s13, 128 }
0x3503   :  { %p8225_p6 = scmp.ne.s32.totalorder %s9729_s13, %s8224_s28  ;;  %p8228_p7 = scmp.lt.u32.totalorder %s8224_s28, %s9729_s13 }
0x3505   :  { %p8230_p8 = pnand %p8228_p7, %p8225_p6 }
0x3507   :  { %8233 = shalt.err (!%p8230_p8)
}
0x3508   :  { %5819 = dma.vmem_to_hbm [thread:$0]  %s5817_s3, 128, %s9729_s13, [#allocation4]  }
0x3509   :  { %8238 = dma.done.wait [#allocation4], 128  }
0x350a   :  { %8239 = vsyncadd [#allocation4], 4294967168 }
0x350b   :  { %8240 = dma.done.wait [#allocation9], 1024  }
0x350c   :  { %8241 = vsyncadd [#allocation9], 4294966272 }
0x350d   :  { %5853 = vsyncpa [#allocation3], 1 }
0x350e   :  { %5854 = vsyncpa [#allocation4], 1 }
0x350f   :  { %5855 = vsyncpa [#allocation9], 1 }
0x3510   :  { %5856 = vsyncpa [#allocation5], 1 }

</bundles_post_ra>
